<compile_context>
chip_gen: v7x
topology: tpu7x:2x2x1
jax: 0.10.0
libtpu: 0.0.40
codegen_flags: <defaults>
</compile_context>

<pallas_src>
import functools

import jax
import jax.numpy as jnp
from jax import lax
from jax.experimental import pallas as pl
from jax.experimental.pallas import tpu as pltpu


# --------------------------------------------------------------- hardware queries


def _vmem_capacity_bytes():
    try:
        return int(pltpu.get_tpu_info().vmem_capacity_bytes)
    except Exception:
        try:
            kind = jax.devices()[0].device_kind.lower()
        except Exception:
            kind = ""
        return 64 * 1024 * 1024 if "v7" in kind else 128 * 1024 * 1024


def _vmem_budget_bytes():
    # 85% of physical VMEM: leaves compiler/semaphore headroom on v7x (64 MiB
    # part) while letting v5e/v6e (128 MiB parts) use ~108 MiB.
    return int(0.85 * _vmem_capacity_bytes())


def _prefer_split_conv():
    # v5e MXU is 128-deep: two K=C dots beat one K=2C concat-matmul (and skip the
    # [N, 2C] bf16 concat copy).  v6e/v7x MXUs are 256-deep -> keep the fused form.
    try:
        kind = jax.devices()[0].device_kind.lower()
    except Exception:
        return False
    return ("v5 lite" in kind) or ("v5e" in kind) or ("v5lite" in kind)


# --------------------------------------------------------------------- small utils


def _round_up(n, m=128):
    return ((n + m - 1) // m) * m


def _pad2(x, rows, cols, dtype=None):
    """Zero-pad a 2D array to [rows, cols] (exact: padded weights contribute 0)."""
    out = jnp.pad(x, ((0, rows - x.shape[0]), (0, cols - x.shape[1])))
    return out.astype(dtype) if dtype is not None else out


# -------------------------------------------------------- graph preprocessing (cached)


def build_graph(edge_index, num_nodes, reduction_type="mean"):
    """Precompute the dense adjacency ONCE (the graph is static).

    A[dst, src] += 1 per edge (multigraph-correct; integer counts are exact in
    bf16).  For "mean" reduction the f32 per-row 1/deg scale is returned
    separately and applied to the aggregate inside the kernel.
    """
    a = jnp.zeros((num_nodes, num_nodes), jnp.float32)
    a = a.at[edge_index[1], edge_index[0]].add(1.0)
    deg = jnp.sum(a, axis=1, keepdims=True)
    if reduction_type == "mean":
        inv_deg = jnp.where(deg > 0, 1.0 / jnp.maximum(deg, 1.0), 0.0)
    else:
        inv_deg = jnp.ones_like(deg)
    return a.astype(jnp.bfloat16), inv_deg.astype(jnp.float32)


# --------------------------------------------------------------- parameter packing


def _padded_params(params, fp, ep, hp, cp):
    bf16, f32 = jnp.bfloat16, jnp.float32

    def fuse(ws, wn, b, cin_p, cout_p):
        wc = jnp.concatenate(
            [_pad2(ws, cin_p, cout_p), _pad2(wn, cin_p, cout_p)], axis=0
        ).astype(bf16)  # [2*cin_p, cout_p] stacked self/neighbor weights
        return wc, _pad2(b, 1, cout_p, f32)

    wc1, bc1 = fuse(params["ws1"], params["wn1"], params["bc1"], ep, hp)
    wc2, bc2 = fuse(params["ws2"], params["wn2"], params["bc2"], hp, hp)
    wc3, bc3 = fuse(params["ws3"], params["wn3"], params["bc3"], hp, hp)

    return dict(
        w1=_pad2(params["w1"], fp, ep, bf16), b1=_pad2(params["b1"], 1, ep, f32),
        wc1=wc1, bc1=bc1, wc2=wc2, bc2=bc2, wc3=wc3, bc3=bc3,
        gamma=_pad2(params["gamma"], 1, hp, f32),
        beta=_pad2(params["beta"], 1, hp, f32),
        w2=_pad2(params["w2"], hp, cp, bf16), b2=_pad2(params["b2"], 1, cp, f32),
        w3=_pad2(params["w3"], cp, cp, bf16), b3=_pad2(params["b3"], 1, cp, f32),
    )


# -------------------------------------------------------- resident (fused) kernel


def _p1gcn2_resident_kernel(
    x_ref, a_ref, invdeg_ref,
    w1_ref, b1_ref,
    wc1_ref, bc1_ref, wc2_ref, bc2_ref, wc3_ref, bc3_ref,
    gamma_ref, beta_ref,
    w2_ref, b2_ref, w3_ref, b3_ref,
    out_ref, *, ep, hp, split_conv,
):
    bf16 = jnp.bfloat16
    x = x_ref[...]            # [N, Fp]  bf16
    a = a_ref[...]            # [N, N]   bf16 (binary/integer edge counts, exact)
    inv_deg = invdeg_ref[...]  # [N, 1]   f32

    # linmaps1: identity (singleton reference domains).

    # lin1 + relu (bf16 MXU inputs, f32 accumulate).  dropout (eval): identity.
    h = jnp.dot(x, w1_ref[...], preferred_element_type=jnp.float32) + b1_ref[...]
    h = jnp.maximum(h, 0.0)

    def conv1p(h, wc_ref, b_ref, cin_p):
        hb = h.astype(bf16)
        # Neighbor "gather"; f32 1/deg row scale keeps "mean" normalization exact.
        agg = jnp.dot(a, hb, preferred_element_type=jnp.float32) * inv_deg
        ab = agg.astype(bf16)
        if split_conv:
            # v5e: two K=Cin dots (128-deep MXU), no concat copy.
            y = (jnp.dot(hb, wc_ref[:cin_p, :], preferred_element_type=jnp.float32)
                 + jnp.dot(ab, wc_ref[cin_p:, :], preferred_element_type=jnp.float32))
        else:
            # v6e/v7x: fused K=2*Cin matmul fills the 256-deep MXU.
            cat = jnp.concatenate([hb, ab], axis=-1)
            y = jnp.dot(cat, wc_ref[...], preferred_element_type=jnp.float32)
        return y + b_ref[...]

    h = conv1p(h, wc1_ref, bc1_ref, ep)
    h = conv1p(h, wc2_ref, bc2_ref, hp)
    h = conv1p(h, wc3_ref, bc3_ref, hp)

    # BatchNorm over nodes (batch statistics), two-pass variance (cancellation-safe).
    mu = jnp.mean(h, axis=0, keepdims=True)
    d = h - mu
    var = jnp.mean(d * d, axis=0, keepdims=True)
    h = d * lax.rsqrt(var + 1e-5) * gamma_ref[...] + beta_ref[...]

    # lin2 + relu, dropout (eval identity), lin3.
    h = jnp.dot(h.astype(bf16), w2_ref[...], preferred_element_type=jnp.float32) + b2_ref[...]
    h = jnp.maximum(h, 0.0)
    y = jnp.dot(h.astype(bf16), w3_ref[...], preferred_element_type=jnp.float32) + b3_ref[...]

    out_ref[...] = y          # linmaps0: identity; lane-dense [N, Cp] store.


def _forward_resident(x_p, a, inv_deg, pp, n, cp, ep, hp, split_conv, vmem_limit):
    operands = (
        x_p, a, inv_deg,
        pp["w1"], pp["b1"],
        pp["wc1"], pp["bc1"], pp["wc2"], pp["bc2"], pp["wc3"], pp["bc3"],
        pp["gamma"], pp["beta"],
        pp["w2"], pp["b2"], pp["w3"], pp["b3"],
    )
    vmem_spec = pl.BlockSpec(memory_space=pltpu.MemorySpace.VMEM)
    kern = functools.partial(_p1gcn2_resident_kernel, ep=ep, hp=hp, split_conv=split_conv)
    return pl.pallas_call(
        kern,
        out_shape=jax.ShapeDtypeStruct((n, cp), jnp.float32),
        in_specs=[vmem_spec] * len(operands),
        out_specs=vmem_spec,
        compiler_params=pltpu.CompilerParams(vmem_limit_bytes=vmem_limit),
    )(*operands)


# ---------------------------------------------------- tiled (streamed-A) kernels


def _lin_relu_kernel(x_ref, w_ref, b_ref, o_ref):
    y = jnp.dot(x_ref[...].astype(jnp.bfloat16), w_ref[...],
                preferred_element_type=jnp.float32) + b_ref[...]
    o_ref[...] = jnp.maximum(y, 0.0).astype(o_ref.dtype)


def _conv1p_tiled_kernel(a_ref, hk_ref, hi_ref, invdeg_ref, wc_ref, b_ref,
                         o_ref, acc_ref, *, cin_p, split_conv):
    k = pl.program_id(1)

    @pl.when(k == 0)
    def _():
        acc_ref[...] = jnp.zeros_like(acc_ref)

    # Stream A row-tile x k-tile from HBM; accumulate the neighbor aggregate.
    acc_ref[...] += jnp.dot(a_ref[...], hk_ref[...].astype(jnp.bfloat16),
                            preferred_element_type=jnp.float32)

    @pl.when(k == pl.num_programs(1) - 1)
    def _():
        agg = acc_ref[...] * invdeg_ref[...]        # f32 1/deg row scale ("mean")
        hb = hi_ref[...].astype(jnp.bfloat16)
        ab = agg.astype(jnp.bfloat16)
        if split_conv:
            y = (jnp.dot(hb, wc_ref[:cin_p, :], preferred_element_type=jnp.float32)
                 + jnp.dot(ab, wc_ref[cin_p:, :], preferred_element_type=jnp.float32))
        else:
            cat = jnp.concatenate([hb, ab], axis=-1)
            y = jnp.dot(cat, wc_ref[...], preferred_element_type=jnp.float32)
        o_ref[...] = (y + b_ref[...]).astype(o_ref.dtype)


def _head_tiled_kernel(h_ref, scale_ref, shift_ref, w2_ref, b2_ref, w3_ref, b3_ref, o_ref):
    h = h_ref[...] * scale_ref[...] + shift_ref[...]          # BN apply (folded)
    h = jnp.dot(h.astype(jnp.bfloat16), w2_ref[...],
                preferred_element_type=jnp.float32) + b2_ref[...]
    h = jnp.maximum(h, 0.0)
    y = jnp.dot(h.astype(jnp.bfloat16), w3_ref[...],
                preferred_element_type=jnp.float32) + b3_ref[...]
    o_ref[...] = y


def _forward_tiled(x, a, inv_deg, pp, n, fp, ep, hp, cp, split_conv, vmem_limit):
    bf16, f32 = jnp.bfloat16, jnp.float32
    tm = 512 if n >= 1024 else 256        # 512+ preferred; multiple of 256 (v6e/v7x MXU)
    tk = tm
    np_ = _round_up(n, tm)
    gdim, kdim = np_ // tm, np_ // tk

    x_p = _pad2(x.astype(f32), np_, fp, bf16)
    a_p = jnp.pad(a, ((0, np_ - n), (0, np_ - n)))          # pad rows/cols are zero
    d_p = jnp.pad(inv_deg, ((0, np_ - n), (0, 0)))

    par1 = pltpu.CompilerParams(dimension_semantics=("parallel",),
                                vmem_limit_bytes=vmem_limit)
    par2 = pltpu.CompilerParams(dimension_semantics=("parallel", "arbitrary"),
                                vmem_limit_bytes=vmem_limit)

    # lin1 + relu, row-tiled.
    h = pl.pallas_call(
        _lin_relu_kernel,
        out_shape=jax.ShapeDtypeStruct((np_, ep), f32),
        grid=(gdim,),
        in_specs=[pl.BlockSpec((tm, fp), lambda i: (i, 0)),
                  pl.BlockSpec((fp, ep), lambda i: (0, 0)),
                  pl.BlockSpec((1, ep), lambda i: (0, 0))],
        out_specs=pl.BlockSpec((tm, ep), lambda i: (i, 0)),
        compiler_params=par1,
    )(x_p, pp["w1"], pp["b1"])

    def conv_layer(h_prev, wc, bc, cin_p, cout_p):
        kern = functools.partial(_conv1p_tiled_kernel, cin_p=cin_p, split_conv=split_conv)
        return pl.pallas_call(
            kern,
            out_shape=jax.ShapeDtypeStruct((np_, cout_p), f32),
            grid=(gdim, kdim),
            in_specs=[pl.BlockSpec((tm, tk), lambda i, k: (i, k)),        # A (HBM-streamed)
                      pl.BlockSpec((tk, cin_p), lambda i, k: (k, 0)),     # h for aggregation
                      pl.BlockSpec((tm, cin_p), lambda i, k: (i, 0)),     # own features
                      pl.BlockSpec((tm, 1), lambda i, k: (i, 0)),         # 1/deg row scale
                      pl.BlockSpec((2 * cin_p, cout_p), lambda i, k: (0, 0)),
                      pl.BlockSpec((1, cout_p), lambda i, k: (0, 0))],
            out_specs=pl.BlockSpec((tm, cout_p), lambda i, k: (i, 0)),
            scratch_shapes=[pltpu.VMEM((tm, cin_p), jnp.float32)],
            compiler_params=par2,
        )(a_p, h_prev, h_prev, d_p, wc, bc)

    h = conv_layer(h, pp["wc1"], pp["bc1"], ep, hp)
    h = conv_layer(h, pp["wc2"], pp["bc2"], hp, hp)
    h = conv_layer(h, pp["wc3"], pp["bc3"], hp, hp)

    # BatchNorm statistics over the real nodes only (tiny [N, Hp] reduction; kept
    # in plain XLA — negligible next to the N^2 aggregation streamed above).
    hr = h[:n]
    mu = jnp.mean(hr, axis=0, keepdims=True)
    var = jnp.mean((hr - mu) ** 2, axis=0, keepdims=True)
    scale = pp["gamma"] * lax.rsqrt(var + 1e-5)
    shift = pp["beta"] - mu * scale

    out = pl.pallas_call(
        _head_tiled_kernel,
        out_shape=jax.ShapeDtypeStruct((np_, cp), f32),
        grid=(gdim,),
        in_specs=[pl.BlockSpec((tm, hp), lambda i: (i, 0)),
                  pl.BlockSpec((1, hp), lambda i: (0, 0)),
                  pl.BlockSpec((1, hp), lambda i: (0, 0)),
                  pl.BlockSpec((hp, cp), lambda i: (0, 0)),
                  pl.BlockSpec((1, cp), lambda i: (0, 0)),
                  pl.BlockSpec((cp, cp), lambda i: (0, 0)),
                  pl.BlockSpec((1, cp), lambda i: (0, 0))],
        out_specs=pl.BlockSpec((tm, cp), lambda i: (i, 0)),
        compiler_params=par1,
    )(h, scale, shift, pp["w2"], pp["b2"], pp["w3"], pp["b3"])
    return out[:n]


# ------------------------------------------------------------------------ forward


def p1gcn2_forward(x, graph, params, *, force_tiled=False):
    """x: [N, F_in] f32; graph: (A_bf16 [N,N], inv_deg_f32 [N,1]) from build_graph."""
    a, inv_deg = graph
    n, f = x.shape
    e_dim = params["w1"].shape[1]
    h_dim = params["ws1"].shape[1]
    c_dim = params["w3"].shape[1]
    fp, ep, hp, cp = (_round_up(v) for v in (f, e_dim, h_dim, c_dim))

    split_conv = _prefer_split_conv()
    pp = _padded_params(params, fp, ep, hp, cp)
    budget = _vmem_budget_bytes()

    # Resident footprint estimate: operands + ~6 live [N, max_dim] f32 activations.
    operand_bytes = (a.size * 2 + n * fp * 2 + inv_deg.size * 4
                     + sum(int(v.size) * v.dtype.itemsize for v in pp.values()))
    act_bytes = 6 * n * max(fp, 2 * max(ep, hp), cp) * 4
    resident_bytes = int(operand_bytes + act_bytes)

    if force_tiled or resident_bytes > budget:
        out = _forward_tiled(x, a, inv_deg, pp, n, fp, ep, hp, cp, split_conv, budget)
        return out[:, :c_dim]

    x_p = _pad2(x.astype(jnp.float32), n, fp, jnp.bfloat16)
    out = _forward_resident(x_p, a, inv_deg, pp, n, cp, ep, hp, split_conv, budget)
    return out[:, :c_dim]


# ------------------------------------------------------------------------- params


def init_params(key, num_features, embedding_dim, hidden, num_classes):
    ks = jax.random.split(key, 16)
    s = 0.1

    def w(k, shape):
        return (s * jax.random.normal(k, shape)).astype(jnp.float32)

    return {
        "w1": w(ks[0], (num_features, embedding_dim)),
        "b1": w(ks[1], (1, embedding_dim)),
        "ws1": w(ks[2], (embedding_dim, hidden)),
        "wn1": w(ks[3], (embedding_dim, hidden)),
        "bc1": w(ks[4], (1, hidden)),
        "ws2": w(ks[5], (hidden, hidden)),
        "wn2": w(ks[6], (hidden, hidden)),
        "bc2": w(ks[7], (1, hidden)),
        "ws3": w(ks[8], (hidden, hidden)),
        "wn3": w(ks[9], (hidden, hidden)),
        "bc3": w(ks[10], (1, hidden)),
        "gamma": jnp.ones((1, hidden), jnp.float32),
        "beta": jnp.zeros((1, hidden), jnp.float32),
        "w2": w(ks[11], (hidden, num_classes)),
        "b2": w(ks[12], (1, num_classes)),
        "w3": w(ks[13], (num_classes, num_classes)),
        "b3": w(ks[14], (1, num_classes)),
    }


if __name__ == "__main__":
    # Small synthetic shapes consistent with the module's forward.
    N = 320                # nodes
    NUM_FEATURES = 200     # dataset.num_features (synthetic)
    EMBEDDING_DIM = 32
    HIDDEN = 32
    NUM_CLASSES = 8        # dataset.num_classes (synthetic)
    E = 2000               # edges

    key = jax.random.PRNGKey(0)
    kx, ke, kp = jax.random.split(key, 3)

    x = jax.random.normal(kx, (N, NUM_FEATURES), dtype=jnp.float32)
    edge_index = jax.random.randint(ke, (2, E), 0, N, dtype=jnp.int32)
    params = init_params(kp, NUM_FEATURES, EMBEDDING_DIM, HIDDEN, NUM_CLASSES)

    # Graph preprocessing hoisted out of the forward (static graph, built once).
    graph = jax.block_until_ready(build_graph(edge_index, N, reduction_type="mean"))

    # Whole-graph-resident fused path (default at this size).
    out = jax.block_until_ready(p1gcn2_forward(x, graph, params))
    assert out.shape == (N, NUM_CLASSES)
    assert out.dtype == jnp.float32
    assert bool(jnp.all(jnp.isfinite(out)))

    # Tiled / HBM-streamed-adjacency path (large-N fallback); must match.
    out_tiled = jax.block_until_ready(p1gcn2_forward(x, graph, params, force_tiled=True))
    assert out_tiled.shape == (N, NUM_CLASSES)
    assert bool(jnp.all(jnp.isfinite(out_tiled)))
    assert bool(jnp.allclose(out, out_tiled, atol=2e-2, rtol=2e-2))

    print("KERNEL_OK")
</pallas_src>

<mosaic_0001>
module attributes {stable_mosaic.version = 11 : i64} {
  func.func @_p1gcn2_resident_kernel(%arg0: memref<320x256xbf16, #tpu.memory_space<vmem>>, %arg1: memref<320x320xbf16, #tpu.memory_space<vmem>>, %arg2: memref<320x1xf32, #tpu.memory_space<vmem>>, %arg3: memref<256x128xbf16, #tpu.memory_space<vmem>>, %arg4: memref<1x128xf32, #tpu.memory_space<vmem>>, %arg5: memref<256x128xbf16, #tpu.memory_space<vmem>>, %arg6: memref<1x128xf32, #tpu.memory_space<vmem>>, %arg7: memref<256x128xbf16, #tpu.memory_space<vmem>>, %arg8: memref<1x128xf32, #tpu.memory_space<vmem>>, %arg9: memref<256x128xbf16, #tpu.memory_space<vmem>>, %arg10: memref<1x128xf32, #tpu.memory_space<vmem>>, %arg11: memref<1x128xf32, #tpu.memory_space<vmem>>, %arg12: memref<1x128xf32, #tpu.memory_space<vmem>>, %arg13: memref<128x128xbf16, #tpu.memory_space<vmem>>, %arg14: memref<1x128xf32, #tpu.memory_space<vmem>>, %arg15: memref<128x128xbf16, #tpu.memory_space<vmem>>, %arg16: memref<1x128xf32, #tpu.memory_space<vmem>>, %arg17: memref<320x128xf32, #tpu.memory_space<vmem>>) attributes {dimension_semantics = [], scalar_prefetch = 0 : i64, scratch_operands = 0 : i64, tpu.core_type = #tpu.core_type<tc>} {
    %c0 = arith.constant 0 : index
    %c0_0 = arith.constant 0 : index
    %0 = vector.load %arg0[%c0, %c0_0] : memref<320x256xbf16, #tpu.memory_space<vmem>>, vector<320x256xbf16>
    %c0_1 = arith.constant 0 : index
    %c0_2 = arith.constant 0 : index
    %1 = vector.load %arg1[%c0_1, %c0_2] : memref<320x320xbf16, #tpu.memory_space<vmem>>, vector<320x320xbf16>
    %c0_3 = arith.constant 0 : index
    %c0_4 = arith.constant 0 : index
    %2 = vector.load %arg2[%c0_3, %c0_4] : memref<320x1xf32, #tpu.memory_space<vmem>>, vector<320x1xf32>
    %c0_5 = arith.constant 0 : index
    %c0_6 = arith.constant 0 : index
    %3 = vector.load %arg3[%c0_5, %c0_6] : memref<256x128xbf16, #tpu.memory_space<vmem>>, vector<256x128xbf16>
    %cst = arith.constant dense<0.000000e+00> : vector<320x128xf32>
    %4 = tpu.matmul %0, %3, %cst {dimension_numbers = #tpu.dot_dimension_numbers<[1], [0], [0], [1], [0, 0, 1, 1], [], []>} : vector<320x256xbf16>, vector<256x128xbf16>, vector<320x128xf32> -> vector<320x128xf32>
    %c0_7 = arith.constant 0 : index
    %c0_8 = arith.constant 0 : index
    %5 = vector.load %arg4[%c0_7, %c0_8] : memref<1x128xf32, #tpu.memory_space<vmem>>, vector<1x128xf32>
    %6 = vector.broadcast %5 : vector<1x128xf32> to vector<320x128xf32>
    %7 = arith.addf %4, %6 : vector<320x128xf32>
    %cst_9 = arith.constant 0.000000e+00 : f32
    %8 = vector.broadcast %cst_9 : f32 to vector<320x128xf32>
    %9 = arith.maximumf %7, %8 : vector<320x128xf32>
    %10 = arith.truncf %9 : vector<320x128xf32> to vector<320x128xbf16>
    %cst_10 = arith.constant dense<0.000000e+00> : vector<320x128xf32>
    %11 = tpu.matmul %1, %10, %cst_10 {dimension_numbers = #tpu.dot_dimension_numbers<[1], [0], [0], [1], [0, 0, 1, 1], [], []>} : vector<320x320xbf16>, vector<320x128xbf16>, vector<320x128xf32> -> vector<320x128xf32>
    %12 = vector.broadcast %2 : vector<320x1xf32> to vector<320x128xf32>
    %13 = arith.mulf %11, %12 : vector<320x128xf32>
    %14 = arith.truncf %13 : vector<320x128xf32> to vector<320x128xbf16>
    %15 = tpu.concatenate %10, %14 in 1 : vector<320x128xbf16>, vector<320x128xbf16> -> vector<320x256xbf16>
    %c0_11 = arith.constant 0 : index
    %c0_12 = arith.constant 0 : index
    %16 = vector.load %arg5[%c0_11, %c0_12] : memref<256x128xbf16, #tpu.memory_space<vmem>>, vector<256x128xbf16>
    %cst_13 = arith.constant dense<0.000000e+00> : vector<320x128xf32>
    %17 = tpu.matmul %15, %16, %cst_13 {dimension_numbers = #tpu.dot_dimension_numbers<[1], [0], [0], [1], [0, 0, 1, 1], [], []>} : vector<320x256xbf16>, vector<256x128xbf16>, vector<320x128xf32> -> vector<320x128xf32>
    %c0_14 = arith.constant 0 : index
    %c0_15 = arith.constant 0 : index
    %18 = vector.load %arg6[%c0_14, %c0_15] : memref<1x128xf32, #tpu.memory_space<vmem>>, vector<1x128xf32>
    %19 = vector.broadcast %18 : vector<1x128xf32> to vector<320x128xf32>
    %20 = arith.addf %17, %19 : vector<320x128xf32>
    %21 = arith.truncf %20 : vector<320x128xf32> to vector<320x128xbf16>
    %cst_16 = arith.constant dense<0.000000e+00> : vector<320x128xf32>
    %22 = tpu.matmul %1, %21, %cst_16 {dimension_numbers = #tpu.dot_dimension_numbers<[1], [0], [0], [1], [0, 0, 1, 1], [], []>} : vector<320x320xbf16>, vector<320x128xbf16>, vector<320x128xf32> -> vector<320x128xf32>
    %23 = vector.broadcast %2 : vector<320x1xf32> to vector<320x128xf32>
    %24 = arith.mulf %22, %23 : vector<320x128xf32>
    %25 = arith.truncf %24 : vector<320x128xf32> to vector<320x128xbf16>
    %26 = tpu.concatenate %21, %25 in 1 : vector<320x128xbf16>, vector<320x128xbf16> -> vector<320x256xbf16>
    %c0_17 = arith.constant 0 : index
    %c0_18 = arith.constant 0 : index
    %27 = vector.load %arg7[%c0_17, %c0_18] : memref<256x128xbf16, #tpu.memory_space<vmem>>, vector<256x128xbf16>
    %cst_19 = arith.constant dense<0.000000e+00> : vector<320x128xf32>
    %28 = tpu.matmul %26, %27, %cst_19 {dimension_numbers = #tpu.dot_dimension_numbers<[1], [0], [0], [1], [0, 0, 1, 1], [], []>} : vector<320x256xbf16>, vector<256x128xbf16>, vector<320x128xf32> -> vector<320x128xf32>
    %c0_20 = arith.constant 0 : index
    %c0_21 = arith.constant 0 : index
    %29 = vector.load %arg8[%c0_20, %c0_21] : memref<1x128xf32, #tpu.memory_space<vmem>>, vector<1x128xf32>
    %30 = vector.broadcast %29 : vector<1x128xf32> to vector<320x128xf32>
    %31 = arith.addf %28, %30 : vector<320x128xf32>
    %32 = arith.truncf %31 : vector<320x128xf32> to vector<320x128xbf16>
    %cst_22 = arith.constant dense<0.000000e+00> : vector<320x128xf32>
    %33 = tpu.matmul %1, %32, %cst_22 {dimension_numbers = #tpu.dot_dimension_numbers<[1], [0], [0], [1], [0, 0, 1, 1], [], []>} : vector<320x320xbf16>, vector<320x128xbf16>, vector<320x128xf32> -> vector<320x128xf32>
    %34 = vector.broadcast %2 : vector<320x1xf32> to vector<320x128xf32>
    %35 = arith.mulf %33, %34 : vector<320x128xf32>
    %36 = arith.truncf %35 : vector<320x128xf32> to vector<320x128xbf16>
    %37 = tpu.concatenate %32, %36 in 1 : vector<320x128xbf16>, vector<320x128xbf16> -> vector<320x256xbf16>
    %c0_23 = arith.constant 0 : index
    %c0_24 = arith.constant 0 : index
    %38 = vector.load %arg9[%c0_23, %c0_24] : memref<256x128xbf16, #tpu.memory_space<vmem>>, vector<256x128xbf16>
    %cst_25 = arith.constant dense<0.000000e+00> : vector<320x128xf32>
    %39 = tpu.matmul %37, %38, %cst_25 {dimension_numbers = #tpu.dot_dimension_numbers<[1], [0], [0], [1], [0, 0, 1, 1], [], []>} : vector<320x256xbf16>, vector<256x128xbf16>, vector<320x128xf32> -> vector<320x128xf32>
    %c0_26 = arith.constant 0 : index
    %c0_27 = arith.constant 0 : index
    %40 = vector.load %arg10[%c0_26, %c0_27] : memref<1x128xf32, #tpu.memory_space<vmem>>, vector<1x128xf32>
    %41 = vector.broadcast %40 : vector<1x128xf32> to vector<320x128xf32>
    %42 = arith.addf %39, %41 : vector<320x128xf32>
    %cst_28 = arith.constant dense<0.000000e+00> : vector<128xf32>
    %43 = vector.multi_reduction <add>, %42, %cst_28 [0] : vector<320x128xf32> to vector<128xf32>
    %44 = vector.shape_cast %43 : vector<128xf32> to vector<1x128xf32>
    %cst_29 = arith.constant 3.200000e+02 : f32
    %45 = vector.broadcast %cst_29 : f32 to vector<1x128xf32>
    %46 = arith.divf %44, %45 : vector<1x128xf32>
    %47 = vector.broadcast %46 : vector<1x128xf32> to vector<320x128xf32>
    %48 = arith.subf %42, %47 : vector<320x128xf32>
    %49 = arith.mulf %48, %48 : vector<320x128xf32>
    %cst_30 = arith.constant dense<0.000000e+00> : vector<128xf32>
    %50 = vector.multi_reduction <add>, %49, %cst_30 [0] : vector<320x128xf32> to vector<128xf32>
    %51 = vector.shape_cast %50 : vector<128xf32> to vector<1x128xf32>
    %cst_31 = arith.constant 3.200000e+02 : f32
    %52 = vector.broadcast %cst_31 : f32 to vector<1x128xf32>
    %53 = arith.divf %51, %52 : vector<1x128xf32>
    %cst_32 = arith.constant 9.99999974E-6 : f32
    %54 = vector.broadcast %cst_32 : f32 to vector<1x128xf32>
    %55 = arith.addf %53, %54 : vector<1x128xf32>
    %56 = math.rsqrt %55 : vector<1x128xf32>
    %57 = vector.broadcast %56 : vector<1x128xf32> to vector<320x128xf32>
    %58 = arith.mulf %48, %57 : vector<320x128xf32>
    %c0_33 = arith.constant 0 : index
    %c0_34 = arith.constant 0 : index
    %59 = vector.load %arg11[%c0_33, %c0_34] : memref<1x128xf32, #tpu.memory_space<vmem>>, vector<1x128xf32>
    %60 = vector.broadcast %59 : vector<1x128xf32> to vector<320x128xf32>
    %61 = arith.mulf %58, %60 : vector<320x128xf32>
    %c0_35 = arith.constant 0 : index
    %c0_36 = arith.constant 0 : index
    %62 = vector.load %arg12[%c0_35, %c0_36] : memref<1x128xf32, #tpu.memory_space<vmem>>, vector<1x128xf32>
    %63 = vector.broadcast %62 : vector<1x128xf32> to vector<320x128xf32>
    %64 = arith.addf %61, %63 : vector<320x128xf32>
    %65 = arith.truncf %64 : vector<320x128xf32> to vector<320x128xbf16>
    %c0_37 = arith.constant 0 : index
    %c0_38 = arith.constant 0 : index
    %66 = vector.load %arg13[%c0_37, %c0_38] : memref<128x128xbf16, #tpu.memory_space<vmem>>, vector<128x128xbf16>
    %cst_39 = arith.constant dense<0.000000e+00> : vector<320x128xf32>
    %67 = tpu.matmul %65, %66, %cst_39 {dimension_numbers = #tpu.dot_dimension_numbers<[1], [0], [0], [1], [0, 0, 1, 1], [], []>} : vector<320x128xbf16>, vector<128x128xbf16>, vector<320x128xf32> -> vector<320x128xf32>
    %c0_40 = arith.constant 0 : index
    %c0_41 = arith.constant 0 : index
    %68 = vector.load %arg14[%c0_40, %c0_41] : memref<1x128xf32, #tpu.memory_space<vmem>>, vector<1x128xf32>
    %69 = vector.broadcast %68 : vector<1x128xf32> to vector<320x128xf32>
    %70 = arith.addf %67, %69 : vector<320x128xf32>
    %cst_42 = arith.constant 0.000000e+00 : f32
    %71 = vector.broadcast %cst_42 : f32 to vector<320x128xf32>
    %72 = arith.maximumf %70, %71 : vector<320x128xf32>
    %73 = arith.truncf %72 : vector<320x128xf32> to vector<320x128xbf16>
    %c0_43 = arith.constant 0 : index
    %c0_44 = arith.constant 0 : index
    %74 = vector.load %arg15[%c0_43, %c0_44] : memref<128x128xbf16, #tpu.memory_space<vmem>>, vector<128x128xbf16>
    %cst_45 = arith.constant dense<0.000000e+00> : vector<320x128xf32>
    %75 = tpu.matmul %73, %74, %cst_45 {dimension_numbers = #tpu.dot_dimension_numbers<[1], [0], [0], [1], [0, 0, 1, 1], [], []>} : vector<320x128xbf16>, vector<128x128xbf16>, vector<320x128xf32> -> vector<320x128xf32>
    %c0_46 = arith.constant 0 : index
    %c0_47 = arith.constant 0 : index
    %76 = vector.load %arg16[%c0_46, %c0_47] : memref<1x128xf32, #tpu.memory_space<vmem>>, vector<1x128xf32>
    %77 = vector.broadcast %76 : vector<1x128xf32> to vector<320x128xf32>
    %78 = arith.addf %75, %77 : vector<320x128xf32>
    %c0_48 = arith.constant 0 : index
    %c0_49 = arith.constant 0 : index
    %79 = vector.load %arg17[%c0_48, %c0_49] : memref<320x128xf32, #tpu.memory_space<vmem>>, vector<320x128xf32>
    tpu.vector_store %arg17[%c0_48, %c0_49], %78 {strides = array<i32>} : memref<320x128xf32, #tpu.memory_space<vmem>>, vector<320x128xf32>,
    return
  }
}

</mosaic_0001>

<bundles_post_ra>
// kernel: tpu_custom_call.1
= control target key start
LH: loop header
LB: loop body
LE: loop exit
PB: predicated region body
PF: predicated region fallthrough
CT: control target
= control target key end

     0   :  { %s8327_s0 = inlined_call_operand.hbm [shape: bf16[320,256], index: 0, kind: input, shape index: {}]   ;;  %s8328_s1 = inlined_call_operand.hbm [shape: bf16[320,320], index: 1, kind: input, shape index: {}]   ;;  %s8329_s2 = inlined_call_operand.hbm [shape: f32[320,1], index: 2, kind: input, shape index: {}]   ;;  %s8330_s3 = inlined_call_operand.hbm [shape: bf16[256,128], index: 3, kind: input, shape index: {}]   ;;  %s8331_s4 = inlined_call_operand.hbm [shape: f32[1,128], index: 4, kind: input, shape index: {}]   ;;  %s8332_s5 = inlined_call_operand.hbm [shape: bf16[256,128], index: 5, kind: input, shape index: {}]   ;;  %s8333_s6 = inlined_call_operand.hbm [shape: f32[1,128], index: 6, kind: input, shape index: {}]   ;;  %s8334_s7 = inlined_call_operand.hbm [shape: bf16[256,128], index: 7, kind: input, shape index: {}]   ;;  %s8335_s8 = inlined_call_operand.hbm [shape: f32[1,128], index: 8, kind: input, shape index: {}]   ;;  %s8336_s9 = inlined_call_operand.hbm [shape: bf16[256,128], index: 9, kind: input, shape index: {}]   ;;  %s8337_s10 = inlined_call_operand.hbm [shape: f32[1,128], index: 10, kind: input, shape index: {}]   ;;  %s8338_s11 = inlined_call_operand.hbm [shape: f32[1,128], index: 11, kind: input, shape index: {}]   ;;  %s8339_s12 = inlined_call_operand.hbm [shape: f32[1,128], index: 12, kind: input, shape index: {}]   ;;  %s8340_s13 = inlined_call_operand.hbm [shape: bf16[128,128], index: 13, kind: input, shape index: {}]   ;;  %s8341_s14 = inlined_call_operand.hbm [shape: f32[1,128], index: 14, kind: input, shape index: {}]   ;;  %s8342_s15 = inlined_call_operand.hbm [shape: bf16[128,128], index: 15, kind: input, shape index: {}]   ;;  %s8343_s16 = inlined_call_operand.hbm [shape: f32[1,128], index: 16, kind: input, shape index: {}]   ;;  %s8344_s17 = inlined_call_operand.hbm [shape: f32[320,128], index: 17, kind: output, shape index: {}]  }
   0x1   :  { %8416 = sst [smem:[#allocation80_spill]] %s8327_s0 }
   0x2   :  { %8417 = sst [smem:[#allocation81_spill]] %s8328_s1 }
   0x3   :  { %8418 = sst [smem:[#allocation82_spill]] %s8344_s17 }
   0x4   :  { %22 = vsyncpa [#allocation3], 0 }
   0x5   :  { %23 = vsyncpa [#allocation6], 0 }
   0x6   :  { %24 = vsyncpa [#allocation9], 0 }
   0x7   :  { %25 = vsyncpa [#allocation12], 0 }
   0x8   :  { %26 = vsyncpa [#allocation15], 0 }
   0x9   :  { %27 = vsyncpa [#allocation18], 0 }
   0xa   :  { %28 = vsyncpa [#allocation21], 0 }
   0xb   :  { %29 = vsyncpa [#allocation24], 0 }
   0xc   :  { %30 = vsyncpa [#allocation27], 0 }
   0xd   :  { %31 = vsyncpa [#allocation4], 0  ;;  %s6369_s24 = smov [#allocation5]   ;;  %s8419_s28 = sld [smem:[#allocation81_spill]] }
   0xe   :  { %s49_s25 = sshll.u32 %s6369_s24, 4  ;;  %s50_s25 = int_to_ptr.vmem [resolvable:$true] %s49_s25 }
  0x13   :  { %s5953_s29 = scalar_lea.hbm %s8419_s28, 7680 }
  0x14   :  { %p5954_p0 = scmp.ne.s32.totalorder %s8419_s28, %s5953_s29  ;;  %p5957_p1 = scmp.lt.u32.totalorder %s5953_s29, %s8419_s28 }
  0x16   :  { %p5959_p2 = pnand %p5957_p1, %p5954_p0 }
  0x18   :  { %5962 = shalt.err (!%p5959_p2)
}
  0x19   :  { %s5963_s1 = scalar_lea.vmem %s50_s25, 7680  ;;  %p5968_p4 = scmp.lt.s32.totalorder %s50_s25, %s50_s25 }
  0x1a   :  { %p5964_p3 = scmp.ne.s32.totalorder %s50_s25, %s5963_s1  ;;  %p5969_p5 = scmp.lt.s32.totalorder %s5963_s1, %s5963_s1 }
  0x1c   :  { %p5970_p6 = por %p5969_p5, %p5968_p4 }
  0x1e   :  { %p5971_p7 = pnand %p5970_p6, %p5964_p3 }
  0x20   :  { %5974 = shalt.err (!%p5971_p7)
}
  0x21   :  { %s6370_s20 = smov 192   ;;  %s6371_s21 = smov 12  }
  0x22   :  { %55 = dma.hbm_to_vmem [thread:$0]  %s8419_s28, 7680, %s50_s25, [#allocation6], %s6370_s20, %s6370_s20, %s6371_s21  }
  0x23   :  { %s6372_s24 = smov [#allocation8]   ;;  %s5975_s0 = scalar_lea.hbm %s8330_s3, 2048 }
  0x24   :  { %s73_s26 = sshll.u32 %s6372_s24, 4  ;;  %p5976_p8 = scmp.ne.s32.totalorder %s8330_s3, %s5975_s0  ;;  %s74_s26 = int_to_ptr.vmem [resolvable:$true] %s73_s26 }
  0x25   :  { %p5979_p9 = scmp.lt.u32.totalorder %s5975_s0, %s8330_s3 }
  0x27   :  { %p5981_p10 = pnand %p5979_p9, %p5976_p8 }
  0x29   :  { %5984 = shalt.err (!%p5981_p10)
}
  0x2a   :  { %s5985_s17 = scalar_lea.vmem %s74_s26, 2048  ;;  %p5990_p12 = scmp.lt.s32.totalorder %s74_s26, %s74_s26 }
  0x2b   :  { %p5986_p11 = scmp.ne.s32.totalorder %s74_s26, %s5985_s17  ;;  %p5991_p13 = scmp.lt.s32.totalorder %s5985_s17, %s5985_s17 }
  0x2d   :  { %p5992_p0 = por %p5991_p13, %p5990_p12 }
  0x2f   :  { %p5993_p1 = pnand %p5992_p0, %p5986_p11 }
  0x31   :  { %5996 = shalt.err (!%p5993_p1)
}
  0x32   :  { %s6373_s25 = smov 64   ;;  %s6374_s28 = smov 4  }
  0x33   :  { %79 = dma.hbm_to_vmem [thread:$0]  %s8330_s3, 2048, %s74_s26, [#allocation9], %s6373_s25, %s6373_s25, %s6374_s28  }
  0x34   :  { %s6375_s22 = smov [#allocation11]   ;;  %s6376_s24 = smov [#allocation14]  }
  0x35   :  { %s95_s23 = sshll.u32 %s6375_s22, 4  ;;  %s117_s27 = sshll.u32 %s6376_s24, 4  ;;  %s96_s23 = int_to_ptr.vmem [resolvable:$true] %s95_s23  ;;  %s6511_s27 = int_to_ptr.vmem [resolvable:$true] %s117_s27 }
  0x36   :  { %s5997_s0 = scalar_lea.hbm %s8332_s5, 2048 }
  0x37   :  { %p5998_p2 = scmp.ne.s32.totalorder %s8332_s5, %s5997_s0  ;;  %p6001_p3 = scmp.lt.u32.totalorder %s5997_s0, %s8332_s5 }
  0x39   :  { %p6003_p4 = pnand %p6001_p3, %p5998_p2 }
  0x3b   :  { %6006 = shalt.err (!%p6003_p4)
}
  0x3c   :  { %s6007_s3 = scalar_lea.vmem %s96_s23, 2048  ;;  %p6012_p6 = scmp.lt.s32.totalorder %s96_s23, %s96_s23 }
  0x3d   :  { %p6008_p5 = scmp.ne.s32.totalorder %s96_s23, %s6007_s3  ;;  %p6013_p7 = scmp.lt.s32.totalorder %s6007_s3, %s6007_s3 }
  0x3f   :  { %p6014_p8 = por %p6013_p7, %p6012_p6 }
  0x41   :  { %p6015_p9 = pnand %p6014_p8, %p6008_p5 }
  0x43   :  { %6018 = shalt.err (!%p6015_p9)
}
  0x44   :  { %101 = dma.hbm_to_vmem [thread:$0]  %s8332_s5, 2048, %s96_s23, [#allocation12], %s6373_s25, %s6373_s25, %s6374_s28  }
  0x45   :  { %s6019_s24 = scalar_lea.hbm %s8334_s7, 2048 }
  0x46   :  { %p6020_p10 = scmp.ne.s32.totalorder %s8334_s7, %s6019_s24  ;;  %p6023_p11 = scmp.lt.u32.totalorder %s6019_s24, %s8334_s7 }
  0x48   :  { %p6025_p12 = pnand %p6023_p11, %p6020_p10 }
  0x4a   :  { %6028 = shalt.err (!%p6025_p12)
}
  0x4b   :  { %s6029_s18 = scalar_lea.vmem %s6511_s27, 2048  ;;  %p6034_p0 = scmp.lt.s32.totalorder %s6511_s27, %s6511_s27 }
  0x4c   :  { %p6030_p13 = scmp.ne.s32.totalorder %s6511_s27, %s6029_s18  ;;  %p6035_p1 = scmp.lt.s32.totalorder %s6029_s18, %s6029_s18 }
  0x4e   :  { %p6036_p2 = por %p6035_p1, %p6034_p0 }
  0x50   :  { %p6037_p3 = pnand %p6036_p2, %p6030_p13 }
  0x52   :  { %6040 = shalt.err (!%p6037_p3)
}
  0x53   :  { %123 = dma.hbm_to_vmem [thread:$0]  %s8334_s7, 2048, %s6511_s27, [#allocation15], %s6373_s25, %s6373_s25, %s6374_s28  }
  0x54   :  { %s6377_s19 = smov [#allocation17]   ;;  %s6378_s3 = smov [#allocation20]  }
  0x55   :  { %s139_s1 = sshll.u32 %s6377_s19, 4  ;;  %s162_s26 = sshll.u32 %s6378_s3, 4  ;;  %s140_s1 = int_to_ptr.vmem [resolvable:$true] %s139_s1  ;;  %s163_s26 = int_to_ptr.vmem [resolvable:$true] %s162_s26 }
  0x56   :  { %s6041_s22 = scalar_lea.hbm %s8336_s9, 2048 }
  0x57   :  { %p6042_p4 = scmp.ne.s32.totalorder %s8336_s9, %s6041_s22  ;;  %p6045_p5 = scmp.lt.u32.totalorder %s6041_s22, %s8336_s9 }
  0x59   :  { %p6047_p6 = pnand %p6045_p5, %p6042_p4 }
  0x5b   :  { %6050 = shalt.err (!%p6047_p6)
}
  0x5c   :  { %s6051_s7 = scalar_lea.vmem %s140_s1, 2048  ;;  %p6056_p8 = scmp.lt.s32.totalorder %s140_s1, %s140_s1 }
  0x5d   :  { %p6052_p7 = scmp.ne.s32.totalorder %s140_s1, %s6051_s7  ;;  %p6057_p9 = scmp.lt.s32.totalorder %s6051_s7, %s6051_s7 }
  0x5f   :  { %p6058_p10 = por %p6057_p9, %p6056_p8 }
  0x61   :  { %p6059_p11 = pnand %p6058_p10, %p6052_p7 }
  0x63   :  { %6062 = shalt.err (!%p6059_p11)
}
  0x64   :  { %145 = dma.hbm_to_vmem [thread:$0]  %s8336_s9, 2048, %s140_s1, [#allocation18], %s6373_s25, %s6373_s25, %s6374_s28  }
  0x65   :  { %s6063_s23 = scalar_lea.hbm %s8338_s11, 16 }
  0x66   :  { %p6064_p12 = scmp.ne.s32.totalorder %s8338_s11, %s6063_s23  ;;  %p6067_p13 = scmp.lt.u32.totalorder %s6063_s23, %s8338_s11 }
  0x68   :  { %p6069_p0 = pnand %p6067_p13, %p6064_p12 }
  0x6a   :  { %6072 = shalt.err (!%p6069_p0)
}
  0x6b   :  { %s6073_s22 = scalar_lea.vmem %s163_s26, 16  ;;  %s6077_s24 = scalar_lea.vmem %s163_s26, 32 }
  0x6c   :  { %p6074_p1 = scmp.ne.s32.totalorder %s163_s26, %s6073_s22  ;;  %p6078_p2 = scmp.lt.s32.totalorder %s163_s26, %s163_s26 }
  0x6d   :  { %p6079_p3 = scmp.lt.s32.totalorder %s6077_s24, %s6073_s22 }
  0x6f   :  { %p6080_p4 = por %p6079_p3, %p6078_p2 }
  0x71   :  { %p6081_p5 = pnand %p6080_p4, %p6074_p1 }
  0x73   :  { %6084 = shalt.err (!%p6081_p5)
}
  0x74   :  { %165 = dma.hbm_to_vmem [thread:$0]  %s8338_s11, 16, %s163_s26, [#allocation21]  }
  0x75   :  { %s6379_s17 = smov [#allocation23]   ;;  %s6380_s0 = smov [#allocation26]  }
  0x76   :  { %s181_s29 = sshll.u32 %s6379_s17, 4  ;;  %s203_s7 = sshll.u32 %s6380_s0, 4  ;;  %s182_s29 = int_to_ptr.vmem [resolvable:$true] %s181_s29  ;;  %s6575_s7 = int_to_ptr.vmem [resolvable:$true] %s203_s7 }
  0x77   :  { %s6085_s18 = scalar_lea.hbm %s8340_s13, 1024 }
  0x78   :  { %p6086_p6 = scmp.ne.s32.totalorder %s8340_s13, %s6085_s18  ;;  %p6089_p7 = scmp.lt.u32.totalorder %s6085_s18, %s8340_s13 }
  0x7a   :  { %p6091_p8 = pnand %p6089_p7, %p6086_p6 }
  0x7c   :  { %6094 = shalt.err (!%p6091_p8)
}
  0x7d   :  { %s6095_s11 = scalar_lea.vmem %s182_s29, 1024  ;;  %p6100_p10 = scmp.lt.s32.totalorder %s182_s29, %s182_s29 }
  0x7e   :  { %p6096_p9 = scmp.ne.s32.totalorder %s182_s29, %s6095_s11  ;;  %p6101_p11 = scmp.lt.s32.totalorder %s6095_s11, %s6095_s11 }
  0x80   :  { %p6102_p12 = por %p6101_p11, %p6100_p10 }
  0x82   :  { %p6103_p13 = pnand %p6102_p12, %p6096_p9 }
  0x84   :  { %6106 = shalt.err (!%p6103_p13)
}
  0x85   :  { %187 = dma.hbm_to_vmem [thread:$0]  %s8340_s13, 1024, %s182_s29, [#allocation24], %s6373_s25, %s6373_s25, %s6374_s28  }
  0x86   :  { %s6107_s24 = scalar_lea.hbm %s8342_s15, 1024 }
  0x87   :  { %p6108_p0 = scmp.ne.s32.totalorder %s8342_s15, %s6107_s24  ;;  %p6111_p1 = scmp.lt.u32.totalorder %s6107_s24, %s8342_s15 }
  0x89   :  { %p6113_p2 = pnand %p6111_p1, %p6108_p0 }
  0x8b   :  { %6116 = shalt.err (!%p6113_p2)
}
  0x8c   :  { %s6117_s27 = scalar_lea.vmem %s6575_s7, 1024  ;;  %p6122_p4 = scmp.lt.s32.totalorder %s6575_s7, %s6575_s7 }
  0x8d   :  { %p6118_p3 = scmp.ne.s32.totalorder %s6575_s7, %s6117_s27  ;;  %p6123_p5 = scmp.lt.s32.totalorder %s6117_s27, %s6117_s27 }
  0x8f   :  { %p6124_p6 = por %p6123_p5, %p6122_p4 }
  0x91   :  { %p6125_p7 = pnand %p6124_p6, %p6118_p3 }
  0x93   :  { %6128 = shalt.err (!%p6125_p7)
}
  0x94   :  { %209 = dma.hbm_to_vmem [thread:$0]  %s8342_s15, 1024, %s6575_s7, [#allocation27], %s6373_s25, %s6373_s25, %s6374_s28  }
  0x95   :  { %s6381_s30 = smov [#allocation2]   ;;  %s8420_s19 = sld [smem:[#allocation80_spill]] }
  0x96   :  { %s37_s18 = sshll.u32 %s6381_s30, 4  ;;  %s38_s18 = int_to_ptr.vmem [resolvable:$true] %s37_s18 }
  0x9b   :  { %s6129_s3 = scalar_lea.hbm %s8420_s19, 5120 }
  0x9c   :  { %p6130_p8 = scmp.ne.s32.totalorder %s8420_s19, %s6129_s3  ;;  %p6133_p9 = scmp.lt.u32.totalorder %s6129_s3, %s8420_s19 }
  0x9e   :  { %p6135_p10 = pnand %p6133_p9, %p6130_p8 }
  0xa0   :  { %6138 = shalt.err (!%p6135_p10)
}
  0xa1   :  { %s6139_s22 = scalar_lea.vmem %s38_s18, 5120  ;;  %p6144_p12 = scmp.lt.s32.totalorder %s38_s18, %s38_s18 }
  0xa2   :  { %p6140_p11 = scmp.ne.s32.totalorder %s38_s18, %s6139_s22  ;;  %p6145_p13 = scmp.lt.s32.totalorder %s6139_s22, %s6139_s22 }
  0xa4   :  { %p6146_p0 = por %p6145_p13, %p6144_p12 }
  0xa6   :  { %p6147_p1 = pnand %p6146_p0, %p6140_p11 }
  0xa8   :  { %6150 = shalt.err (!%p6147_p1)
}
  0xa9   :  { %s6382_s15 = smov 128   ;;  %s6383_s25 = smov 8  }
  0xaa   :  { %43 = dma.hbm_to_vmem [thread:$0]  %s8420_s19, 5120, %s38_s18, [#allocation3], %s6382_s15, %s6382_s15, %s6383_s25  }
  0xab   :  { %s6384_s24 = smov [#allocation7]   ;;  %s6385_s1 = smov [#allocation10]  }
  0xac   :  { %s61_s9 = sshll.u32 %s6384_s24, 4  ;;  %s86_s17 = sshll.u32 %s6385_s1, 4  ;;  %s62_s9 = int_to_ptr.vmem [resolvable:$true] %s61_s9  ;;  %s87_s17 = int_to_ptr.vmem [resolvable:$true] %s86_s17 }
  0xad   :  { %s6151_s13 = scalar_lea.hbm %s8329_s2, 5120 }
  0xae   :  { %p6152_p2 = scmp.ne.s32.totalorder %s8329_s2, %s6151_s13  ;;  %p6155_p3 = scmp.lt.u32.totalorder %s6151_s13, %s8329_s2 }
  0xb0   :  { %p6157_p4 = pnand %p6155_p3, %p6152_p2 }
  0xb2   :  { %6160 = shalt.err (!%p6157_p4)
}
  0xb3   :  { %s6161_s18 = scalar_lea.vmem %s62_s9, 5120  ;;  %p6166_p6 = scmp.lt.s32.totalorder %s62_s9, %s62_s9 }
  0xb4   :  { %p6162_p5 = scmp.ne.s32.totalorder %s62_s9, %s6161_s18  ;;  %p6167_p7 = scmp.lt.s32.totalorder %s6161_s18, %s6161_s18 }
  0xb6   :  { %p6168_p8 = por %p6167_p7, %p6166_p6 }
  0xb8   :  { %p6169_p9 = pnand %p6168_p8, %p6162_p5 }
  0xba   :  { %6172 = shalt.err (!%p6169_p9)
}
  0xbb   :  { %67 = dma.hbm_to_vmem [thread:$0]  %s8329_s2, 5120, %s62_s9, [#allocation6], %s6382_s15, %s6382_s15, %s6383_s25  }
  0xbc   :  { %s6173_s20 = scalar_lea.hbm %s8331_s4, 16 }
  0xbd   :  { %p6174_p10 = scmp.ne.s32.totalorder %s8331_s4, %s6173_s20  ;;  %p6177_p11 = scmp.lt.u32.totalorder %s6173_s20, %s8331_s4 }
  0xbf   :  { %p6179_p12 = pnand %p6177_p11, %p6174_p10 }
  0xc1   :  { %6182 = shalt.err (!%p6179_p12)
}
  0xc2   :  { %s6183_s24 = scalar_lea.vmem %s87_s17, 16  ;;  %s6187_s1 = scalar_lea.vmem %s87_s17, 32 }
  0xc3   :  { %p6184_p13 = scmp.ne.s32.totalorder %s87_s17, %s6183_s24  ;;  %p6188_p0 = scmp.lt.s32.totalorder %s87_s17, %s87_s17 }
  0xc4   :  { %p6189_p1 = scmp.lt.s32.totalorder %s6187_s1, %s6183_s24 }
  0xc6   :  { %p6190_p2 = por %p6189_p1, %p6188_p0 }
  0xc8   :  { %p6191_p3 = pnand %p6190_p2, %p6184_p13 }
  0xca   :  { %6194 = shalt.err (!%p6191_p3)
}
  0xcb   :  { %89 = dma.hbm_to_vmem [thread:$0]  %s8331_s4, 16, %s87_s17, [#allocation9]  }
  0xcc   :  { %s6386_s0 = smov [#allocation13]   ;;  %s6387_s13 = smov [#allocation16]  }
  0xcd   :  { %s108_s27 = sshll.u32 %s6386_s0, 4  ;;  %s130_s29 = sshll.u32 %s6387_s13, 4  ;;  %s109_s27 = int_to_ptr.vmem [resolvable:$true] %s108_s27  ;;  %s131_s29 = int_to_ptr.vmem [resolvable:$true] %s130_s29 }
  0xce   :  { %s6195_s23 = scalar_lea.hbm %s8333_s6, 16 }
  0xcf   :  { %p6196_p4 = scmp.ne.s32.totalorder %s8333_s6, %s6195_s23  ;;  %p6199_p5 = scmp.lt.u32.totalorder %s6195_s23, %s8333_s6 }
  0xd1   :  { %p6201_p6 = pnand %p6199_p5, %p6196_p4 }
  0xd3   :  { %6204 = shalt.err (!%p6201_p6)
}
  0xd4   :  { %s6205_s4 = scalar_lea.vmem %s109_s27, 16  ;;  %s6209_s17 = scalar_lea.vmem %s109_s27, 32 }
  0xd5   :  { %p6206_p7 = scmp.ne.s32.totalorder %s109_s27, %s6205_s4  ;;  %p6210_p8 = scmp.lt.s32.totalorder %s109_s27, %s109_s27 }
  0xd6   :  { %p6211_p9 = scmp.lt.s32.totalorder %s6209_s17, %s6205_s4 }
  0xd8   :  { %p6212_p10 = por %p6211_p9, %p6210_p8 }
  0xda   :  { %p6213_p11 = pnand %p6212_p10, %p6206_p7 }
  0xdc   :  { %6216 = shalt.err (!%p6213_p11)
}
  0xdd   :  { %111 = dma.hbm_to_vmem [thread:$0]  %s8333_s6, 16, %s109_s27, [#allocation12]  }
  0xde   :  { %s6217_s28 = scalar_lea.hbm %s8335_s8, 16 }
  0xdf   :  { %p6218_p12 = scmp.ne.s32.totalorder %s8335_s8, %s6217_s28  ;;  %p6221_p13 = scmp.lt.u32.totalorder %s6217_s28, %s8335_s8 }
  0xe1   :  { %p6223_p0 = pnand %p6221_p13, %p6218_p12 }
  0xe3   :  { %6226 = shalt.err (!%p6223_p0)
}
  0xe4   :  { %s6227_s9 = scalar_lea.vmem %s131_s29, 16  ;;  %s6231_s0 = scalar_lea.vmem %s131_s29, 32 }
  0xe5   :  { %p6228_p1 = scmp.ne.s32.totalorder %s131_s29, %s6227_s9  ;;  %p6232_p2 = scmp.lt.s32.totalorder %s131_s29, %s131_s29 }
  0xe6   :  { %p6233_p3 = scmp.lt.s32.totalorder %s6231_s0, %s6227_s9 }
  0xe8   :  { %p6234_p4 = por %p6233_p3, %p6232_p2 }
  0xea   :  { %p6235_p5 = pnand %p6234_p4, %p6228_p1 }
  0xec   :  { %6238 = shalt.err (!%p6235_p5)
}
  0xed   :  { %133 = dma.hbm_to_vmem [thread:$0]  %s8335_s8, 16, %s131_s29, [#allocation15]  }
  0xee   :  { %s6388_s13 = smov [#allocation19]   ;;  %s6389_s5 = smov [#allocation22]  }
  0xef   :  { %s152_s30 = sshll.u32 %s6388_s13, 4  ;;  %s172_s23 = sshll.u32 %s6389_s5, 4  ;;  %s153_s30 = int_to_ptr.vmem [resolvable:$true] %s152_s30  ;;  %s173_s23 = int_to_ptr.vmem [resolvable:$true] %s172_s23 }
  0xf0   :  { %s6239_s3 = scalar_lea.hbm %s8337_s10, 16 }
  0xf1   :  { %p6240_p6 = scmp.ne.s32.totalorder %s8337_s10, %s6239_s3  ;;  %p6243_p7 = scmp.lt.u32.totalorder %s6239_s3, %s8337_s10 }
  0xf3   :  { %p6245_p8 = pnand %p6243_p7, %p6240_p6 }
  0xf5   :  { %6248 = shalt.err (!%p6245_p8)
}
  0xf6   :  { %s6249_s8 = scalar_lea.vmem %s153_s30, 16  ;;  %s6253_s29 = scalar_lea.vmem %s153_s30, 32 }
  0xf7   :  { %p6250_p9 = scmp.ne.s32.totalorder %s153_s30, %s6249_s8  ;;  %p6254_p10 = scmp.lt.s32.totalorder %s153_s30, %s153_s30 }
  0xf8   :  { %p6255_p11 = scmp.lt.s32.totalorder %s6253_s29, %s6249_s8 }
  0xfa   :  { %p6256_p12 = por %p6255_p11, %p6254_p10 }
  0xfc   :  { %p6257_p13 = pnand %p6256_p12, %p6250_p9 }
  0xfe   :  { %6260 = shalt.err (!%p6257_p13)
}
  0xff   :  { %155 = dma.hbm_to_vmem [thread:$0]  %s8337_s10, 16, %s153_s30, [#allocation18]  }
 0x100   :  { %s6261_s7 = scalar_lea.hbm %s8339_s12, 16 }
 0x101   :  { %p6262_p0 = scmp.ne.s32.totalorder %s8339_s12, %s6261_s7  ;;  %p6265_p1 = scmp.lt.u32.totalorder %s6261_s7, %s8339_s12 }
 0x103   :  { %p6267_p2 = pnand %p6265_p1, %p6262_p0 }
 0x105   :  { %6270 = shalt.err (!%p6267_p2)
}
 0x106   :  { %s6271_s0 = scalar_lea.vmem %s173_s23, 16  ;;  %s6275_s6 = scalar_lea.vmem %s173_s23, 32 }
 0x107   :  { %p6272_p3 = scmp.ne.s32.totalorder %s173_s23, %s6271_s0  ;;  %p6276_p4 = scmp.lt.s32.totalorder %s173_s23, %s173_s23 }
 0x108   :  { %p6277_p5 = scmp.lt.s32.totalorder %s6275_s6, %s6271_s0 }
 0x10a   :  { %p6278_p6 = por %p6277_p5, %p6276_p4 }
 0x10c   :  { %p6279_p7 = pnand %p6278_p6, %p6272_p3 }
 0x10e   :  { %6282 = shalt.err (!%p6279_p7)
}
 0x10f   :  { %175 = dma.hbm_to_vmem [thread:$0]  %s8339_s12, 16, %s173_s23, [#allocation21]  }
 0x110   :  { %s6390_s13 = smov [#allocation25]   ;;  %s6391_s5 = smov [#allocation28]  }
 0x111   :  { %s194_s30 = sshll.u32 %s6390_s13, 4  ;;  %s216_s18 = sshll.u32 %s6391_s5, 4  ;;  %s195_s30 = int_to_ptr.vmem [resolvable:$true] %s194_s30  ;;  %s217_s18 = int_to_ptr.vmem [resolvable:$true] %s216_s18 }
 0x112   :  { %s6283_s11 = scalar_lea.hbm %s8341_s14, 16 }
 0x113   :  { %p6284_p8 = scmp.ne.s32.totalorder %s8341_s14, %s6283_s11  ;;  %p6287_p9 = scmp.lt.u32.totalorder %s6283_s11, %s8341_s14 }
 0x115   :  { %p6289_p10 = pnand %p6287_p9, %p6284_p8 }
 0x117   :  { %6292 = shalt.err (!%p6289_p10)
}
 0x118   :  { %s6293_s12 = scalar_lea.vmem %s195_s30, 16  ;;  %s6297_s23 = scalar_lea.vmem %s195_s30, 32 }
 0x119   :  { %p6294_p11 = scmp.ne.s32.totalorder %s195_s30, %s6293_s12  ;;  %p6298_p12 = scmp.lt.s32.totalorder %s195_s30, %s195_s30 }
 0x11a   :  { %p6299_p13 = scmp.lt.s32.totalorder %s6297_s23, %s6293_s12 }
 0x11c   :  { %p6300_p0 = por %p6299_p13, %p6298_p12 }
 0x11e   :  { %p6301_p1 = pnand %p6300_p0, %p6294_p11 }
 0x120   :  { %6304 = shalt.err (!%p6301_p1)
}
 0x121   :  { %197 = dma.hbm_to_vmem [thread:$0]  %s8341_s14, 16, %s195_s30, [#allocation24]  }
 0x122   :  { %s6305_s28 = scalar_lea.hbm %s8343_s16, 16 }
 0x123   :  { %p6306_p2 = scmp.ne.s32.totalorder %s8343_s16, %s6305_s28  ;;  %p6309_p3 = scmp.lt.u32.totalorder %s6305_s28, %s8343_s16 }
 0x125   :  { %p6311_p4 = pnand %p6309_p3, %p6306_p2 }
 0x127   :  { %6314 = shalt.err (!%p6311_p4)
}
 0x128   :  { %s6315_s9 = scalar_lea.vmem %s217_s18, 16  ;;  %s6319_s0 = scalar_lea.vmem %s217_s18, 32 }
 0x129   :  { %p6316_p5 = scmp.ne.s32.totalorder %s217_s18, %s6315_s9  ;;  %p6320_p6 = scmp.lt.s32.totalorder %s217_s18, %s217_s18 }
 0x12a   :  { %p6321_p7 = scmp.lt.s32.totalorder %s6319_s0, %s6315_s9 }
 0x12c   :  { %p6322_p8 = por %p6321_p7, %p6320_p6 }
 0x12e   :  { %p6323_p9 = pnand %p6322_p8, %p6316_p5 }
 0x130   :  { %6326 = shalt.err (!%p6323_p9)
}
 0x131   :  { %219 = dma.hbm_to_vmem [thread:$0]  %s8343_s16, 16, %s217_s18, [#allocation27]  }
 0x132   :  { %6349 = dma.done.wait [#allocation3], 5120  }
 0x133   :  { %6350 = vsyncadd [#allocation3], 4294962176 }
 0x134   :  { %6351 = dma.done.wait [#allocation6], 12800  }
 0x135   :  { %6352 = vsyncadd [#allocation6], 4294954496 }
 0x136   :  { %6353 = dma.done.wait [#allocation9], 2064  }
 0x137   :  { %6354 = vsyncadd [#allocation9], 4294965232 }
 0x138   :  { %6355 = dma.done.wait [#allocation12], 2064  }
 0x139   :  { %6356 = vsyncadd [#allocation12], 4294965232 }
 0x13a   :  { %6357 = dma.done.wait [#allocation15], 2064  }
 0x13b   :  { %6358 = vsyncadd [#allocation15], 4294965232 }
 0x13c   :  { %6359 = dma.done.wait [#allocation18], 2064  }
 0x13d   :  { %6360 = vsyncadd [#allocation18], 4294965232 }
 0x13e   :  { %6361 = dma.done.wait [#allocation21], 32  }
 0x13f   :  { %6362 = vsyncadd [#allocation21], 4294967264 }
 0x140   :  { %6363 = dma.done.wait [#allocation24], 1040  }
 0x141   :  { %6364 = vsyncadd [#allocation24], 4294966256 }
 0x142   :  { %6365 = dma.done.wait [#allocation27], 1040  }
 0x143   :  { %6366 = vsyncadd [#allocation27], 4294966256  ;;  %v8348_v0 = vmov 0   ;;  %v5616_v1 = vld [vmem:[#allocation8] sm:$0xff]   ;;  %v5617_v2 = vld [vmem:[#allocation8 + $0x8] sm:$0xff]   ;;  %vm1320_vm0 = vcmask 523264  }
 0x144   :  { %767 = vmatprep.subr.bf16.mxu0 %v8348_v0  ;;  %1381 = vmatprep.subr.bf16.mxu1 %v8348_v0  ;;  %v5618_v3 = vld [vmem:[#allocation8 + $0x10] sm:$0xff]   ;;  %v5619_v4 = vld [vmem:[#allocation8 + $0x18] sm:$0xff]   ;;  %v5620_v5 = vld [vmem:[#allocation8 + $0x20] sm:$0xff]   ;;  %s6393_s16 = smov [#allocation29]  }
 0x145   :  { %5614 = vset.pattern.permute.xlu0 %v8348_v0  ;;  %5615 = vset.pattern.permute.xlu1 %v8348_v0  ;;  %v5634_v6 = vld [vmem:[#allocation2 + $0x4] ss:$8 sps:$4 sm:$0xff]   ;;  %v5622_v8 = vld [vmem:[#allocation8 + $0x30] sm:$0xff]   ;;  %v5623_v9 = vld [vmem:[#allocation8 + $0x38] sm:$0xff]   ;;  %s4905_s10 = sshll.u32 %s6393_s16, 4  ;;  %s4906_s10 = int_to_ptr.vmem [resolvable:$true] %s4905_s10 }
 0x146   :  { %768 = vmatpush1.bf16.msra.mxu0 %v5616_v1  ;;  %v5621_v7 = vld [vmem:[#allocation8 + $0x28] sm:$0xff]   ;;  %799 = vmatprep.mubr.bf16.mxu0 %v5634_v6  ;;  %v5624_v10 = vld [vmem:[#allocation8 + $0x40] sm:$0xff]   ;;  %v5626_v12 = vld [vmem:[#allocation8 + $0x50] sm:$0xff]   ;;  %s6327_s27 = scalar_lea.vmem %s4906_s10, 5120  ;;  %p6332_p11 = scmp.lt.s32.totalorder %s4906_s10, %s4906_s10 }
 0x147   :  { %769 = vmatprep.subr.bf16.mxu0 %v8348_v0  ;;  %v5625_v11 = vld [vmem:[#allocation8 + $0x48] sm:$0xff]   ;;  %v5627_v13 = vld [vmem:[#allocation8 + $0x58] sm:$0xff]   ;;  %v5628_v14 = vld [vmem:[#allocation8 + $0x60] sm:$0xff]   ;;  %p6328_p10 = scmp.ne.s32.totalorder %s4906_s10, %s6327_s27  ;;  %p6333_p12 = scmp.lt.s32.totalorder %s6327_s27, %s6327_s27 }
 0x148   :  { %v5629_v15 = vld [vmem:[#allocation8 + $0x68] sm:$0xff]   ;;  %v5630_v16 = vld [vmem:[#allocation8 + $0x70] sm:$0xff]   ;;  %v5631_v17 = vld [vmem:[#allocation8 + $0x78] sm:$0xff]  }
 0x149   :  { %v5632_v18 = vld [vmem:[#allocation2] ss:$8 sps:$4 sm:$0xff]   ;;  %v5635_v19 = vld [vmem:[#allocation2 + $0x14] ss:$8 sps:$4 sm:$0xff]   ;;  %v5637_v20 = vld [vmem:[#allocation2 + $0x10] ss:$8 sps:$4 sm:$0xff]   ;;  %p6334_p13 = por %p6333_p12, %p6332_p11 }
 0x14a   :  { %770 = vmatpush1.bf16.msra.mxu0 %v5617_v2  ;;  %v5638_v21 = vld [vmem:[#allocation2 + $0x24] ss:$8 sps:$4 sm:$0xff]   ;;  %v5640_v22 = vld [vmem:[#allocation2 + $0x20] ss:$8 sps:$4 sm:$0xff]   ;;  %v5641_v23 = vld [vmem:[#allocation2 + $0x34] ss:$8 sps:$4 sm:$0xff]  }
 0x14b   :  { %771 = vmatprep.subr.bf16.mxu0 %v8348_v0  ;;  %v5643_v24 = vld [vmem:[#allocation2 + $0x30] ss:$8 sps:$4 sm:$0xff]   ;;  %v5644_v25 = vld [vmem:[#allocation2 + $0x44] ss:$8 sps:$4 sm:$0xff]   ;;  %v5646_v26 = vld [vmem:[#allocation2 + $0x40] ss:$8 sps:$4 sm:$0xff]   ;;  %p6335_p0 = pnand %p6334_p13, %p6328_p10 }
 0x14c   :  { %v5647_v27 = vld [vmem:[#allocation2 + $0x54] ss:$8 sps:$4 sm:$0xff]   ;;  %v5649_v28 = vld [vmem:[#allocation2 + $0x50] ss:$8 sps:$4 sm:$0xff]   ;;  %v5650_v29 = vld [vmem:[#allocation2 + $0x64] ss:$8 sps:$4 sm:$0xff]  }
 0x14d   :  { %v5652_v30 = vld [vmem:[#allocation2 + $0x60] ss:$8 sps:$4 sm:$0xff]   ;;  %v5653_v31 = vld [vmem:[#allocation2 + $0x74] ss:$8 sps:$4 sm:$0xff]   ;;  %v5655_v32 = vld [vmem:[#allocation2 + $0x70] ss:$8 sps:$4 sm:$0xff]  }
 0x14e   :  { %772 = vmatpush1.bf16.msra.mxu0 %v5618_v3  ;;  %v5656_v33 = vld [vmem:[#allocation2 + $0x84] ss:$8 sps:$4 sm:$0xff]   ;;  %v5658_v34 = vld [vmem:[#allocation2 + $0x80] ss:$8 sps:$4 sm:$0xff]   ;;  %v5659_v35 = vld [vmem:[#allocation2 + $0x94] ss:$8 sps:$4 sm:$0xff]  }
 0x14f   :  { %773 = vmatprep.subr.bf16.mxu0 %v8348_v0  ;;  %v5661_v36 = vld [vmem:[#allocation2 + $0x90] ss:$8 sps:$4 sm:$0xff]   ;;  %v5662_v37 = vld [vmem:[#allocation2 + $0xa4] ss:$8 sps:$4 sm:$0xff]   ;;  %v5664_v38 = vld [vmem:[#allocation2 + $0xa0] ss:$8 sps:$4 sm:$0xff]  }
 0x150   :  { %v5665_v39 = vld [vmem:[#allocation2 + $0xb4] ss:$8 sps:$4 sm:$0xff]   ;;  %v5667_v40 = vld [vmem:[#allocation2 + $0xb0] ss:$8 sps:$4 sm:$0xff]   ;;  %v5668_v41 = vld [vmem:[#allocation2 + $0xc4] ss:$8 sps:$4 sm:$0xff]  }
 0x151   :  { %v5670_v42 = vld [vmem:[#allocation2 + $0xc0] ss:$8 sps:$4 sm:$0xff]   ;;  %v5671_v43 = vld [vmem:[#allocation2 + $0xd4] ss:$8 sps:$4 sm:$0xff]   ;;  %v5673_v44 = vld [vmem:[#allocation2 + $0xd0] ss:$8 sps:$4 sm:$0xff]  }
 0x152   :  { %774 = vmatpush1.bf16.msra.mxu0 %v5619_v4  ;;  %v5674_v45 = vld [vmem:[#allocation2 + $0xe4] ss:$8 sps:$4 sm:$0xff]   ;;  %v5676_v46 = vld [vmem:[#allocation2 + $0xe0] ss:$8 sps:$4 sm:$0xff]   ;;  %v5677_v47 = vld [vmem:[#allocation2 + $0xf4] ss:$8 sps:$4 sm:$0xff]  }
 0x153   :  { %775 = vmatprep.subr.bf16.mxu0 %v8348_v0  ;;  %v5679_v48 = vld [vmem:[#allocation2 + $0xf0] ss:$8 sps:$4 sm:$0xff]   ;;  %v5680_v49 = vld [vmem:[#allocation2 + $0x104] ss:$8 sps:$4 sm:$0xff]   ;;  %v5682_v50 = vld [vmem:[#allocation2 + $0x100] ss:$8 sps:$4 sm:$0xff]  }
 0x154   :  { %v5683_v51 = vld [vmem:[#allocation2 + $0x114] ss:$8 sps:$4 sm:$0xff]   ;;  %v5685_v52 = vld [vmem:[#allocation2 + $0x110] ss:$8 sps:$4 sm:$0xff]   ;;  %v5686_v53 = vld [vmem:[#allocation2 + $0x124] ss:$8 sps:$4 sm:$0xff]  }
 0x155   :  { %v5688_v54 = vld [vmem:[#allocation2 + $0x120] ss:$8 sps:$4 sm:$0xff]   ;;  %v5689_v55 = vld [vmem:[#allocation2 + $0x134] ss:$8 sps:$4 sm:$0xff]   ;;  %v5691_v56 = vld [vmem:[#allocation2 + $0x130] ss:$8 sps:$4 sm:$0xff]  }
 0x156   :  { %776 = vmatpush1.bf16.msra.mxu0 %v5620_v5  ;;  %v6745_v57 = vld [vmem:[#allocation10] ss:$0 sm:$0xff]  ;;  %v6748_v61 = vld [vmem:[#allocation5 + $0x4] ss:$12 sps:$4 sm:$0xff]  }
 0x157   :  { %777 = vmatprep.subr.bf16.mxu0 %v8348_v0  ;;  %1413 = vmatprep.mubr.bf16.mxu1 %v6748_v61 }
 0x15a   :  { %778 = vmatpush1.bf16.msra.mxu0 %v5621_v7 }
 0x15b   :  { %779 = vmatprep.subr.bf16.mxu0 %v8348_v0 }
 0x15e   :  { %780 = vmatpush1.bf16.msra.mxu0 %v5622_v8 }
 0x15f   :  { %781 = vmatprep.subr.bf16.mxu0 %v8348_v0 }
 0x162   :  { %782 = vmatpush1.bf16.msra.mxu0 %v5623_v9 }
 0x163   :  { %783 = vmatprep.subr.bf16.mxu0 %v8348_v0 }
 0x166   :  { %784 = vmatpush1.bf16.msra.mxu0 %v5624_v10 }
 0x167   :  { %785 = vmatprep.subr.bf16.mxu0 %v8348_v0 }
 0x16a   :  { %786 = vmatpush1.bf16.msra.mxu0 %v5625_v11 }
 0x16b   :  { %787 = vmatprep.subr.bf16.mxu0 %v8348_v0 }
 0x16e   :  { %788 = vmatpush1.bf16.msra.mxu0 %v5626_v12 }
 0x16f   :  { %789 = vmatprep.subr.bf16.mxu0 %v8348_v0 }
 0x172   :  { %790 = vmatpush1.bf16.msra.mxu0 %v5627_v13 }
 0x173   :  { %791 = vmatprep.subr.bf16.mxu0 %v8348_v0 }
 0x176   :  { %792 = vmatpush1.bf16.msra.mxu0 %v5628_v14 }
 0x177   :  { %793 = vmatprep.subr.bf16.mxu0 %v8348_v0 }
 0x17a   :  { %794 = vmatpush1.bf16.msra.mxu0 %v5629_v15 }
 0x17b   :  { %795 = vmatprep.subr.bf16.mxu0 %v8348_v0 }
 0x17e   :  { %796 = vmatpush1.bf16.msra.mxu0 %v5630_v16 }
 0x17f   :  { %797 = vmatprep.subr.bf16.mxu0 %v8348_v0 }
 0x182   :  { %798 = vmatpush1.bf16.msra.mxu0 %v5631_v17 }
 0x185   :  { %800 = vmatmul.mubr.bf16.vlgmr.msra.gmra.mrb[0].mxu0 %v5632_v18 }
 0x186   :  { %807 = vmatprep.mubr.bf16.mxu0 %v5635_v19 }
 0x18d   :  { %808 = vmatmul.mubr.bf16.gmra.mrb[4].mxu0 %v5637_v20 }
 0x18e   :  { %815 = vmatprep.mubr.bf16.mxu0 %v5638_v21 }
 0x195   :  { %816 = vmatmul.mubr.bf16.gmra.mrb[8].mxu0 %v5640_v22 }
 0x196   :  { %823 = vmatprep.mubr.bf16.mxu0 %v5641_v23 }
 0x19d   :  { %824 = vmatmul.mubr.bf16.gmra.mrb[12].mxu0 %v5643_v24 }
 0x19e   :  { %831 = vmatprep.mubr.bf16.mxu0 %v5644_v25 }
 0x1a5   :  { %832 = vmatmul.mubr.bf16.gmra.mrb[16].mxu0 %v5646_v26 }
 0x1a6   :  { %839 = vmatprep.mubr.bf16.mxu0 %v5647_v27 }
 0x1ad   :  { %840 = vmatmul.mubr.bf16.gmra.mrb[20].mxu0 %v5649_v28 }
 0x1ae   :  { %847 = vmatprep.mubr.bf16.mxu0 %v5650_v29 }
 0x1b5   :  { %848 = vmatmul.mubr.bf16.gmra.mrb[24].mxu0 %v5652_v30 }
 0x1b6   :  { %855 = vmatprep.mubr.bf16.mxu0 %v5653_v31 }
 0x1bd   :  { %856 = vmatmul.mubr.bf16.gmra.mrb[28].mxu0 %v5655_v32 }
 0x1be   :  { %863 = vmatprep.mubr.bf16.mxu0 %v5656_v33 }
 0x1c5   :  { %864 = vmatmul.mubr.bf16.gmra.mrb[32].mxu0 %v5658_v34 }
 0x1c6   :  { %871 = vmatprep.mubr.bf16.mxu0 %v5659_v35 }
 0x1cd   :  { %872 = vmatmul.mubr.bf16.gmra.mrb[36].mxu0 %v5661_v36  ;;  %v5707_v36 = vld [vmem:[#allocation5 + $0x8] ss:$12 sps:$4 sm:$0xff]  }
 0x1ce   :  { %879 = vmatprep.mubr.bf16.mxu0 %v5662_v37 }
 0x1d5   :  { %880 = vmatmul.mubr.bf16.gmra.mrb[40].mxu0 %v5664_v38 }
 0x1d6   :  { %887 = vmatprep.mubr.bf16.mxu0 %v5665_v39 }
 0x1dd   :  { %888 = vmatmul.mubr.bf16.gmra.mrb[44].mxu0 %v5667_v40 }
 0x1de   :  { %895 = vmatprep.mubr.bf16.mxu0 %v5668_v41 }
 0x1e5   :  { %896 = vmatmul.mubr.bf16.gmra.mrb[48].mxu0 %v5670_v42 }
 0x1e6   :  { %903 = vmatprep.mubr.bf16.mxu0 %v5671_v43 }
 0x1ed   :  { %904 = vmatmul.mubr.bf16.gmra.mrb[52].mxu0 %v5673_v44 }
 0x1ee   :  { %911 = vmatprep.mubr.bf16.mxu0 %v5674_v45 }
 0x1f5   :  { %912 = vmatmul.mubr.bf16.gmra.mrb[56].mxu0 %v5676_v46 }
 0x1f6   :  { %919 = vmatprep.mubr.bf16.mxu0 %v5677_v47 }
 0x1fd   :  { %920 = vmatmul.mubr.bf16.gmra.mrb[60].mxu0 %v5679_v48 }
 0x1fe   :  { %927 = vmatprep.mubr.bf16.mxu0 %v5680_v49 }
 0x205   :  { %928 = vmatmul.mubr.bf16.gmra.mrb[64].mxu0 %v5682_v50  ;;  %v392_v50 = vld [vmem:[#allocation7] sm:$0xff] }
 0x206   :  { %935 = vmatprep.mubr.bf16.mxu0 %v5683_v51  ;;  %1769 = vperm.xlu0 %5614, %v392_v50  }
 0x20d   :  { %936 = vmatmul.mubr.bf16.gmra.mrb[68].mxu0 %v5685_v52  ;;  %v393_v52 = vld [vmem:[#allocation7 + $0x8] sm:$0xff] }
 0x20e   :  { %943 = vmatprep.mubr.bf16.mxu0 %v5686_v53  ;;  %1774 = vperm.xlu0 %5614, %v393_v52  }
 0x215   :  { %944 = vmatmul.mubr.bf16.gmra.mrb[72].mxu0 %v5688_v54 }
 0x216   :  { %951 = vmatprep.mubr.bf16.mxu0 %v5689_v55 }
 0x21d   :  { %952 = vmatmul.mubr.bf16.gmra.mrb[76].mxu0 %v5691_v56 }
 0x21e   :  { %5309 = vmatprep.mubr.msk.bf16.mxu0 %vm1320_vm0, %v5707_v36 }
 0x258   :  { %v801_v58 = vpop.f32.mrb[0].mxu0 }
 0x259   :  { %v802_v59 = vadd.f32 %v6745_v57, %v801_v58  ;;  %v803_v60 = vpop.f32.mrb[1].mxu0 }
 0x25a   :  { %v804_v62 = vpop.f32.mrb[2].mxu0 }
 0x25b   :  { %v805_v63 = vadd.f32 %v6745_v57, %v804_v62  ;;  %v806_v1 = vpop.f32.mrb[3].mxu0  ;;  %v960_v2 = vmax.f32 %v802_v59, 0.0 }
 0x25c   :  { %v396_v1 = vld [vmem:[#allocation7 + $0x20] sm:$0xff] }
 0x25d   :  { %v961_v3 = vmax.f32 %v805_v63, 0.0  ;;  %v394_v63 = vld [vmem:[#allocation7 + $0x10] sm:$0xff]  ;;  %1789 = vperm.xlu0 %5614, %v396_v1  }
 0x25e   :  { %1779 = vperm.xlu1 %5615, %v394_v63   ;;  %v411_v63 = vld [vmem:[#allocation7 + $0x98] sm:$0xff] }
 0x25f   :  { %v6752_v4 = vpack.c.bf16 %v961_v3, %v960_v2  ;;  %v395_v3 = vld [vmem:[#allocation7 + $0x18] sm:$0xff] }
 0x260   :  { %v809_v5 = vpop.f32.mrb[4].mxu0 }
 0x261   :  { %v810_v6 = vadd.f32 %v6745_v57, %v809_v5  ;;  %v811_v7 = vpop.f32.mrb[5].mxu0  ;;  %1382 = vmatpush1.bf16.msra.mxu1 %v6752_v4 }
 0x262   :  { %v812_v8 = vpop.f32.mrb[6].mxu0  ;;  %1383 = vmatprep.subr.bf16.mxu1 %v8348_v0  ;;  %1784 = vperm.xlu1 %5615, %v395_v3   ;;  %v414_v3 = vld [vmem:[#allocation7 + $0xb0] sm:$0xff] }
 0x263   :  { %v813_v9 = vadd.f32 %v6745_v57, %v812_v8  ;;  %v814_v10 = vpop.f32.mrb[7].mxu0  ;;  %v962_v11 = vmax.f32 %v810_v6, 0.0  ;;  %v398_v6 = vld [vmem:[#allocation7 + $0x30] sm:$0xff] }
 0x264   :  { %1799 = vperm.xlu0 %5614, %v398_v6  }
 0x265   :  { %v963_v12 = vmax.f32 %v813_v9, 0.0 }
 0x267   :  { %v6758_v13 = vpack.c.bf16 %v963_v12, %v962_v11 }
 0x268   :  { %v817_v14 = vpop.f32.mrb[8].mxu0 }
 0x269   :  { %v818_v15 = vadd.f32 %v6745_v57, %v817_v14  ;;  %v819_v16 = vpop.f32.mrb[9].mxu0  ;;  %1384 = vmatpush1.bf16.msra.mxu1 %v6758_v13 }
 0x26a   :  { %v820_v17 = vpop.f32.mrb[10].mxu0  ;;  %1385 = vmatprep.subr.bf16.mxu1 %v8348_v0  ;;  %v400_v16 = vld [vmem:[#allocation7 + $0x40] sm:$0xff] }
 0x26b   :  { %v821_v18 = vadd.f32 %v6745_v57, %v820_v17  ;;  %v822_v19 = vpop.f32.mrb[11].mxu0  ;;  %v964_v20 = vmax.f32 %v818_v15, 0.0  ;;  %v397_v15 = vld [vmem:[#allocation7 + $0x28] sm:$0xff]  ;;  %1809 = vperm.xlu0 %5614, %v400_v16   ;;  %v415_v16 = vld [vmem:[#allocation7 + $0xb8] sm:$0xff] }
 0x26c   :  { %1794 = vperm.xlu1 %5615, %v397_v15  }
 0x26d   :  { %v965_v21 = vmax.f32 %v821_v18, 0.0  ;;  %v399_v18 = vld [vmem:[#allocation7 + $0x38] sm:$0xff] }
 0x26f   :  { %v6764_v22 = vpack.c.bf16 %v965_v21, %v964_v20  ;;  %v402_v20 = vld [vmem:[#allocation7 + $0x50] sm:$0xff] }
 0x270   :  { %v825_v23 = vpop.f32.mrb[12].mxu0  ;;  %1804 = vperm.xlu1 %5615, %v399_v18   ;;  %1819 = vperm.xlu0 %5614, %v402_v20  }
 0x271   :  { %v826_v24 = vadd.f32 %v6745_v57, %v825_v23  ;;  %v827_v25 = vpop.f32.mrb[13].mxu0  ;;  %1386 = vmatpush1.bf16.msra.mxu1 %v6764_v22 }
 0x272   :  { %v828_v26 = vpop.f32.mrb[14].mxu0  ;;  %1387 = vmatprep.subr.bf16.mxu1 %v8348_v0 }
 0x273   :  { %v829_v27 = vadd.f32 %v6745_v57, %v828_v26  ;;  %v830_v28 = vpop.f32.mrb[15].mxu0  ;;  %v966_v29 = vmax.f32 %v826_v24, 0.0 }
 0x275   :  { %v967_v30 = vmax.f32 %v829_v27, 0.0 }
 0x277   :  { %v6770_v31 = vpack.c.bf16 %v967_v30, %v966_v29  ;;  %v401_v29 = vld [vmem:[#allocation7 + $0x48] sm:$0xff]  ;;  %v404_v30 = vld [vmem:[#allocation7 + $0x60] sm:$0xff] }
 0x278   :  { %v833_v32 = vpop.f32.mrb[16].mxu0  ;;  %1814 = vperm.xlu1 %5615, %v401_v29   ;;  %1829 = vperm.xlu0 %5614, %v404_v30  }
 0x279   :  { %v834_v33 = vadd.f32 %v6745_v57, %v833_v32  ;;  %v835_v34 = vpop.f32.mrb[17].mxu0  ;;  %1388 = vmatpush1.bf16.msra.mxu1 %v6770_v31 }
 0x27a   :  { %v836_v35 = vpop.f32.mrb[18].mxu0  ;;  %1389 = vmatprep.subr.bf16.mxu1 %v8348_v0 }
 0x27b   :  { %v837_v37 = vadd.f32 %v6745_v57, %v836_v35  ;;  %v838_v38 = vpop.f32.mrb[19].mxu0  ;;  %v968_v39 = vmax.f32 %v834_v33, 0.0  ;;  %v403_v33 = vld [vmem:[#allocation7 + $0x58] sm:$0xff]  ;;  %v406_v35 = vld [vmem:[#allocation7 + $0x70] sm:$0xff] }
 0x27c   :  { %1824 = vperm.xlu1 %5615, %v403_v33   ;;  %1839 = vperm.xlu0 %5614, %v406_v35   ;;  %v419_v33 = vld [vmem:[#allocation7 + $0xd8] sm:$0xff]  ;;  %v422_v35 = vld [vmem:[#allocation7 + $0xf0] sm:$0xff] }
 0x27d   :  { %v969_v40 = vmax.f32 %v837_v37, 0.0 }
 0x27f   :  { %v6777_v41 = vpack.c.bf16 %v969_v40, %v968_v39 }
 0x280   :  { %v841_v42 = vpop.f32.mrb[20].mxu0 }
 0x281   :  { %v842_v43 = vadd.f32 %v6745_v57, %v841_v42  ;;  %v843_v44 = vpop.f32.mrb[21].mxu0  ;;  %1390 = vmatpush1.bf16.msra.mxu1 %v6777_v41  ;;  %v405_v42 = vld [vmem:[#allocation7 + $0x68] sm:$0xff] }
 0x282   :  { %v844_v45 = vpop.f32.mrb[22].mxu0  ;;  %1391 = vmatprep.subr.bf16.mxu1 %v8348_v0  ;;  %1834 = vperm.xlu1 %5615, %v405_v42   ;;  %v421_v42 = vld [vmem:[#allocation7 + $0xe8] sm:$0xff] }
 0x283   :  { %v845_v46 = vadd.f32 %v6745_v57, %v844_v45  ;;  %v846_v47 = vpop.f32.mrb[23].mxu0  ;;  %v970_v48 = vmax.f32 %v842_v43, 0.0  ;;  %v408_v43 = vld [vmem:[#allocation7 + $0x80] sm:$0xff] }
 0x284   :  { %1849 = vperm.xlu0 %5614, %v408_v43   ;;  %v407_v47 = vld [vmem:[#allocation7 + $0x78] sm:$0xff]  ;;  %v424_v43 = vld [vmem:[#allocation7 + $0x100] sm:$0xff] }
 0x285   :  { %v971_v49 = vmax.f32 %v845_v46, 0.0 }
 0x286   :  { %1844 = vperm.xlu1 %5615, %v407_v47  }
 0x287   :  { %v6783_v51 = vpack.c.bf16 %v971_v49, %v970_v48  ;;  %v410_v49 = vld [vmem:[#allocation7 + $0x90] sm:$0xff] }
 0x288   :  { %v849_v53 = vpop.f32.mrb[24].mxu0  ;;  %1859 = vperm.xlu0 %5614, %v410_v49  }
 0x289   :  { %v850_v54 = vadd.f32 %v6745_v57, %v849_v53  ;;  %v851_v55 = vpop.f32.mrb[25].mxu0  ;;  %1392 = vmatpush1.bf16.msra.mxu1 %v6783_v51 }
 0x28a   :  { %v852_v56 = vpop.f32.mrb[26].mxu0  ;;  %1393 = vmatprep.subr.bf16.mxu1 %v8348_v0 }
 0x28b   :  { %v853_v58 = vadd.f32 %v6745_v57, %v852_v56  ;;  %v854_v59 = vpop.f32.mrb[27].mxu0  ;;  %v972_v60 = vmax.f32 %v850_v54, 0.0  ;;  %v409_v56 = vld [vmem:[#allocation7 + $0x88] sm:$0xff] }
 0x28c   :  { %1854 = vperm.xlu1 %5615, %v409_v56  }
 0x28d   :  { %v973_v62 = vmax.f32 %v853_v58, 0.0  ;;  %v412_v58 = vld [vmem:[#allocation7 + $0xa0] sm:$0xff] }
 0x28e   :  { %1869 = vperm.xlu0 %5614, %v412_v58   ;;  %v425_v58 = vld [vmem:[#allocation7 + $0x108] sm:$0xff] }
 0x28f   :  { %v6789_v2 = vpack.c.bf16 %v973_v62, %v972_v60 }
 0x290   :  { %v857_v5 = vpop.f32.mrb[28].mxu0  ;;  %1864 = vperm.xlu1 %5615, %v411_v63  }
 0x291   :  { %v858_v7 = vadd.f32 %v6745_v57, %v857_v5  ;;  %v859_v8 = vpop.f32.mrb[29].mxu0  ;;  %1394 = vmatpush1.bf16.msra.mxu1 %v6789_v2 }
 0x292   :  { %v860_v9 = vpop.f32.mrb[30].mxu0  ;;  %1395 = vmatprep.subr.bf16.mxu1 %v8348_v0  ;;  %1879 = vperm.xlu0 %5614, %v414_v3   ;;  %v427_v3 = vld [vmem:[#allocation7 + $0x118] sm:$0xff] }
 0x293   :  { %v861_v10 = vadd.f32 %v6745_v57, %v860_v9  ;;  %v862_v11 = vpop.f32.mrb[31].mxu0  ;;  %v974_v12 = vmax.f32 %v858_v7, 0.0 }
 0x294   :  { %v416_v11 = vld [vmem:[#allocation7 + $0xc0] sm:$0xff] }
 0x295   :  { %v975_v14 = vmax.f32 %v861_v10, 0.0  ;;  %v413_v10 = vld [vmem:[#allocation7 + $0xa8] sm:$0xff] }
 0x296   :  { %1874 = vperm.xlu1 %5615, %v413_v10   ;;  %1889 = vperm.xlu0 %5614, %v416_v11  }
 0x297   :  { %v6795_v17 = vpack.c.bf16 %v975_v14, %v974_v12 }
 0x298   :  { %v865_v19 = vpop.f32.mrb[32].mxu0 }
 0x299   :  { %v866_v21 = vadd.f32 %v6745_v57, %v865_v19  ;;  %v867_v23 = vpop.f32.mrb[33].mxu0  ;;  %1396 = vmatpush1.bf16.msra.mxu1 %v6795_v17  ;;  %v418_v19 = vld [vmem:[#allocation7 + $0xd0] sm:$0xff] }
 0x29a   :  { %v868_v24 = vpop.f32.mrb[34].mxu0  ;;  %1397 = vmatprep.subr.bf16.mxu1 %v8348_v0  ;;  %1884 = vperm.xlu1 %5615, %v415_v16  }
 0x29b   :  { %v869_v25 = vadd.f32 %v6745_v57, %v868_v24  ;;  %v870_v26 = vpop.f32.mrb[35].mxu0  ;;  %v976_v27 = vmax.f32 %v866_v21, 0.0  ;;  %1899 = vperm.xlu0 %5614, %v418_v19   ;;  %v431_v19 = vld [vmem:[#allocation7 + $0x138] sm:$0xff] }
 0x29c   :  { %v417_v26 = vld [vmem:[#allocation7 + $0xc8] sm:$0xff] }
 0x29d   :  { %v977_v28 = vmax.f32 %v869_v25, 0.0 }
 0x29e   :  { %1894 = vperm.xlu1 %5615, %v417_v26  }
 0x29f   :  { %v6801_v32 = vpack.c.bf16 %v977_v28, %v976_v27  ;;  %v420_v27 = vld [vmem:[#allocation7 + $0xe0] sm:$0xff] }
 0x2a0   :  { %v873_v34 = vpop.f32.mrb[36].mxu0  ;;  %1909 = vperm.xlu0 %5614, %v420_v27  }
 0x2a1   :  { %v874_v36 = vadd.f32 %v6745_v57, %v873_v34  ;;  %v875_v37 = vpop.f32.mrb[37].mxu0  ;;  %1398 = vmatpush1.bf16.msra.mxu1 %v6801_v32 }
 0x2a2   :  { %v876_v38 = vpop.f32.mrb[38].mxu0  ;;  %1399 = vmatprep.subr.bf16.mxu1 %v8348_v0  ;;  %1904 = vperm.xlu1 %5615, %v419_v33  }
 0x2a3   :  { %v877_v39 = vadd.f32 %v6745_v57, %v876_v38  ;;  %v878_v40 = vpop.f32.mrb[39].mxu0  ;;  %v978_v44 = vmax.f32 %v874_v36, 0.0 }
 0x2a4   :  { %1919 = vperm.xlu0 %5614, %v422_v35  }
 0x2a5   :  { %v979_v45 = vmax.f32 %v877_v39, 0.0 }
 0x2a6   :  { %1914 = vperm.xlu1 %5615, %v421_v42  }
 0x2a7   :  { %v6807_v46 = vpack.c.bf16 %v979_v45, %v978_v44 }
 0x2a8   :  { %v881_v48 = vpop.f32.mrb[40].mxu0  ;;  %1929 = vperm.xlu0 %5614, %v424_v43  }
 0x2a9   :  { %v882_v50 = vadd.f32 %v6745_v57, %v881_v48  ;;  %v883_v52 = vpop.f32.mrb[41].mxu0  ;;  %1400 = vmatpush1.bf16.msra.mxu1 %v6807_v46  ;;  %v423_v48 = vld [vmem:[#allocation7 + $0xf8] sm:$0xff] }
 0x2aa   :  { %v884_v53 = vpop.f32.mrb[42].mxu0  ;;  %1401 = vmatprep.subr.bf16.mxu1 %v8348_v0  ;;  %1924 = vperm.xlu1 %5615, %v423_v48  }
 0x2ab   :  { %v885_v54 = vadd.f32 %v6745_v57, %v884_v53  ;;  %v886_v55 = vpop.f32.mrb[43].mxu0  ;;  %v980_v59 = vmax.f32 %v882_v50, 0.0  ;;  %v426_v50 = vld [vmem:[#allocation7 + $0x110] sm:$0xff] }
 0x2ac   :  { %1939 = vperm.xlu0 %5614, %v426_v50   ;;  %v5700_v50 = vld [vmem:[#allocation5 + $0x30] ss:$12 sps:$4 sm:$0xff]  }
 0x2ad   :  { %v981_v60 = vmax.f32 %v885_v54, 0.0 }
 0x2ae   :  { %1934 = vperm.xlu1 %5615, %v425_v58  }
 0x2af   :  { %v6813_v62 = vpack.c.bf16 %v981_v60, %v980_v59  ;;  %v428_v59 = vld [vmem:[#allocation7 + $0x120] sm:$0xff] }
 0x2b0   :  { %v889_v1 = vpop.f32.mrb[44].mxu0  ;;  %1949 = vperm.xlu0 %5614, %v428_v59  }
 0x2b1   :  { %v890_v5 = vadd.f32 %v6745_v57, %v889_v1  ;;  %v891_v6 = vpop.f32.mrb[45].mxu0  ;;  %1402 = vmatpush1.bf16.msra.mxu1 %v6813_v62 }
 0x2b2   :  { %v892_v7 = vpop.f32.mrb[46].mxu0  ;;  %1403 = vmatprep.subr.bf16.mxu1 %v8348_v0  ;;  %v430_v6 = vld [vmem:[#allocation7 + $0x130] sm:$0xff]  ;;  %1944 = vperm.xlu1 %5615, %v427_v3  }
 0x2b3   :  { %v893_v8 = vadd.f32 %v6745_v57, %v892_v7  ;;  %v894_v9 = vpop.f32.mrb[47].mxu0  ;;  %v982_v12 = vmax.f32 %v890_v5, 0.0 }
 0x2b4   :  { %1959 = vperm.xlu0 %5614, %v430_v6  }
 0x2b5   :  { %v983_v14 = vmax.f32 %v893_v8, 0.0 }
 0x2b7   :  { %v6819_v15 = vpack.c.bf16 %v983_v14, %v982_v12  ;;  %v429_v12 = vld [vmem:[#allocation7 + $0x128] sm:$0xff] }
 0x2b8   :  { %v897_v18 = vpop.f32.mrb[48].mxu0  ;;  %1954 = vperm.xlu1 %5615, %v429_v12   ;;  %v5772_v12 = vld [vmem:[#allocation11] sm:$0xff]  }
 0x2b9   :  { %v898_v20 = vadd.f32 %v6745_v57, %v897_v18  ;;  %v899_v21 = vpop.f32.mrb[49].mxu0  ;;  %1404 = vmatpush1.bf16.msra.mxu1 %v6819_v15 }
 0x2ba   :  { %v900_v23 = vpop.f32.mrb[50].mxu0  ;;  %1405 = vmatprep.subr.bf16.mxu1 %v8348_v0  ;;  %v5694_v21 = vld [vmem:[#allocation5] ss:$12 sps:$4 sm:$0xff]  }
 0x2bb   :  { %v901_v24 = vadd.f32 %v6745_v57, %v900_v23  ;;  %v902_v25 = vpop.f32.mrb[51].mxu0  ;;  %v984_v28 = vmax.f32 %v898_v20, 0.0 }
 0x2bc   :  { %v5695_v25 = vld [vmem:[#allocation5 + $0x1c] ss:$12 sps:$4 sm:$0xff]   ;;  %1964 = vperm.xlu1 %5615, %v431_v19  }
 0x2bd   :  { %v985_v29 = vmax.f32 %v901_v24, 0.0  ;;  %v5773_v19 = vld [vmem:[#allocation11 + $0x8] sm:$0xff]  }
 0x2bf   :  { %v6825_v30 = vpack.c.bf16 %v985_v29, %v984_v28 }
 0x2c0   :  { %v905_v34 = vpop.f32.mrb[52].mxu0 }
 0x2c1   :  { %v906_v36 = vadd.f32 %v6745_v57, %v905_v34  ;;  %v907_v37 = vpop.f32.mrb[53].mxu0  ;;  %1406 = vmatpush1.bf16.msra.mxu1 %v6825_v30 }
 0x2c2   :  { %v908_v38 = vpop.f32.mrb[54].mxu0  ;;  %1407 = vmatprep.subr.bf16.mxu1 %v8348_v0 }
 0x2c3   :  { %v909_v39 = vadd.f32 %v6745_v57, %v908_v38  ;;  %v910_v40 = vpop.f32.mrb[55].mxu0  ;;  %v986_v44 = vmax.f32 %v906_v36, 0.0  ;;  %v5697_v36 = vld [vmem:[#allocation5 + $0x18] ss:$12 sps:$4 sm:$0xff]  }
 0x2c5   :  { %v987_v45 = vmax.f32 %v909_v39, 0.0  ;;  %v5698_v39 = vld [vmem:[#allocation5 + $0x34] ss:$12 sps:$4 sm:$0xff]  }
 0x2c7   :  { %v6831_v47 = vpack.c.bf16 %v987_v45, %v986_v44 }
 0x2c8   :  { %v913_v49 = vpop.f32.mrb[56].mxu0 }
 0x2c9   :  { %v914_v52 = vadd.f32 %v6745_v57, %v913_v49  ;;  %v915_v53 = vpop.f32.mrb[57].mxu0  ;;  %1408 = vmatpush1.bf16.msra.mxu1 %v6831_v47 }
 0x2ca   :  { %v916_v54 = vpop.f32.mrb[58].mxu0  ;;  %1409 = vmatprep.subr.bf16.mxu1 %v8348_v0 }
 0x2cb   :  { %v917_v55 = vadd.f32 %v6745_v57, %v916_v54  ;;  %v918_v56 = vpop.f32.mrb[59].mxu0  ;;  %v988_v60 = vmax.f32 %v914_v52, 0.0  ;;  %v5701_v54 = vld [vmem:[#allocation5 + $0x4c] ss:$12 sps:$4 sm:$0xff]  }
 0x2cd   :  { %v989_v63 = vmax.f32 %v917_v55, 0.0 }
 0x2cf   :  { %v6837_v1 = vpack.c.bf16 %v989_v63, %v988_v60 }
 0x2d0   :  { %v921_v5 = vpop.f32.mrb[60].mxu0 }
 0x2d1   :  { %v922_v7 = vadd.f32 %v6745_v57, %v921_v5  ;;  %v923_v8 = vpop.f32.mrb[61].mxu0  ;;  %1410 = vmatpush1.bf16.msra.mxu1 %v6837_v1  ;;  %v5703_v5 = vld [vmem:[#allocation5 + $0x48] ss:$12 sps:$4 sm:$0xff]  }
 0x2d2   :  { %v924_v9 = vpop.f32.mrb[62].mxu0  ;;  %1411 = vmatprep.subr.bf16.mxu1 %v8348_v0  ;;  %v5704_v8 = vld [vmem:[#allocation5 + $0x64] ss:$12 sps:$4 sm:$0xff]  }
 0x2d3   :  { %v925_v10 = vadd.f32 %v6745_v57, %v924_v9  ;;  %v926_v11 = vpop.f32.mrb[63].mxu0  ;;  %v990_v14 = vmax.f32 %v922_v7, 0.0 }
 0x2d5   :  { %v991_v16 = vmax.f32 %v925_v10, 0.0 }
 0x2d7   :  { %v6843_v18 = vpack.c.bf16 %v991_v16, %v990_v14 }
 0x2d8   :  { %v929_v20 = vpop.f32.mrb[64].mxu0 }
 0x2d9   :  { %v930_v23 = vadd.f32 %v6745_v57, %v929_v20  ;;  %v931_v24 = vpop.f32.mrb[65].mxu0  ;;  %1412 = vmatpush1.bf16.msra.mxu1 %v6843_v18 }
 0x2da   :  { %v932_v26 = vpop.f32.mrb[66].mxu0  ;;  %2162 = vmatprep.subr.bf16.mxu1 %v8348_v0  ;;  %v5709_v24 = vld [vmem:[#allocation5 + $0x7c] ss:$12 sps:$4 sm:$0xff]  }
 0x2db   :  { %v933_v27 = vadd.f32 %v6745_v57, %v932_v26  ;;  %v934_v28 = vpop.f32.mrb[67].mxu0  ;;  %v992_v29 = vmax.f32 %v930_v23, 0.0  ;;  %v5708_v23 = vld [vmem:[#allocation5 + $0x20] ss:$12 sps:$4 sm:$0xff]  }
 0x2dc   :  { %1414 = vmatmul.mubr.bf16.vlgmr.msra.gmra.mrb[0].mxu1 %v5694_v21  ;;  %v5706_v21 = vld [vmem:[#allocation5 + $0x60] ss:$12 sps:$4 sm:$0xff]   ;;  %v5713_v28 = vld [vmem:[#allocation5 + $0x50] ss:$12 sps:$4 sm:$0xff]  }
 0x2dd   :  { %v993_v33 = vmax.f32 %v933_v27, 0.0  ;;  %1421 = vmatprep.mubr.bf16.mxu1 %v5695_v25  ;;  %2163 = vmatpush1.bf16.msra.mxu1 %v5772_v12  ;;  %v5774_v25 = vld [vmem:[#allocation11 + $0x10] sm:$0xff]   ;;  %v5775_v26 = vld [vmem:[#allocation11 + $0x18] sm:$0xff]   ;;  %v5784_v12 = vld [vmem:[#allocation11 + $0x60] sm:$0xff]  }
 0x2de   :  { %2164 = vmatprep.subr.bf16.mxu1 %v8348_v0  ;;  %v5711_v27 = vld [vmem:[#allocation5 + $0x78] ss:$12 sps:$4 sm:$0xff]  }
 0x2df   :  { %v6849_v34 = vpack.c.bf16 %v993_v33, %v992_v29  ;;  %v5714_v29 = vld [vmem:[#allocation5 + $0x94] ss:$12 sps:$4 sm:$0xff]  }
 0x2e0   :  { %v937_v35 = vpop.f32.mrb[68].mxu0  ;;  %v5717_v33 = vld [vmem:[#allocation5 + $0x68] ss:$12 sps:$4 sm:$0xff]  }
 0x2e1   :  { %v938_v37 = vadd.f32 %v6745_v57, %v937_v35  ;;  %v939_v38 = vpop.f32.mrb[69].mxu0  ;;  %5301 = vmatprep.subr.bf16.mxu0 %v6849_v34  ;;  %2165 = vmatpush1.bf16.msra.mxu1 %v5773_v19  ;;  %v5776_v35 = vld [vmem:[#allocation11 + $0x20] sm:$0xff]   ;;  %v5751_v19 = vld [vmem:[#allocation5 + $0x170] ss:$12 sps:$4 sm:$0xff]  }
 0x2e2   :  { %v940_v40 = vpop.f32.mrb[70].mxu0  ;;  %5302 = vmatpush3.bf16.msra.mxu0 %v6849_v34  ;;  %2166 = vmatprep.subr.bf16.mxu1 %v8348_v0  ;;  %v5718_v38 = vld [vmem:[#allocation5 + $0x80] ss:$12 sps:$4 sm:$0xff]  }
 0x2e3   :  { %v941_v42 = vadd.f32 %v6745_v57, %v940_v40  ;;  %v942_v43 = vpop.f32.mrb[71].mxu0  ;;  %v994_v44 = vmax.f32 %v938_v37, 0.0  ;;  %v5716_v37 = vld [vmem:[#allocation5 + $0x90] ss:$12 sps:$4 sm:$0xff]   ;;  %v5722_v40 = vld [vmem:[#allocation5 + $0x98] ss:$12 sps:$4 sm:$0xff]  }
 0x2e4   :  { %1422 = vmatmul.mubr.bf16.gmra.mrb[4].mxu1 %v5697_v36  ;;  %v5777_v36 = vld [vmem:[#allocation11 + $0x28] sm:$0xff]   ;;  %v5779_v43 = vld [vmem:[#allocation11 + $0x38] sm:$0xff]  }
 0x2e5   :  { %v995_v45 = vmax.f32 %v941_v42, 0.0  ;;  %1429 = vmatprep.mubr.bf16.mxu1 %v5698_v39  ;;  %2167 = vmatpush1.bf16.msra.mxu1 %v5774_v25  ;;  %v5719_v39 = vld [vmem:[#allocation5 + $0xac] ss:$12 sps:$4 sm:$0xff]  }
 0x2e6   :  { %2168 = vmatprep.subr.bf16.mxu1 %v8348_v0  ;;  %v5778_v42 = vld [vmem:[#allocation11 + $0x30] sm:$0xff]  }
 0x2e7   :  { %v6855_v48 = vpack.c.bf16 %v995_v45, %v994_v44  ;;  %v5721_v44 = vld [vmem:[#allocation5 + $0xa8] ss:$12 sps:$4 sm:$0xff]   ;;  %v5723_v45 = vld [vmem:[#allocation5 + $0xb0] ss:$12 sps:$4 sm:$0xff]   ;;  %v5764_v25 = vld [vmem:[#allocation5 + $0x1b8] ss:$12 sps:$4 sm:$0xff]  }
 0x2e8   :  { %v945_v49 = vpop.f32.mrb[72].mxu0 }
 0x2e9   :  { %v946_v52 = vadd.f32 %v6745_v57, %v945_v49  ;;  %v947_v53 = vpop.f32.mrb[73].mxu0  ;;  %5303 = vmatprep.subr.bf16.mxu0 %v6855_v48  ;;  %2169 = vmatpush1.bf16.msra.mxu1 %v5775_v26  ;;  %v5724_v49 = vld [vmem:[#allocation5 + $0xc4] ss:$12 sps:$4 sm:$0xff]  }
 0x2ea   :  { %v948_v55 = vpop.f32.mrb[74].mxu0  ;;  %5304 = vmatpush3.bf16.msra.mxu0 %v6855_v48  ;;  %2170 = vmatprep.subr.bf16.mxu1 %v8348_v0  ;;  %v5781_v53 = vld [vmem:[#allocation11 + $0x48] sm:$0xff]   ;;  %v5747_v26 = vld [vmem:[#allocation5 + $0x138] ss:$12 sps:$4 sm:$0xff]  }
 0x2eb   :  { %v949_v56 = vadd.f32 %v6745_v57, %v948_v55  ;;  %v950_v58 = vpop.f32.mrb[75].mxu0  ;;  %v996_v59 = vmax.f32 %v946_v52, 0.0  ;;  %v5780_v52 = vld [vmem:[#allocation11 + $0x40] sm:$0xff]  }
 0x2ec   :  { %1430 = vmatmul.mubr.bf16.gmra.mrb[8].mxu1 %v5700_v50  ;;  %v5727_v50 = vld [vmem:[#allocation5 + $0xc8] ss:$12 sps:$4 sm:$0xff]   ;;  %v5728_v55 = vld [vmem:[#allocation5 + $0xe0] ss:$12 sps:$4 sm:$0xff]   ;;  %v5732_v58 = vld [vmem:[#allocation5 + $0xf8] ss:$12 sps:$4 sm:$0xff]  }
 0x2ed   :  { %v997_v60 = vmax.f32 %v949_v56, 0.0  ;;  %1437 = vmatprep.mubr.bf16.mxu1 %v5701_v54  ;;  %2171 = vmatpush1.bf16.msra.mxu1 %v5776_v35  ;;  %v5726_v54 = vld [vmem:[#allocation5 + $0xc0] ss:$12 sps:$4 sm:$0xff]   ;;  %v5729_v56 = vld [vmem:[#allocation5 + $0xdc] ss:$12 sps:$4 sm:$0xff]  }
 0x2ee   :  { %2172 = vmatprep.subr.bf16.mxu1 %v8348_v0  ;;  %v5785_v35 = vld [vmem:[#allocation11 + $0x68] sm:$0xff]  }
 0x2ef   :  { %v6861_v63 = vpack.c.bf16 %v997_v60, %v996_v59  ;;  %v5782_v59 = vld [vmem:[#allocation11 + $0x50] sm:$0xff]   ;;  %v5783_v60 = vld [vmem:[#allocation11 + $0x58] sm:$0xff]  }
 0x2f0   :  { %v953_v3 = vpop.f32.mrb[76].mxu0 }
 0x2f1   :  { %v954_v6 = vadd.f32 %v6745_v57, %v953_v3  ;;  %v955_v7 = vpop.f32.mrb[77].mxu0  ;;  %5305 = vmatprep.subr.bf16.mxu0 %v6861_v63  ;;  %2173 = vmatpush1.bf16.msra.mxu1 %v5777_v36  ;;  %v5731_v3 = vld [vmem:[#allocation5 + $0xd8] ss:$12 sps:$4 sm:$0xff]   ;;  %v6908_v36 = vld [vmem:[#allocation5 + $0x168] ss:$12 sps:$4 sm:$0xff]  }
 0x2f2   :  { %v956_v9 = vpop.f32.mrb[78].mxu0  ;;  %5306 = vmatpush3.bf16.msra.mxu0 %v6861_v63  ;;  %2174 = vmatprep.subr.bf16.mxu1 %v8348_v0  ;;  %v5740_v7 = vld [vmem:[#allocation5 + $0x128] ss:$12 sps:$4 sm:$0xff]  }
 0x2f3   :  { %v957_v10 = vadd.f32 %v6745_v57, %v956_v9  ;;  %v958_v11 = vpop.f32.mrb[79].mxu0  ;;  %v998_v14 = vmax.f32 %v954_v6, 0.0  ;;  %v5712_v57 = vld [vmem:[#allocation5 + $0x38] ss:$12 sps:$4 sm:$0xff]   ;;  %v5735_v6 = vld [vmem:[#allocation5 + $0x110] ss:$12 sps:$4 sm:$0xff]  }
 0x2f4   :  { %1438 = vmatmul.mubr.bf16.gmra.mrb[12].mxu1 %v5703_v5  ;;  %v5733_v5 = vld [vmem:[#allocation5 + $0xf4] ss:$12 sps:$4 sm:$0xff]   ;;  %v5737_v9 = vld [vmem:[#allocation5 + $0x10c] ss:$12 sps:$4 sm:$0xff]  }
 0x2f5   :  { %v999_v16 = vmax.f32 %v957_v10, 0.0  ;;  %1445 = vmatprep.mubr.bf16.mxu1 %v5704_v8  ;;  %2175 = vmatpush1.bf16.msra.mxu1 %v5778_v42  ;;  %v5736_v8 = vld [vmem:[#allocation5 + $0xf0] ss:$12 sps:$4 sm:$0xff]   ;;  %v5743_v10 = vld [vmem:[#allocation5 + $0x140] ss:$12 sps:$4 sm:$0xff]  }
 0x2f6   :  { %2176 = vmatprep.subr.bf16.mxu1 %v8348_v0  ;;  %v5748_v11 = vld [vmem:[#allocation5 + $0x158] ss:$12 sps:$4 sm:$0xff]  }
 0x2f7   :  { %v6867_v20 = vpack.c.bf16 %v999_v16, %v998_v14  ;;  %v5739_v14 = vld [vmem:[#allocation5 + $0x108] ss:$12 sps:$4 sm:$0xff]   ;;  %v5741_v16 = vld [vmem:[#allocation5 + $0x124] ss:$12 sps:$4 sm:$0xff]  }
 0x2f8   :  { %v5763_v42 = vld [vmem:[#allocation5 + $0x198] ss:$12 sps:$4 sm:$0xff]  }
 0x2f9   :  { %5307 = vmatprep.subr.bf16.mxu0 %v6867_v20  ;;  %2177 = vmatpush1.bf16.msra.mxu1 %v5779_v43  ;;  %v5765_v43 = vld [vmem:[#allocation5 + $0x1b4] ss:$12 sps:$4 sm:$0xff]  }
 0x2fa   :  { %5308 = vmatpush3.bf16.msra.mxu0 %v6867_v20  ;;  %2178 = vmatprep.subr.bf16.mxu1 %v8348_v0 }
 0x2fb   :  { %2375 = vmatprep.subr.bf16.mxu0 %v8348_v0 }
 0x2fc   :  { %1446 = vmatmul.mubr.bf16.gmra.mrb[16].mxu1 %v5706_v21  ;;  %v5756_v21 = vld [vmem:[#allocation5 + $0x188] ss:$12 sps:$4 sm:$0xff]  }
 0x2fd   :  { %5310 = vmatmul.mubr.msk.bf16.vlgmr.msra.gmra.mrb[80].mxu0 %vm1320_vm0, %v5708_v23  ;;  %1453 = vmatprep.mubr.bf16.mxu1 %v5709_v24  ;;  %v5744_v23 = vld [vmem:[#allocation5 + $0x120] ss:$12 sps:$4 sm:$0xff]   ;;  %v5745_v24 = vld [vmem:[#allocation5 + $0x13c] ss:$12 sps:$4 sm:$0xff]  }
 0x2fe   :  { %5313 = vmatprep.mubr.msk.bf16.mxu0 %vm1320_vm0, %v5712_v57  ;;  %2179 = vmatpush1.bf16.msra.mxu1 %v5780_v52  ;;  %v5759_v57 = vld [vmem:[#allocation5 + $0x1a0] ss:$12 sps:$4 sm:$0xff]  }
 0x2ff   :  { %2180 = vmatprep.subr.bf16.mxu1 %v8348_v0 }
 0x302   :  { %2181 = vmatpush1.bf16.msra.mxu1 %v5781_v53 }
 0x303   :  { %2182 = vmatprep.subr.bf16.mxu1 %v8348_v0 }
 0x304   :  { %1454 = vmatmul.mubr.bf16.gmra.mrb[20].mxu1 %v5711_v27  ;;  %v5749_v27 = vld [vmem:[#allocation5 + $0x154] ss:$12 sps:$4 sm:$0xff]  }
 0x305   :  { %5314 = vmatmul.mubr.msk.bf16.gmra.mrb[84].mxu0 %vm1320_vm0, %v5713_v28  ;;  %1461 = vmatprep.mubr.bf16.mxu1 %v5714_v29  ;;  %v5767_v28 = vld [vmem:[#allocation5 + $0x1d0] ss:$12 sps:$4 sm:$0xff]  }
 0x306   :  { %5317 = vmatprep.mubr.msk.bf16.mxu0 %vm1320_vm0, %v5717_v33  ;;  %2183 = vmatpush1.bf16.msra.mxu1 %v5782_v59  ;;  %v5752_v29 = vld [vmem:[#allocation5 + $0x150] ss:$12 sps:$4 sm:$0xff]   ;;  %v6905_v33 = vld [vmem:[#allocation5 + $0x16c] ss:$12 sps:$4 sm:$0xff]  }
 0x307   :  { %2184 = vmatprep.subr.bf16.mxu1 %v8348_v0 }
 0x30a   :  { %2185 = vmatpush1.bf16.msra.mxu1 %v5783_v60 }
 0x30b   :  { %2186 = vmatprep.subr.bf16.mxu1 %v8348_v0 }
 0x30c   :  { %1462 = vmatmul.mubr.bf16.gmra.mrb[24].mxu1 %v5716_v37  ;;  %v6910_v37 = vld [vmem:[#allocation5 + $0x184] ss:$12 sps:$4 sm:$0xff]  }
 0x30d   :  { %5318 = vmatmul.mubr.msk.bf16.gmra.mrb[88].mxu0 %vm1320_vm0, %v5718_v38  ;;  %1469 = vmatprep.mubr.bf16.mxu1 %v5719_v39  ;;  %v5786_v38 = vld [vmem:[#allocation11 + $0x70] sm:$0xff]   ;;  %v5760_v39 = vld [vmem:[#allocation5 + $0x180] ss:$12 sps:$4 sm:$0xff]  }
 0x30e   :  { %5321 = vmatprep.mubr.msk.bf16.mxu0 %vm1320_vm0, %v5722_v40  ;;  %2187 = vmatpush1.bf16.msra.mxu1 %v5784_v12  ;;  %v5761_v40 = vld [vmem:[#allocation5 + $0x19c] ss:$12 sps:$4 sm:$0xff]  }
 0x30f   :  { %2188 = vmatprep.subr.bf16.mxu1 %v8348_v0 }
 0x312   :  { %2189 = vmatpush1.bf16.msra.mxu1 %v5785_v35 }
 0x313   :  { %2190 = vmatprep.subr.bf16.mxu1 %v8348_v0 }
 0x314   :  { %1470 = vmatmul.mubr.bf16.gmra.mrb[28].mxu1 %v5721_v44  ;;  %v5768_v44 = vld [vmem:[#allocation5 + $0x1b0] ss:$12 sps:$4 sm:$0xff]  }
 0x315   :  { %5322 = vmatmul.mubr.msk.bf16.gmra.mrb[92].mxu0 %vm1320_vm0, %v5723_v45  ;;  %1477 = vmatprep.mubr.bf16.mxu1 %v5724_v49  ;;  %v5769_v45 = vld [vmem:[#allocation5 + $0x1cc] ss:$12 sps:$4 sm:$0xff]   ;;  %v5771_v49 = vld [vmem:[#allocation5 + $0x1c8] ss:$12 sps:$4 sm:$0xff]  }
 0x316   :  { %5325 = vmatprep.mubr.msk.bf16.mxu0 %vm1320_vm0, %v5727_v50  ;;  %2191 = vmatpush1.bf16.msra.mxu1 %v5786_v38 }
 0x317   :  { %2192 = vmatprep.subr.bf16.mxu1 %v8348_v0 }
 0x31c   :  { %1478 = vmatmul.mubr.bf16.gmra.mrb[32].mxu1 %v5726_v54 }
 0x31d   :  { %5326 = vmatmul.mubr.msk.bf16.gmra.mrb[96].mxu0 %vm1320_vm0, %v5728_v55  ;;  %1485 = vmatprep.mubr.bf16.mxu1 %v5729_v56  ;;  %v6917_v55 = vpop.permute.xlu0 %1769 }
 0x31e   :  { %5329 = vmatprep.mubr.msk.bf16.mxu0 %vm1320_vm0, %v5732_v58 }
 0x324   :  { %1486 = vmatmul.mubr.bf16.gmra.mrb[36].mxu1 %v5731_v3  ;;  %v6919_v3 = vpop.permute.xlu0 %1774 }
 0x325   :  { %1493 = vmatprep.mubr.bf16.mxu1 %v5733_v5  ;;  %5330 = vmatmul.mubr.msk.bf16.gmra.mrb[100].mxu0 %vm1320_vm0, %v5735_v6  ;;  %v6921_v5 = vpop.permute.xlu1 %1779 }
 0x326   :  { %5333 = vmatprep.mubr.msk.bf16.mxu0 %vm1320_vm0, %v5740_v7 }
 0x32c   :  { %1494 = vmatmul.mubr.bf16.gmra.mrb[40].mxu1 %v5736_v8 }
 0x32d   :  { %1501 = vmatprep.mubr.bf16.mxu1 %v5737_v9  ;;  %5334 = vmatmul.mubr.msk.bf16.gmra.mrb[104].mxu0 %vm1320_vm0, %v5743_v10  ;;  %v6923_v9 = vpop.permute.xlu0 %1789 }
 0x32e   :  { %5337 = vmatprep.mubr.msk.bf16.mxu0 %vm1320_vm0, %v5748_v11  ;;  %v6925_v11 = vpop.permute.xlu1 %1784 }
 0x334   :  { %1502 = vmatmul.mubr.bf16.gmra.mrb[44].mxu1 %v5739_v14  ;;  %v6927_v14 = vpop.permute.xlu0 %1799 }
 0x335   :  { %1509 = vmatprep.mubr.bf16.mxu1 %v5741_v16  ;;  %5338 = vmatmul.mubr.msk.bf16.gmra.mrb[108].mxu0 %vm1320_vm0, %v5751_v19  ;;  %v6929_v19 = vpop.permute.xlu1 %1794 }
 0x336   :  { %5341 = vmatprep.mubr.msk.bf16.mxu0 %vm1320_vm0, %v5756_v21 }
 0x33c   :  { %1510 = vmatmul.mubr.bf16.gmra.mrb[48].mxu1 %v5744_v23 }
 0x33d   :  { %1517 = vmatprep.mubr.bf16.mxu1 %v5745_v24  ;;  %5342 = vmatmul.mubr.msk.bf16.gmra.mrb[112].mxu0 %vm1320_vm0, %v5759_v57  ;;  %v6931_v24 = vpop.permute.xlu0 %1809  ;;  %v6933_v57 = vpop.permute.xlu1 %1804 }
 0x33e   :  { %5345 = vmatprep.mubr.msk.bf16.mxu0 %vm1320_vm0, %v5764_v25 }
 0x344   :  { %1518 = vmatmul.mubr.bf16.gmra.mrb[52].mxu1 %v5747_v26 }
 0x345   :  { %1525 = vmatprep.mubr.bf16.mxu1 %v5749_v27  ;;  %5346 = vmatmul.mubr.msk.bf16.gmra.mrb[116].mxu0 %vm1320_vm0, %v5767_v28 }
 0x346   :  { %2407 = vmatprep.mubr.bf16.mxu0 %v6748_v61  ;;  %v5787_v61 = vld [vmem:[#allocation11 + $0x78] sm:$0xff]  }
 0x347   :  { %2193 = vmatpush1.bf16.msra.mxu1 %v5787_v61 }
 0x348   :  { %5557 = vmatprep.subr.bf16.mxu1 %v8348_v0 }
 0x34c   :  { %1526 = vmatmul.mubr.bf16.gmra.mrb[56].mxu1 %v5752_v29 }
 0x34d   :  { %1533 = vmatprep.mubr.bf16.mxu1 %v6905_v33 }
 0x354   :  { %1534 = vmatmul.mubr.bf16.gmra.mrb[60].mxu1 %v6908_v36 }
 0x355   :  { %1541 = vmatprep.mubr.bf16.mxu1 %v6910_v37 }
 0x35c   :  { %1542 = vmatmul.mubr.bf16.gmra.mrb[64].mxu1 %v5760_v39 }
 0x35d   :  { %1549 = vmatprep.mubr.bf16.mxu1 %v5761_v40 }
 0x364   :  { %1550 = vmatmul.mubr.bf16.gmra.mrb[68].mxu1 %v5763_v42 }
 0x365   :  { %1557 = vmatprep.mubr.bf16.mxu1 %v5765_v43 }
 0x36c   :  { %1558 = vmatmul.mubr.bf16.gmra.mrb[72].mxu1 %v5768_v44 }
 0x36d   :  { %1565 = vmatprep.mubr.bf16.mxu1 %v5769_v45 }
 0x374   :  { %1566 = vmatmul.mubr.bf16.gmra.mrb[76].mxu1 %v5771_v49  ;;  %v6937_v49 = vpop.permute.xlu0 %1819 }
 0x3af   :  { %v1415_v50 = vpop.f32.mrb[0].mxu1 }
 0x3b0   :  { %v1417_v52 = vpop.f32.mrb[1].mxu1 }
 0x3b1   :  { %v1418_v53 = vpop.f32.mrb[2].mxu1 }
 0x3b2   :  { %v1420_v54 = vpop.f32.mrb[3].mxu1 }
 0x3b7   :  { %v1423_v56 = vpop.f32.mrb[4].mxu1 }
 0x3b8   :  { %v1425_v58 = vpop.f32.mrb[5].mxu1 }
 0x3b9   :  { %v1426_v59 = vpop.f32.mrb[6].mxu1  ;;  %v6941_v58 = vpop.permute.xlu1 %1814 }
 0x3ba   :  { %v1428_v60 = vpop.f32.mrb[7].mxu1 }
 0x3bf   :  { %v1431_v6 = vpop.f32.mrb[8].mxu1 }
 0x3c0   :  { %v1433_v7 = vpop.f32.mrb[9].mxu1 }
 0x3c1   :  { %v1434_v8 = vpop.f32.mrb[10].mxu1 }
 0x3c2   :  { %v1436_v10 = vpop.f32.mrb[11].mxu1 }
 0x3c7   :  { %v1439_v12 = vpop.f32.mrb[12].mxu1 }
 0x3c8   :  { %v1441_v16 = vpop.f32.mrb[13].mxu1 }
 0x3c9   :  { %v1442_v21 = vpop.f32.mrb[14].mxu1 }
 0x3ca   :  { %v1444_v23 = vpop.f32.mrb[15].mxu1 }
 0x3cf   :  { %v1447_v25 = vpop.f32.mrb[16].mxu1 }
 0x3d0   :  { %v5311_v26 = vpop.f32.mrb[80].mxu0  ;;  %v1449_v27 = vpop.f32.mrb[17].mxu1 }
 0x3d1   :  { %v1617_v28 = vadd.f32 %v5311_v26, %v1423_v56  ;;  %v1608_v29 = vpop.f32.mrb[81].mxu0  ;;  %v1450_v35 = vpop.f32.mrb[18].mxu1 }
 0x3d2   :  { %v1609_v38 = vadd.f32 %v1608_v29, %v1415_v50  ;;  %v5312_v61 = vpop.f32.mrb[82].mxu0  ;;  %v1452_v39 = vpop.f32.mrb[19].mxu1 }
 0x3d3   :  { %v1620_v40 = vadd.f32 %v5312_v61, %v1426_v59  ;;  %v1611_v42 = vpop.f32.mrb[83].mxu0  ;;  %v1969_v44 = vmul.f32 %v6921_v5, %v1617_v28 }
 0x3d4   :  { %v1612_v43 = vadd.f32 %v1611_v42, %v1418_v53  ;;  %v1967_v52 = vmul.f32 %v6917_v55, %v1609_v38 }
 0x3d5   :  { %v1970_v45 = vmul.f32 %v6925_v11, %v1620_v40  ;;  %v6946_v40 = vpop.permute.xlu0 %1829 }
 0x3d6   :  { %v1968_v54 = vmul.f32 %v6919_v3, %v1612_v43 }
 0x3d7   :  { %v2008_v56 = vpack.c.bf16 %v1970_v45, %v1969_v44  ;;  %v1455_v60 = vpop.f32.mrb[20].mxu1 }
 0x3d8   :  { %v5315_v50 = vpop.f32.mrb[84].mxu0  ;;  %v2007_v7 = vpack.c.bf16 %v1968_v54, %v1967_v52  ;;  %v1457_v10 = vpop.f32.mrb[21].mxu1 }
 0x3d9   :  { %v1633_v59 = vadd.f32 %v5315_v50, %v1439_v12  ;;  %v1624_v16 = vpop.f32.mrb[85].mxu0  ;;  %v1458_v53 = vpop.f32.mrb[22].mxu1 }
 0x3da   :  { %v1625_v23 = vadd.f32 %v1624_v16, %v1431_v6  ;;  %v5316_v26 = vpop.f32.mrb[86].mxu0  ;;  %2194 = vmatprep.mubr.bf16.mxu1 %v2007_v7  ;;  %v1460_v27 = vpop.f32.mrb[23].mxu1 }
 0x3db   :  { %v1636_v28 = vadd.f32 %v5316_v26, %v1442_v21  ;;  %v1627_v29 = vpop.f32.mrb[87].mxu0  ;;  %2195 = vmatmul.mubr.bf16.vlgmr.msra.gmra.mrb[80].mxu1 %v6752_v4  ;;  %v1973_v61 = vmul.f32 %v6927_v14, %v1633_v59  ;;  %v6950_v6 = vpop.permute.xlu1 %1824 }
 0x3dc   :  { %v1628_v38 = vadd.f32 %v1627_v29, %v1434_v8  ;;  %2202 = vmatprep.mubr.bf16.mxu1 %v2008_v56  ;;  %v1971_v12 = vmul.f32 %v6923_v9, %v1625_v23  ;;  %v6959_v29 = vpop.permute.xlu0 %1839 }
 0x3dd   :  { %v1974_v39 = vmul.f32 %v6933_v57, %v1636_v28 }
 0x3de   :  { %v1972_v42 = vmul.f32 %v6929_v19, %v1628_v38 }
 0x3df   :  { %v1463_v43 = vpop.f32.mrb[24].mxu1  ;;  %v2010_v44 = vpack.c.bf16 %v1974_v39, %v1973_v61  ;;  %v6955_v27 = vpop.permute.xlu1 %1834 }
 0x3e0   :  { %v5319_v21 = vpop.f32.mrb[88].mxu0  ;;  %v2009_v45 = vpack.c.bf16 %v1972_v42, %v1971_v12  ;;  %v1465_v52 = vpop.f32.mrb[25].mxu1  ;;  %8421 = vst [vmem:[#allocation40_spill] sm:$0xff] %v6955_v27 }
 0x3e1   :  { %v1649_v4 = vadd.f32 %v5319_v21, %v1455_v60  ;;  %v1640_v8 = vpop.f32.mrb[89].mxu0  ;;  %v1466_v54 = vpop.f32.mrb[26].mxu1 }
 0x3e2   :  { %v1641_v56 = vadd.f32 %v1640_v8, %v1447_v25  ;;  %v5320_v50 = vpop.f32.mrb[90].mxu0  ;;  %v1468_v7 = vpop.f32.mrb[27].mxu1 }
 0x3e3   :  { %v1652_v10 = vadd.f32 %v5320_v50, %v1458_v53  ;;  %v1643_v59 = vpop.f32.mrb[91].mxu0  ;;  %2203 = vmatmul.mubr.bf16.gmra.mrb[84].mxu1 %v6758_v13  ;;  %v1977_v23 = vmul.f32 %v6937_v49, %v1649_v4  ;;  %v6962_v8 = vpop.permute.xlu1 %1844 }
 0x3e4   :  { %v1644_v16 = vadd.f32 %v1643_v59, %v1450_v35  ;;  %2210 = vmatprep.mubr.bf16.mxu1 %v2009_v45  ;;  %v1975_v28 = vmul.f32 %v6931_v24, %v1641_v56  ;;  %v6972_v59 = vpop.permute.xlu0 %1849 }
 0x3e5   :  { %v1978_v26 = vmul.f32 %v6950_v6, %v1652_v10  ;;  %8422 = vst [vmem:[#allocation41_spill] sm:$0xff] %v6972_v59 }
 0x3e6   :  { %v1976_v60 = vmul.f32 %v6941_v58, %v1644_v16 }
 0x3e7   :  { %v1471_v25 = vpop.f32.mrb[28].mxu1  ;;  %v2012_v38 = vpack.c.bf16 %v1978_v26, %v1977_v23 }
 0x3e8   :  { %v5323_v53 = vpop.f32.mrb[92].mxu0  ;;  %v1473_v61 = vpop.f32.mrb[29].mxu1  ;;  %v2011_v39 = vpack.c.bf16 %v1976_v60, %v1975_v28 }
 0x3e9   :  { %v1665_v13 = vadd.f32 %v5323_v53, %v1471_v25  ;;  %v1656_v35 = vpop.f32.mrb[93].mxu0  ;;  %v1474_v12 = vpop.f32.mrb[30].mxu1 }
 0x3ea   :  { %v1657_v42 = vadd.f32 %v1656_v35, %v1463_v43  ;;  %v5324_v21 = vpop.f32.mrb[94].mxu0  ;;  %v1476_v45 = vpop.f32.mrb[31].mxu1 }
 0x3eb   :  { %v1668_v52 = vadd.f32 %v5324_v21, %v1474_v12  ;;  %v1659_v4 = vpop.f32.mrb[95].mxu0  ;;  %2211 = vmatmul.mubr.bf16.gmra.mrb[88].mxu1 %v6764_v22  ;;  %v6965_v50 = vmul.f32 %v6959_v29, %v1665_v13  ;;  %v6977_v35 = vpop.permute.xlu1 %1854 }
 0x3ec   :  { %v1660_v56 = vadd.f32 %v1659_v4, %v1466_v54  ;;  %2218 = vmatprep.mubr.bf16.mxu1 %v2010_v44  ;;  %v1979_v10 = vmul.f32 %v6946_v40, %v1657_v42  ;;  %8423 = vst [vmem:[#allocation42_spill] sm:$0xff] %v6977_v35  ;;  %v6985_v21 = vpop.permute.xlu0 %1859 }
 0x3ed   :  { %v6968_v7 = vmul.f32 %v6962_v8, %v1668_v52  ;;  %8424 = vst [vmem:[#allocation43_spill] sm:$0xff] %v6985_v21 }
 0x3ee   :  { %v1980_v43 = vmul.f32 %v6955_v27, %v1660_v56 }
 0x3ef   :  { %v1479_v16 = vpop.f32.mrb[32].mxu1 }
 0x3f0   :  { %v5327_v23 = vpop.f32.mrb[96].mxu0  ;;  %v1481_v26 = vpop.f32.mrb[33].mxu1  ;;  %v2013_v54 = vpack.c.bf16 %v1980_v43, %v1979_v10 }
 0x3f1   :  { %v1672_v44 = vpop.f32.mrb[97].mxu0  ;;  %v1482_v28 = vpop.f32.mrb[34].mxu1 }
 0x3f2   :  { %v1673_v60 = vadd.f32 %v1672_v44, %v1479_v16  ;;  %v5328_v25 = vpop.f32.mrb[98].mxu0  ;;  %v1484_v53 = vpop.f32.mrb[35].mxu1 }
 0x3f3   :  { %v1675_v61 = vpop.f32.mrb[99].mxu0  ;;  %2219 = vmatmul.mubr.bf16.gmra.mrb[92].mxu1 %v6770_v31  ;;  %v6989_v44 = vpop.permute.xlu1 %1864 }
 0x3f4   :  { %v1676_v13 = vadd.f32 %v1675_v61, %v1482_v28  ;;  %2226 = vmatprep.mubr.bf16.mxu1 %v2011_v39  ;;  %v6980_v12 = vmul.f32 %v6972_v59, %v1673_v60  ;;  %8425 = vst [vmem:[#allocation44_spill] sm:$0xff] %v6989_v44  ;;  %v7000_v61 = vpop.permute.xlu0 %1869 }
 0x3f5   :  { %8426 = vst [vmem:[#allocation45_spill] sm:$0xff] %v7000_v61 }
 0x3f6   :  { %v6983_v42 = vmul.f32 %v6977_v35, %v1676_v13 }
 0x3f7   :  { %v1487_v45 = vpop.f32.mrb[36].mxu1 }
 0x3f8   :  { %v1681_v52 = vadd.f32 %v5327_v23, %v1487_v45  ;;  %v1489_v4 = vpop.f32.mrb[37].mxu1  ;;  %v5331_v56 = vpop.f32.mrb[100].mxu0  ;;  %v2015_v10 = vpack.c.bf16 %v6983_v42, %v6980_v12 }
 0x3f9   :  { %v1490_v31 = vpop.f32.mrb[38].mxu1  ;;  %v1688_v43 = vpop.f32.mrb[101].mxu0 }
 0x3fa   :  { %v1684_v39 = vadd.f32 %v5328_v25, %v1490_v31  ;;  %v1492_v16 = vpop.f32.mrb[39].mxu1  ;;  %v5332_v26 = vpop.f32.mrb[102].mxu0  ;;  %v6993_v60 = vmul.f32 %v6985_v21, %v1681_v52 }
 0x3fb   :  { %2227 = vmatmul.mubr.bf16.gmra.mrb[96].mxu1 %v6777_v41  ;;  %v1691_v28 = vpop.f32.mrb[103].mxu0  ;;  %v7002_v52 = vpop.permute.xlu1 %1874 }
 0x3fc   :  { %v6996_v23 = vmul.f32 %v6989_v44, %v1684_v39  ;;  %2234 = vmatprep.mubr.bf16.mxu1 %v2012_v38  ;;  %8427 = vst [vmem:[#allocation46_spill] sm:$0xff] %v7002_v52 }
 0x3ff   :  { %v1495_v25 = vpop.f32.mrb[40].mxu1 }
 0x400   :  { %v1689_v13 = vadd.f32 %v1688_v43, %v1495_v25  ;;  %v1497_v12 = vpop.f32.mrb[41].mxu1  ;;  %v5335_v42 = vpop.f32.mrb[104].mxu0 }
 0x401   :  { %v1498_v45 = vpop.f32.mrb[42].mxu1  ;;  %v1704_v4 = vpop.f32.mrb[105].mxu0 }
 0x402   :  { %v1692_v41 = vadd.f32 %v1691_v28, %v1498_v45  ;;  %v1500_v31 = vpop.f32.mrb[43].mxu1  ;;  %v5336_v16 = vpop.f32.mrb[106].mxu0  ;;  %v7006_v38 = vmul.f32 %v7000_v61, %v1689_v13 }
 0x403   :  { %2235 = vmatmul.mubr.bf16.gmra.mrb[100].mxu1 %v6783_v51  ;;  %v1707_v39 = vpop.f32.mrb[107].mxu0  ;;  %v7013_v25 = vpop.permute.xlu0 %1879 }
 0x404   :  { %v7009_v0 = vmul.f32 %v7002_v52, %v1692_v41  ;;  %2242 = vmatprep.mubr.bf16.mxu1 %v2013_v54  ;;  %8428 = vst [vmem:[#allocation47_spill] sm:$0xff] %v7013_v25  ;;  %v7015_v13 = vpop.permute.xlu1 %1884  ;;  %v8430_v52 = vpack.c.bf16 %v6968_v7, %v6965_v50 }
 0x405   :  { %8429 = vst [vmem:[#allocation48_spill] sm:$0xff] %v7015_v13 }
 0x407   :  { %v1503_v28 = vpop.f32.mrb[44].mxu1 }
 0x408   :  { %v1697_v12 = vadd.f32 %v5331_v56, %v1503_v28  ;;  %v1505_v45 = vpop.f32.mrb[45].mxu1  ;;  %v5339_v31 = vpop.f32.mrb[108].mxu0 }
 0x409   :  { %v1506_v53 = vpop.f32.mrb[46].mxu1  ;;  %v1720_v22 = vpop.f32.mrb[109].mxu0 }
 0x40a   :  { %v1700_v51 = vadd.f32 %v5332_v26, %v1506_v53  ;;  %v1508_v35 = vpop.f32.mrb[47].mxu1  ;;  %v5340_v59 = vpop.f32.mrb[110].mxu0  ;;  %v1989_v54 = vmul.f32 %v7013_v25, %v1697_v12 }
 0x40b   :  { %2243 = vmatmul.mubr.bf16.gmra.mrb[104].mxu1 %v6789_v2  ;;  %v1723_v41 = vpop.f32.mrb[111].mxu0  ;;  %v7023_v28 = vpop.permute.xlu0 %1889 }
 0x40c   :  { %v1990_v43 = vmul.f32 %v7015_v13, %v1700_v51  ;;  %2250 = vmatprep.mubr.bf16.mxu1 %v8430_v52  ;;  %8431 = vst [vmem:[#allocation49_spill] sm:$0xff] %v7023_v28  ;;  %v7029_v12 = vpop.permute.xlu1 %1894 }
 0x40d   :  { %8432 = vst [vmem:[#allocation50_spill] sm:$0xff] %v7029_v12 }
 0x40e   :  { %v2018_v56 = vpack.c.bf16 %v1990_v43, %v1989_v54 }
 0x40f   :  { %v1511_v45 = vpop.f32.mrb[48].mxu1  ;;  %v7034_v43 = vpop.permute.xlu0 %1899 }
 0x410   :  { %v1705_v26 = vadd.f32 %v1704_v4, %v1511_v45  ;;  %v1513_v35 = vpop.f32.mrb[49].mxu1  ;;  %v7025_v53 = vpop.f32.mrb[112].mxu0 }
 0x411   :  { %v1514_v61 = vpop.f32.mrb[50].mxu1  ;;  %v1736_v44 = vpop.f32.mrb[113].mxu0 }
 0x412   :  { %v1708_v2 = vadd.f32 %v1707_v39, %v1514_v61  ;;  %v1516_v21 = vpop.f32.mrb[51].mxu1  ;;  %v7027_v27 = vpop.f32.mrb[114].mxu0  ;;  %v1991_v7 = vmul.f32 %v7023_v28, %v1705_v26 }
 0x413   :  { %2251 = vmatmul.mubr.bf16.gmra.mrb[108].mxu1 %v6795_v17  ;;  %v1739_v50 = vpop.f32.mrb[115].mxu0  ;;  %v7042_v25 = vpop.permute.xlu1 %1904 }
 0x414   :  { %v1992_v52 = vmul.f32 %v7029_v12, %v1708_v2  ;;  %2258 = vmatprep.mubr.bf16.mxu1 %v2015_v10  ;;  %v7050_v12 = vpop.permute.xlu0 %1909 }
 0x415   :  { %8434 = vst [vmem:[#allocation51_spill] sm:$0xff] %v7050_v12 }
 0x416   :  { %v2019_v4 = vpack.c.bf16 %v1992_v52, %v1991_v7 }
 0x417   :  { %v1519_v51 = vpop.f32.mrb[52].mxu1  ;;  %v7052_v28 = vpop.permute.xlu1 %1914 }
 0x418   :  { %v1713_v54 = vadd.f32 %v5335_v42, %v1519_v51  ;;  %v1521_v45 = vpop.f32.mrb[53].mxu1  ;;  %v7036_v61 = vpop.f32.mrb[116].mxu0  ;;  %v8433_v42 = vpack.c.bf16 %v6996_v23, %v6993_v60  ;;  %8435 = vst [vmem:[#allocation52_spill] sm:$0xff] %v7052_v28  ;;  %v8436_v60 = vpack.c.bf16 %v7009_v0, %v7006_v38 }
 0x419   :  { %v1522_v21 = vpop.f32.mrb[54].mxu1  ;;  %v7038_v39 = vpop.f32.mrb[117].mxu0 }
 0x41a   :  { %v1716_v35 = vadd.f32 %v5336_v16, %v1522_v21  ;;  %v1524_v13 = vpop.f32.mrb[55].mxu1  ;;  %v7040_v17 = vpop.f32.mrb[118].mxu0  ;;  %v1993_v26 = vmul.f32 %v7034_v43, %v1713_v54 }
 0x41b   :  { %2259 = vmatmul.mubr.bf16.gmra.mrb[112].mxu1 %v6801_v32  ;;  %v1755_v10 = vpop.f32.mrb[119].mxu0 }
 0x41c   :  { %v1994_v2 = vmul.f32 %v7042_v25, %v1716_v35  ;;  %2266 = vmatprep.mubr.bf16.mxu1 %v8433_v42 }
 0x41e   :  { %v2020_v7 = vpack.c.bf16 %v1994_v2, %v1993_v26 }
 0x41f   :  { %v1527_v52 = vpop.f32.mrb[56].mxu1 }
 0x420   :  { %v1721_v51 = vadd.f32 %v1720_v22, %v1527_v52  ;;  %v1529_v16 = vpop.f32.mrb[57].mxu1  ;;  %v7060_v52 = vpop.permute.xlu0 %1919 }
 0x421   :  { %v1530_v13 = vpop.f32.mrb[58].mxu1  ;;  %8437 = vst [vmem:[#allocation53_spill] sm:$0xff] %v7060_v52  ;;  %v7062_v16 = vpop.permute.xlu1 %1924 }
 0x422   :  { %v1724_v45 = vadd.f32 %v1723_v41, %v1530_v13  ;;  %v1532_v21 = vpop.f32.mrb[59].mxu1  ;;  %v1995_v32 = vmul.f32 %v7050_v12, %v1721_v51  ;;  %8438 = vst [vmem:[#allocation54_spill] sm:$0xff] %v7062_v16 }
 0x423   :  { %2267 = vmatmul.mubr.bf16.gmra.mrb[116].mxu1 %v6807_v46 }
 0x424   :  { %v1996_v54 = vmul.f32 %v7052_v28, %v1724_v45  ;;  %2274 = vmatprep.mubr.bf16.mxu1 %v8436_v60 }
 0x426   :  { %v2021_v23 = vpack.c.bf16 %v1996_v54, %v1995_v32  ;;  %v7069_v54 = vpop.permute.xlu1 %1934 }
 0x427   :  { %v1535_v22 = vpop.f32.mrb[60].mxu1  ;;  %8440 = vst [vmem:[#allocation56_spill] sm:$0xff] %v7069_v54 }
 0x428   :  { %v1729_v35 = vadd.f32 %v5339_v31, %v1535_v22  ;;  %v1537_v26 = vpop.f32.mrb[61].mxu1 }
 0x429   :  { %v1538_v41 = vpop.f32.mrb[62].mxu1 }
 0x42a   :  { %v1732_v2 = vadd.f32 %v5340_v59, %v1538_v41  ;;  %v1540_v42 = vpop.f32.mrb[63].mxu1  ;;  %v1997_v46 = vmul.f32 %v7060_v52, %v1729_v35  ;;  %v7067_v59 = vpop.permute.xlu0 %1929 }
 0x42b   :  { %2275 = vmatmul.mubr.bf16.gmra.mrb[120].mxu1 %v6813_v62  ;;  %8439 = vst [vmem:[#allocation55_spill] sm:$0xff] %v7067_v59  ;;  %v7078_v42 = vpop.permute.xlu1 %1944 }
 0x42c   :  { %v1998_v51 = vmul.f32 %v7062_v16, %v1732_v2  ;;  %2282 = vmatprep.mubr.bf16.mxu1 %v2018_v56  ;;  %8442 = vst [vmem:[#allocation58_spill] sm:$0xff] %v7078_v42 }
 0x42e   :  { %v2022_v0 = vpack.c.bf16 %v1998_v51, %v1997_v46  ;;  %v7076_v2 = vpop.permute.xlu0 %1939 }
 0x42f   :  { %v1543_v38 = vpop.f32.mrb[64].mxu1  ;;  %8441 = vst [vmem:[#allocation57_spill] sm:$0xff] %v7076_v2 }
 0x430   :  { %v1737_v13 = vadd.f32 %v1736_v44, %v1543_v38  ;;  %v1545_v45 = vpop.f32.mrb[65].mxu1 }
 0x431   :  { %v1546_v31 = vpop.f32.mrb[66].mxu1 }
 0x432   :  { %v1740_v21 = vadd.f32 %v1739_v50, %v1546_v31  ;;  %v1548_v32 = vpop.f32.mrb[67].mxu1  ;;  %v1999_v62 = vmul.f32 %v7067_v59, %v1737_v13  ;;  %v7084_v31 = vpop.permute.xlu0 %1949 }
 0x433   :  { %2283 = vmatmul.mubr.bf16.gmra.mrb[124].mxu1 %v6819_v15  ;;  %8443 = vst [vmem:[#allocation59_spill] sm:$0xff] %v7084_v31 }
 0x434   :  { %v2000_v60 = vmul.f32 %v7069_v54, %v1740_v21  ;;  %2290 = vmatprep.mubr.bf16.mxu1 %v2019_v4  ;;  %v7086_v21 = vpop.permute.xlu1 %1954 }
 0x435   :  { %8444 = vst [vmem:[#allocation60_spill] sm:$0xff] %v7086_v21 }
 0x436   :  { %v2023_v22 = vpack.c.bf16 %v2000_v60, %v1999_v62 }
 0x437   :  { %v1551_v56 = vpop.f32.mrb[68].mxu1 }
 0x438   :  { %v1745_v35 = vadd.f32 %v7025_v53, %v1551_v56  ;;  %v1553_v44 = vpop.f32.mrb[69].mxu1 }
 0x439   :  { %v1554_v26 = vpop.f32.mrb[70].mxu1  ;;  %v7093_v44 = vpop.permute.xlu0 %1959 }
 0x43a   :  { %v1748_v50 = vadd.f32 %v7027_v27, %v1554_v26  ;;  %v1556_v41 = vpop.f32.mrb[71].mxu1  ;;  %v2001_v15 = vmul.f32 %v7076_v2, %v1745_v35  ;;  %8445 = vst [vmem:[#allocation61_spill] sm:$0xff] %v7093_v44  ;;  %v7095_v26 = vpop.permute.xlu1 %1964 }
 0x43b   :  { %2291 = vmatmul.mubr.bf16.gmra.mrb[128].mxu1 %v6825_v30  ;;  %8446 = vst [vmem:[#allocation62_spill] sm:$0xff] %v7095_v26 }
 0x43c   :  { %v2002_v46 = vmul.f32 %v7078_v42, %v1748_v50  ;;  %2298 = vmatprep.mubr.bf16.mxu1 %v2020_v7 }
 0x43e   :  { %v2024_v4 = vpack.c.bf16 %v2002_v46, %v2001_v15 }
 0x43f   :  { %v1559_v51 = vpop.f32.mrb[72].mxu1 }
 0x440   :  { %v1753_v53 = vadd.f32 %v7038_v39, %v1559_v51  ;;  %v1561_v38 = vpop.f32.mrb[73].mxu1 }
 0x441   :  { %v1562_v13 = vpop.f32.mrb[74].mxu1 }
 0x442   :  { %v1756_v45 = vadd.f32 %v1755_v10, %v1562_v13  ;;  %v1564_v27 = vpop.f32.mrb[75].mxu1  ;;  %v2003_v30 = vmul.f32 %v7084_v31, %v1753_v53 }
 0x443   :  { %2299 = vmatmul.mubr.bf16.gmra.mrb[132].mxu1 %v6831_v47 }
 0x444   :  { %v2004_v32 = vmul.f32 %v7086_v21, %v1756_v45  ;;  %2306 = vmatprep.mubr.bf16.mxu1 %v2021_v23 }
 0x446   :  { %v2025_v7 = vpack.c.bf16 %v2004_v32, %v2003_v30 }
 0x447   :  { %v1567_v62 = vpop.f32.mrb[76].mxu1 }
 0x448   :  { %v1761_v60 = vadd.f32 %v7036_v61, %v1567_v62  ;;  %v1569_v39 = vpop.f32.mrb[77].mxu1 }
 0x449   :  { %v1570_v56 = vpop.f32.mrb[78].mxu1 }
 0x44a   :  { %v1764_v10 = vadd.f32 %v7040_v17, %v1570_v56  ;;  %v1572_v35 = vpop.f32.mrb[79].mxu1  ;;  %v2005_v47 = vmul.f32 %v7093_v44, %v1761_v60 }
 0x44b   :  { %2307 = vmatmul.mubr.bf16.gmra.mrb[136].mxu1 %v6837_v1  ;;  %v7106_v1 = vld [vmem:[#allocation13] ss:$0 sm:$0xff] }
 0x44c   :  { %v2006_v50 = vmul.f32 %v7095_v26, %v1764_v10  ;;  %2314 = vmatprep.mubr.bf16.mxu1 %v2022_v0 }
 0x44e   :  { %v2026_v23 = vpack.c.bf16 %v2006_v50, %v2005_v47 }
 0x453   :  { %2315 = vmatmul.mubr.bf16.gmra.mrb[140].mxu1 %v6843_v18 }
 0x454   :  { %2322 = vmatprep.mubr.bf16.mxu1 %v2023_v22 }
 0x45b   :  { %2323 = vmatmul.mubr.bf16.gmra.mrb[144].mxu1 %v6849_v34 }
 0x45c   :  { %2330 = vmatprep.mubr.bf16.mxu1 %v2024_v4 }
 0x463   :  { %2331 = vmatmul.mubr.bf16.gmra.mrb[148].mxu1 %v6855_v48 }
 0x464   :  { %2338 = vmatprep.mubr.bf16.mxu1 %v2025_v7 }
 0x46b   :  { %2339 = vmatmul.mubr.bf16.gmra.mrb[152].mxu1 %v6861_v63  ;;  %v8447_v63 = vmov 0  }
 0x46c   :  { %2346 = vmatprep.mubr.bf16.mxu1 %v2026_v23 }
 0x473   :  { %2347 = vmatmul.mubr.bf16.gmra.mrb[156].mxu1 %v6867_v20 }
 0x474   :  { %2527 = vmatprep.mubr.bf16.mxu1 %v6905_v33 }
 0x4ae   :  { %v2196_v61 = vpop.f32.mrb[80].mxu1 }
 0x4af   :  { %v2198_v17 = vpop.f32.mrb[81].mxu1  ;;  %v2197_v18 = vadd.f32 %v7106_v1, %v2196_v61 }
 0x4b0   :  { %v2199_v0 = vpop.f32.mrb[82].mxu1 }
 0x4b1   :  { %v2200_v34 = vadd.f32 %v7106_v1, %v2199_v0  ;;  %v2201_v22 = vpop.f32.mrb[83].mxu1 }
 0x4b3   :  { %v7110_v41 = vpack.c.bf16 %v2200_v34, %v2197_v18 }
 0x4b5   :  { %2376 = vmatpush1.bf16.msra.mxu0 %v7110_v41  ;;  %5573 = vmatpush1.bf16.msra.mxu1 %v7110_v41 }
 0x4b6   :  { %v2204_v48 = vpop.f32.mrb[84].mxu1  ;;  %2377 = vmatprep.subr.bf16.mxu0 %v8447_v63  ;;  %5558 = vmatprep.subr.bf16.mxu1 %v8447_v63 }
 0x4b7   :  { %v2206_v20 = vpop.f32.mrb[85].mxu1  ;;  %v2205_v15 = vadd.f32 %v7106_v1, %v2204_v48 }
 0x4b8   :  { %v2207_v33 = vpop.f32.mrb[86].mxu1 }
 0x4b9   :  { %v2208_v46 = vadd.f32 %v7106_v1, %v2207_v33  ;;  %v2209_v4 = vpop.f32.mrb[87].mxu1 }
 0x4bb   :  { %v7118_v51 = vpack.c.bf16 %v2208_v46, %v2205_v15 }
 0x4bd   :  { %2378 = vmatpush1.bf16.msra.mxu0 %v7118_v51  ;;  %5574 = vmatpush1.bf16.msra.mxu1 %v7118_v51 }
 0x4be   :  { %v2212_v53 = vpop.f32.mrb[88].mxu1  ;;  %2379 = vmatprep.subr.bf16.mxu0 %v8447_v63  ;;  %5559 = vmatprep.subr.bf16.mxu1 %v8447_v63 }
 0x4bf   :  { %v2214_v38 = vpop.f32.mrb[89].mxu1  ;;  %v2213_v45 = vadd.f32 %v7106_v1, %v2212_v53 }
 0x4c0   :  { %v2215_v13 = vpop.f32.mrb[90].mxu1 }
 0x4c1   :  { %v2216_v27 = vadd.f32 %v7106_v1, %v2215_v13  ;;  %v2217_v30 = vpop.f32.mrb[91].mxu1 }
 0x4c3   :  { %v7126_v32 = vpack.c.bf16 %v2216_v27, %v2213_v45 }
 0x4c5   :  { %2380 = vmatpush1.bf16.msra.mxu0 %v7126_v32  ;;  %5575 = vmatpush1.bf16.msra.mxu1 %v7126_v32 }
 0x4c6   :  { %v2220_v7 = vpop.f32.mrb[92].mxu1  ;;  %2381 = vmatprep.subr.bf16.mxu0 %v8447_v63  ;;  %5560 = vmatprep.subr.bf16.mxu1 %v8447_v63 }
 0x4c7   :  { %v2222_v62 = vpop.f32.mrb[93].mxu1  ;;  %v2221_v39 = vadd.f32 %v7106_v1, %v2220_v7 }
 0x4c8   :  { %v2223_v60 = vpop.f32.mrb[94].mxu1 }
 0x4c9   :  { %v2224_v56 = vadd.f32 %v7106_v1, %v2223_v60  ;;  %v2225_v10 = vpop.f32.mrb[95].mxu1 }
 0x4cb   :  { %v7134_v35 = vpack.c.bf16 %v2224_v56, %v2221_v39 }
 0x4cd   :  { %2382 = vmatpush1.bf16.msra.mxu0 %v7134_v35  ;;  %5576 = vmatpush1.bf16.msra.mxu1 %v7134_v35 }
 0x4ce   :  { %v2228_v47 = vpop.f32.mrb[96].mxu1  ;;  %2383 = vmatprep.subr.bf16.mxu0 %v8447_v63  ;;  %5561 = vmatprep.subr.bf16.mxu1 %v8447_v63 }
 0x4cf   :  { %v2230_v50 = vpop.f32.mrb[97].mxu1  ;;  %v2229_v61 = vadd.f32 %v7106_v1, %v2228_v47 }
 0x4d0   :  { %v2231_v23 = vpop.f32.mrb[98].mxu1 }
 0x4d1   :  { %v2232_v17 = vadd.f32 %v7106_v1, %v2231_v23  ;;  %v2233_v0 = vpop.f32.mrb[99].mxu1 }
 0x4d3   :  { %v7142_v18 = vpack.c.bf16 %v2232_v17, %v2229_v61 }
 0x4d5   :  { %2384 = vmatpush1.bf16.msra.mxu0 %v7142_v18  ;;  %5577 = vmatpush1.bf16.msra.mxu1 %v7142_v18 }
 0x4d6   :  { %v2236_v34 = vpop.f32.mrb[100].mxu1  ;;  %2385 = vmatprep.subr.bf16.mxu0 %v8447_v63  ;;  %5562 = vmatprep.subr.bf16.mxu1 %v8447_v63 }
 0x4d7   :  { %v2238_v22 = vpop.f32.mrb[101].mxu1  ;;  %v2237_v20 = vadd.f32 %v7106_v1, %v2236_v34 }
 0x4d8   :  { %v2239_v48 = vpop.f32.mrb[102].mxu1 }
 0x4d9   :  { %v2240_v33 = vadd.f32 %v7106_v1, %v2239_v48  ;;  %v2241_v15 = vpop.f32.mrb[103].mxu1 }
 0x4db   :  { %v7150_v46 = vpack.c.bf16 %v2240_v33, %v2237_v20 }
 0x4dd   :  { %2386 = vmatpush1.bf16.msra.mxu0 %v7150_v46  ;;  %5578 = vmatpush1.bf16.msra.mxu1 %v7150_v46 }
 0x4de   :  { %v2244_v4 = vpop.f32.mrb[104].mxu1  ;;  %2387 = vmatprep.subr.bf16.mxu0 %v8447_v63  ;;  %5563 = vmatprep.subr.bf16.mxu1 %v8447_v63 }
 0x4df   :  { %v2246_v53 = vpop.f32.mrb[105].mxu1  ;;  %v2245_v13 = vadd.f32 %v7106_v1, %v2244_v4 }
 0x4e0   :  { %v2247_v38 = vpop.f32.mrb[106].mxu1 }
 0x4e1   :  { %v2248_v45 = vadd.f32 %v7106_v1, %v2247_v38  ;;  %v2249_v27 = vpop.f32.mrb[107].mxu1 }
 0x4e3   :  { %v7158_v30 = vpack.c.bf16 %v2248_v45, %v2245_v13 }
 0x4e5   :  { %2388 = vmatpush1.bf16.msra.mxu0 %v7158_v30  ;;  %5579 = vmatpush1.bf16.msra.mxu1 %v7158_v30 }
 0x4e6   :  { %v2252_v7 = vpop.f32.mrb[108].mxu1  ;;  %2389 = vmatprep.subr.bf16.mxu0 %v8447_v63  ;;  %5564 = vmatprep.subr.bf16.mxu1 %v8447_v63 }
 0x4e7   :  { %v2254_v62 = vpop.f32.mrb[109].mxu1  ;;  %v2253_v39 = vadd.f32 %v7106_v1, %v2252_v7 }
 0x4e8   :  { %v2255_v60 = vpop.f32.mrb[110].mxu1 }
 0x4e9   :  { %v2256_v56 = vadd.f32 %v7106_v1, %v2255_v60  ;;  %v2257_v10 = vpop.f32.mrb[111].mxu1 }
 0x4eb   :  { %v7166_v47 = vpack.c.bf16 %v2256_v56, %v2253_v39 }
 0x4ed   :  { %2390 = vmatpush1.bf16.msra.mxu0 %v7166_v47  ;;  %5580 = vmatpush1.bf16.msra.mxu1 %v7166_v47 }
 0x4ee   :  { %v2260_v50 = vpop.f32.mrb[112].mxu1  ;;  %2391 = vmatprep.subr.bf16.mxu0 %v8447_v63  ;;  %5565 = vmatprep.subr.bf16.mxu1 %v8447_v63 }
 0x4ef   :  { %v2262_v23 = vpop.f32.mrb[113].mxu1  ;;  %v2261_v17 = vadd.f32 %v7106_v1, %v2260_v50 }
 0x4f0   :  { %v2263_v61 = vpop.f32.mrb[114].mxu1 }
 0x4f1   :  { %v2264_v0 = vadd.f32 %v7106_v1, %v2263_v61  ;;  %v2265_v34 = vpop.f32.mrb[115].mxu1 }
 0x4f3   :  { %v7174_v22 = vpack.c.bf16 %v2264_v0, %v2261_v17 }
 0x4f5   :  { %8448 = vst [vmem:[#allocation63_spill] sm:$0xff] %v7174_v22  ;;  %2392 = vmatpush1.bf16.msra.mxu0 %v7174_v22  ;;  %5581 = vmatpush1.bf16.msra.mxu1 %v7174_v22 }
 0x4f6   :  { %v2268_v48 = vpop.f32.mrb[116].mxu1  ;;  %2393 = vmatprep.subr.bf16.mxu0 %v8447_v63  ;;  %5566 = vmatprep.subr.bf16.mxu1 %v8447_v63 }
 0x4f7   :  { %v2270_v20 = vpop.f32.mrb[117].mxu1  ;;  %v2269_v15 = vadd.f32 %v7106_v1, %v2268_v48 }
 0x4f8   :  { %v2271_v33 = vpop.f32.mrb[118].mxu1 }
 0x4f9   :  { %v2272_v4 = vadd.f32 %v7106_v1, %v2271_v33  ;;  %v2273_v53 = vpop.f32.mrb[119].mxu1 }
 0x4fb   :  { %v7182_v38 = vpack.c.bf16 %v2272_v4, %v2269_v15 }
 0x4fd   :  { %8449 = vst [vmem:[#allocation64_spill] sm:$0xff] %v7182_v38  ;;  %2394 = vmatpush1.bf16.msra.mxu0 %v7182_v38  ;;  %5582 = vmatpush1.bf16.msra.mxu1 %v7182_v38 }
 0x4fe   :  { %v2276_v13 = vpop.f32.mrb[120].mxu1  ;;  %2395 = vmatprep.subr.bf16.mxu0 %v8447_v63  ;;  %5567 = vmatprep.subr.bf16.mxu1 %v8447_v63 }
 0x4ff   :  { %v2278_v45 = vpop.f32.mrb[121].mxu1  ;;  %v2277_v7 = vadd.f32 %v7106_v1, %v2276_v13 }
 0x500   :  { %v2279_v27 = vpop.f32.mrb[122].mxu1 }
 0x501   :  { %v2280_v62 = vadd.f32 %v7106_v1, %v2279_v27  ;;  %v2281_v60 = vpop.f32.mrb[123].mxu1 }
 0x503   :  { %v7190_v39 = vpack.c.bf16 %v2280_v62, %v2277_v7 }
 0x505   :  { %8450 = vst [vmem:[#allocation65_spill] sm:$0xff] %v7190_v39  ;;  %2396 = vmatpush1.bf16.msra.mxu0 %v7190_v39  ;;  %5583 = vmatpush1.bf16.msra.mxu1 %v7190_v39 }
 0x506   :  { %v2284_v56 = vpop.f32.mrb[124].mxu1  ;;  %2397 = vmatprep.subr.bf16.mxu0 %v8447_v63  ;;  %5568 = vmatprep.subr.bf16.mxu1 %v8447_v63 }
 0x507   :  { %v2286_v10 = vpop.f32.mrb[125].mxu1  ;;  %v2285_v23 = vadd.f32 %v7106_v1, %v2284_v56 }
 0x508   :  { %v2287_v50 = vpop.f32.mrb[126].mxu1 }
 0x509   :  { %v2288_v61 = vadd.f32 %v7106_v1, %v2287_v50  ;;  %v2289_v17 = vpop.f32.mrb[127].mxu1 }
 0x50b   :  { %v7198_v0 = vpack.c.bf16 %v2288_v61, %v2285_v23 }
 0x50d   :  { %8451 = vst [vmem:[#allocation66_spill] sm:$0xff] %v7198_v0  ;;  %2398 = vmatpush1.bf16.msra.mxu0 %v7198_v0  ;;  %5584 = vmatpush1.bf16.msra.mxu1 %v7198_v0 }
 0x50e   :  { %v2292_v34 = vpop.f32.mrb[128].mxu1  ;;  %2399 = vmatprep.subr.bf16.mxu0 %v8447_v63  ;;  %5569 = vmatprep.subr.bf16.mxu1 %v8447_v63 }
 0x50f   :  { %v2294_v48 = vpop.f32.mrb[129].mxu1  ;;  %v2293_v33 = vadd.f32 %v7106_v1, %v2292_v34 }
 0x510   :  { %v2295_v20 = vpop.f32.mrb[130].mxu1 }
 0x511   :  { %v2296_v15 = vadd.f32 %v7106_v1, %v2295_v20  ;;  %v2297_v4 = vpop.f32.mrb[131].mxu1 }
 0x513   :  { %v7206_v53 = vpack.c.bf16 %v2296_v15, %v2293_v33 }
 0x515   :  { %8452 = vst [vmem:[#allocation67_spill] sm:$0xff] %v7206_v53  ;;  %2400 = vmatpush1.bf16.msra.mxu0 %v7206_v53  ;;  %5585 = vmatpush1.bf16.msra.mxu1 %v7206_v53 }
 0x516   :  { %v2300_v13 = vpop.f32.mrb[132].mxu1  ;;  %2401 = vmatprep.subr.bf16.mxu0 %v8447_v63  ;;  %5570 = vmatprep.subr.bf16.mxu1 %v8447_v63 }
 0x517   :  { %v2302_v45 = vpop.f32.mrb[133].mxu1  ;;  %v2301_v7 = vadd.f32 %v7106_v1, %v2300_v13 }
 0x518   :  { %v2303_v27 = vpop.f32.mrb[134].mxu1 }
 0x519   :  { %v2304_v62 = vadd.f32 %v7106_v1, %v2303_v27  ;;  %v2305_v60 = vpop.f32.mrb[135].mxu1 }
 0x51b   :  { %v7214_v56 = vpack.c.bf16 %v2304_v62, %v2301_v7  ;;  %v5788_v62 = vld [vmem:[#allocation14] sm:$0xff]  }
 0x51d   :  { %8453 = vst [vmem:[#allocation68_spill] sm:$0xff] %v7214_v56  ;;  %2402 = vmatpush1.bf16.msra.mxu0 %v7214_v56  ;;  %5586 = vmatpush1.bf16.msra.mxu1 %v7214_v56 }
 0x51e   :  { %v2308_v10 = vpop.f32.mrb[136].mxu1  ;;  %2403 = vmatprep.subr.bf16.mxu0 %v8447_v63  ;;  %5571 = vmatprep.subr.bf16.mxu1 %v8447_v63 }
 0x51f   :  { %v2310_v50 = vpop.f32.mrb[137].mxu1  ;;  %v2309_v61 = vadd.f32 %v7106_v1, %v2308_v10 }
 0x520   :  { %v2311_v23 = vpop.f32.mrb[138].mxu1  ;;  %v5838_v50 = vld [vmem:[#allocation5] ss:$12 sps:$4 sm:$0xff]  }
 0x521   :  { %v2312_v17 = vadd.f32 %v7106_v1, %v2311_v23  ;;  %v2313_v34 = vpop.f32.mrb[139].mxu1 }
 0x522   :  { %v5839_v34 = vld [vmem:[#allocation5 + $0x1c] ss:$12 sps:$4 sm:$0xff]  }
 0x523   :  { %v7222_v48 = vpack.c.bf16 %v2312_v17, %v2309_v61 }
 0x525   :  { %8454 = vst [vmem:[#allocation69_spill] sm:$0xff] %v7222_v48  ;;  %2404 = vmatpush1.bf16.msra.mxu0 %v7222_v48  ;;  %5587 = vmatpush1.bf16.msra.mxu1 %v7222_v48 }
 0x526   :  { %v2316_v20 = vpop.f32.mrb[140].mxu1  ;;  %2405 = vmatprep.subr.bf16.mxu0 %v8447_v63  ;;  %5572 = vmatprep.subr.bf16.mxu1 %v8447_v63 }
 0x527   :  { %v2318_v33 = vpop.f32.mrb[141].mxu1  ;;  %v2317_v4 = vadd.f32 %v7106_v1, %v2316_v20  ;;  %v5789_v20 = vld [vmem:[#allocation14 + $0x8] sm:$0xff]  }
 0x528   :  { %v2319_v15 = vpop.f32.mrb[142].mxu1 }
 0x529   :  { %v2320_v13 = vadd.f32 %v7106_v1, %v2319_v15  ;;  %v2321_v45 = vpop.f32.mrb[143].mxu1 }
 0x52a   :  { %v5840_v45 = vld [vmem:[#allocation5 + $0x18] ss:$12 sps:$4 sm:$0xff]  }
 0x52b   :  { %v7230_v27 = vpack.c.bf16 %v2320_v13, %v2317_v4 }
 0x52d   :  { %8455 = vst [vmem:[#allocation70_spill] sm:$0xff] %v7230_v27  ;;  %2406 = vmatpush1.bf16.msra.mxu0 %v7230_v27  ;;  %5588 = vmatpush1.bf16.msra.mxu1 %v7230_v27 }
 0x52e   :  { %v2324_v7 = vpop.f32.mrb[144].mxu1  ;;  %2956 = vmatprep.subr.bf16.mxu0 %v8447_v63 }
 0x52f   :  { %v2326_v60 = vpop.f32.mrb[145].mxu1  ;;  %v2325_v23 = vadd.f32 %v7106_v1, %v2324_v7 }
 0x530   :  { %v2327_v10 = vpop.f32.mrb[146].mxu1  ;;  %2408 = vmatmul.mubr.bf16.vlgmr.msra.gmra.mrb[120].mxu0 %v5838_v50  ;;  %2528 = vmatmul.mubr.bf16.vlgmr.msra.gmra.mrb[160].mxu1 %v6908_v36  ;;  %v5790_v36 = vld [vmem:[#allocation14 + $0x10] sm:$0xff]   ;;  %v5843_v50 = vld [vmem:[#allocation5 + $0x19c] ss:$12 sps:$4 sm:$0xff]  }
 0x531   :  { %v2328_v61 = vadd.f32 %v7106_v1, %v2327_v10  ;;  %v2329_v17 = vpop.f32.mrb[147].mxu1  ;;  %2415 = vmatprep.mubr.bf16.mxu0 %v5839_v34  ;;  %2535 = vmatprep.mubr.bf16.mxu1 %v6910_v37  ;;  %v5841_v37 = vld [vmem:[#allocation5 + $0x180] ss:$12 sps:$4 sm:$0xff]  }
 0x532   :  { %2957 = vmatpush1.bf16.msra.mxu0 %v5788_v62  ;;  %v5842_v10 = vld [vmem:[#allocation5 + $0x34] ss:$12 sps:$4 sm:$0xff]  }
 0x533   :  { %v7239_v33 = vpack.c.bf16 %v2328_v61, %v2325_v23  ;;  %2958 = vmatprep.subr.bf16.mxu0 %v8447_v63 }
 0x535   :  { %8456 = vst [vmem:[#allocation71_spill] sm:$0xff] %v7239_v33  ;;  %5349 = vmatprep.subr.bf16.mxu1 %v7239_v33 }
 0x536   :  { %v2332_v15 = vpop.f32.mrb[148].mxu1  ;;  %5350 = vmatpush3.bf16.msra.mxu1 %v7239_v33  ;;  %2959 = vmatpush1.bf16.msra.mxu0 %v5789_v20  ;;  %v5844_v20 = vld [vmem:[#allocation5 + $0x30] ss:$12 sps:$4 sm:$0xff]  }
 0x537   :  { %v2334_v4 = vpop.f32.mrb[149].mxu1  ;;  %2960 = vmatprep.subr.bf16.mxu0 %v8447_v63  ;;  %v2333_v7 = vadd.f32 %v7106_v1, %v2332_v15  ;;  %v5845_v15 = vld [vmem:[#allocation5 + $0x198] ss:$12 sps:$4 sm:$0xff]  }
 0x538   :  { %v2335_v13 = vpop.f32.mrb[150].mxu1  ;;  %2416 = vmatmul.mubr.bf16.gmra.mrb[124].mxu0 %v5840_v45  ;;  %2536 = vmatmul.mubr.bf16.gmra.mrb[164].mxu1 %v5841_v37  ;;  %v5846_v45 = vld [vmem:[#allocation5 + $0x4c] ss:$12 sps:$4 sm:$0xff]   ;;  %v5847_v37 = vld [vmem:[#allocation5 + $0x1b4] ss:$12 sps:$4 sm:$0xff]  }
 0x539   :  { %v2336_v62 = vadd.f32 %v7106_v1, %v2335_v13  ;;  %v2337_v60 = vpop.f32.mrb[151].mxu1  ;;  %2423 = vmatprep.mubr.bf16.mxu0 %v5842_v10  ;;  %2543 = vmatprep.mubr.bf16.mxu1 %v5843_v50  ;;  %v5848_v50 = vld [vmem:[#allocation5 + $0x48] ss:$12 sps:$4 sm:$0xff]  }
 0x53a   :  { %2961 = vmatpush1.bf16.msra.mxu0 %v5790_v36 }
 0x53b   :  { %v7247_v23 = vpack.c.bf16 %v2336_v62, %v2333_v7  ;;  %2962 = vmatprep.subr.bf16.mxu0 %v8447_v63 }
 0x53d   :  { %8457 = vst [vmem:[#allocation72_spill] sm:$0xff] %v7247_v23  ;;  %5351 = vmatprep.subr.bf16.mxu1 %v7247_v23 }
 0x53e   :  { %v2340_v61 = vpop.f32.mrb[152].mxu1  ;;  %5352 = vmatpush3.bf16.msra.mxu1 %v7247_v23 }
 0x53f   :  { %v2342_v17 = vpop.f32.mrb[153].mxu1  ;;  %v2341_v4 = vadd.f32 %v7106_v1, %v2340_v61 }
 0x540   :  { %v2343_v34 = vpop.f32.mrb[154].mxu1  ;;  %2424 = vmatmul.mubr.bf16.gmra.mrb[128].mxu0 %v5844_v20  ;;  %2544 = vmatmul.mubr.bf16.gmra.mrb[168].mxu1 %v5845_v15  ;;  %v5849_v17 = vld [vmem:[#allocation5 + $0x1b0] ss:$12 sps:$4 sm:$0xff]  }
 0x541   :  { %v2344_v13 = vadd.f32 %v7106_v1, %v2343_v34  ;;  %v2345_v36 = vpop.f32.mrb[155].mxu1  ;;  %2431 = vmatprep.mubr.bf16.mxu0 %v5846_v45  ;;  %2551 = vmatprep.mubr.bf16.mxu1 %v5847_v37  ;;  %v5850_v15 = vld [vmem:[#allocation5 + $0x64] ss:$12 sps:$4 sm:$0xff]   ;;  %v5853_v45 = vld [vmem:[#allocation5 + $0x1c8] ss:$12 sps:$4 sm:$0xff]  }
 0x542   :  { %v5852_v36 = vld [vmem:[#allocation5 + $0x60] ss:$12 sps:$4 sm:$0xff]   ;;  %v5854_v37 = vld [vmem:[#allocation5 + $0x7c] ss:$12 sps:$4 sm:$0xff]  }
 0x543   :  { %v7254_v7 = vpack.c.bf16 %v2344_v13, %v2341_v4  ;;  %v5851_v4 = vld [vmem:[#allocation5 + $0x1cc] ss:$12 sps:$4 sm:$0xff]  }
 0x545   :  { %8458 = vst [vmem:[#allocation73_spill] sm:$0xff] %v7254_v7  ;;  %5353 = vmatprep.subr.bf16.mxu1 %v7254_v7 }
 0x546   :  { %v2348_v62 = vpop.f32.mrb[156].mxu1  ;;  %5354 = vmatpush3.bf16.msra.mxu1 %v7254_v7 }
 0x547   :  { %v2350_v60 = vpop.f32.mrb[157].mxu1  ;;  %v2349_v61 = vadd.f32 %v7106_v1, %v2348_v62  ;;  %v5856_v62 = vld [vmem:[#allocation5 + $0x78] ss:$12 sps:$4 sm:$0xff]  }
 0x548   :  { %v2351_v10 = vpop.f32.mrb[158].mxu1  ;;  %2432 = vmatmul.mubr.bf16.gmra.mrb[132].mxu0 %v5848_v50  ;;  %2552 = vmatmul.mubr.bf16.gmra.mrb[172].mxu1 %v5849_v17  ;;  %v5857_v60 = vld [vmem:[#allocation5 + $0x20] ss:$12 sps:$4 sm:$0xff]   ;;  %v5859_v50 = vld [vmem:[#allocation5 + $0x38] ss:$12 sps:$4 sm:$0xff]  }
 0x549   :  { %v2352_v34 = vadd.f32 %v7106_v1, %v2351_v10  ;;  %v2353_v20 = vpop.f32.mrb[159].mxu1  ;;  %2439 = vmatprep.mubr.bf16.mxu0 %v5850_v15  ;;  %2559 = vmatprep.mubr.bf16.mxu1 %v5851_v4  ;;  %v7265_v1 = vld [vmem:[#allocation5 + $0x8] ss:$12 sps:$4 sm:$0xff]   ;;  %v5860_v17 = vld [vmem:[#allocation5 + $0x90] ss:$12 sps:$4 sm:$0xff]  }
 0x54a   :  { %8460 = vst [vmem:[#allocation75_spill] sm:$0xff] %v7265_v1  ;;  %v5858_v10 = vld [vmem:[#allocation5 + $0x94] ss:$12 sps:$4 sm:$0xff]  }
 0x54b   :  { %v7260_v13 = vpack.c.bf16 %v2352_v34, %v2349_v61  ;;  %v5861_v61 = vld [vmem:[#allocation5 + $0x50] ss:$12 sps:$4 sm:$0xff]   ;;  %v5862_v34 = vld [vmem:[#allocation5 + $0xac] ss:$12 sps:$4 sm:$0xff]   ;;  %v5863_v20 = vld [vmem:[#allocation5 + $0x68] ss:$12 sps:$4 sm:$0xff]  }
 0x54c   :  { %v5864_v15 = vld [vmem:[#allocation5 + $0xa8] ss:$12 sps:$4 sm:$0xff]   ;;  %v5865_v4 = vld [vmem:[#allocation5 + $0x80] ss:$12 sps:$4 sm:$0xff]  }
 0x54d   :  { %8459 = vst [vmem:[#allocation74_spill] sm:$0xff] %v7260_v13  ;;  %5355 = vmatprep.subr.bf16.mxu1 %v7260_v13 }
 0x54e   :  { %5356 = vmatpush3.bf16.msra.mxu1 %v7260_v13 }
 0x54f   :  { %3169 = vmatprep.subr.bf16.mxu1 %v8447_v63 }
 0x550   :  { %2440 = vmatmul.mubr.bf16.gmra.mrb[136].mxu0 %v5852_v36  ;;  %2560 = vmatmul.mubr.bf16.gmra.mrb[176].mxu1 %v5853_v45  ;;  %v5866_v36 = vld [vmem:[#allocation5 + $0xc4] ss:$12 sps:$4 sm:$0xff]  }
 0x551   :  { %2447 = vmatprep.mubr.bf16.mxu0 %v5854_v37  ;;  %5357 = vmatprep.mubr.msk.bf16.mxu1 %vm1320_vm0, %v7265_v1  ;;  %v5867_v45 = vld [vmem:[#allocation5 + $0x98] ss:$12 sps:$4 sm:$0xff]   ;;  %v5868_v37 = vld [vmem:[#allocation5 + $0xc0] ss:$12 sps:$4 sm:$0xff]  }
 0x558   :  { %2448 = vmatmul.mubr.bf16.gmra.mrb[140].mxu0 %v5856_v62  ;;  %5358 = vmatmul.mubr.msk.bf16.vlgmr.msra.gmra.mrb[180].mxu1 %vm1320_vm0, %v5857_v60  ;;  %v5869_v62 = vld [vmem:[#allocation5 + $0xb0] ss:$12 sps:$4 sm:$0xff]  }
 0x559   :  { %2455 = vmatprep.mubr.bf16.mxu0 %v5858_v10  ;;  %5361 = vmatprep.mubr.msk.bf16.mxu1 %vm1320_vm0, %v5859_v50  ;;  %v5870_v60 = vld [vmem:[#allocation5 + $0xdc] ss:$12 sps:$4 sm:$0xff]   ;;  %v5872_v50 = vld [vmem:[#allocation5 + $0xd8] ss:$12 sps:$4 sm:$0xff]  }
 0x55a   :  { %v5871_v10 = vld [vmem:[#allocation5 + $0xc8] ss:$12 sps:$4 sm:$0xff]  }
 0x560   :  { %2456 = vmatmul.mubr.bf16.gmra.mrb[144].mxu0 %v5860_v17  ;;  %5362 = vmatmul.mubr.msk.bf16.gmra.mrb[184].mxu1 %vm1320_vm0, %v5861_v61  ;;  %v5873_v17 = vld [vmem:[#allocation5 + $0xe0] ss:$12 sps:$4 sm:$0xff]  }
 0x561   :  { %2463 = vmatprep.mubr.bf16.mxu0 %v5862_v34  ;;  %5365 = vmatprep.mubr.msk.bf16.mxu1 %vm1320_vm0, %v5863_v20  ;;  %v5874_v61 = vld [vmem:[#allocation5 + $0xf4] ss:$12 sps:$4 sm:$0xff]   ;;  %v5875_v34 = vld [vmem:[#allocation5 + $0xf8] ss:$12 sps:$4 sm:$0xff]   ;;  %v5876_v20 = vld [vmem:[#allocation5 + $0xf0] ss:$12 sps:$4 sm:$0xff]  }
 0x568   :  { %2464 = vmatmul.mubr.bf16.gmra.mrb[148].mxu0 %v5864_v15  ;;  %5366 = vmatmul.mubr.msk.bf16.gmra.mrb[188].mxu1 %vm1320_vm0, %v5865_v4  ;;  %v5877_v15 = vld [vmem:[#allocation5 + $0x110] ss:$12 sps:$4 sm:$0xff]   ;;  %v5878_v4 = vld [vmem:[#allocation5 + $0x10c] ss:$12 sps:$4 sm:$0xff]  }
 0x569   :  { %2471 = vmatprep.mubr.bf16.mxu0 %v5866_v36  ;;  %5369 = vmatprep.mubr.msk.bf16.mxu1 %vm1320_vm0, %v5867_v45  ;;  %v5879_v36 = vld [vmem:[#allocation5 + $0x128] ss:$12 sps:$4 sm:$0xff]   ;;  %v5791_v45 = vld [vmem:[#allocation14 + $0x18] sm:$0xff]  }
 0x56a   :  { %2963 = vmatpush1.bf16.msra.mxu0 %v5791_v45  ;;  %v5796_v45 = vld [vmem:[#allocation14 + $0x40] sm:$0xff]  }
 0x56b   :  { %2964 = vmatprep.subr.bf16.mxu0 %v8447_v63 }
 0x570   :  { %2472 = vmatmul.mubr.bf16.gmra.mrb[152].mxu0 %v5868_v37  ;;  %5370 = vmatmul.mubr.msk.bf16.gmra.mrb[192].mxu1 %vm1320_vm0, %v5869_v62  ;;  %v5792_v37 = vld [vmem:[#allocation14 + $0x20] sm:$0xff]  }
 0x571   :  { %2479 = vmatprep.mubr.bf16.mxu0 %v5870_v60  ;;  %5373 = vmatprep.mubr.msk.bf16.mxu1 %vm1320_vm0, %v5871_v10  ;;  %v5880_v62 = vld [vmem:[#allocation5 + $0x108] ss:$12 sps:$4 sm:$0xff]   ;;  %v5881_v60 = vld [vmem:[#allocation5 + $0x140] ss:$12 sps:$4 sm:$0xff]   ;;  %v5882_v10 = vld [vmem:[#allocation5 + $0x124] ss:$12 sps:$4 sm:$0xff]  }
 0x572   :  { %2965 = vmatpush1.bf16.msra.mxu0 %v5792_v37  ;;  %v5888_v37 = vld [vmem:[#allocation5 + $0x138] ss:$12 sps:$4 sm:$0xff]  }
 0x573   :  { %2966 = vmatprep.subr.bf16.mxu0 %v8447_v63 }
 0x578   :  { %2480 = vmatmul.mubr.bf16.gmra.mrb[156].mxu0 %v5872_v50  ;;  %5374 = vmatmul.mubr.msk.bf16.gmra.mrb[196].mxu1 %vm1320_vm0, %v5873_v17  ;;  %v5883_v50 = vld [vmem:[#allocation5 + $0x158] ss:$12 sps:$4 sm:$0xff]   ;;  %v5793_v17 = vld [vmem:[#allocation14 + $0x28] sm:$0xff]  }
 0x579   :  { %2487 = vmatprep.mubr.bf16.mxu0 %v5874_v61  ;;  %5377 = vmatprep.mubr.msk.bf16.mxu1 %vm1320_vm0, %v5875_v34  ;;  %v5794_v61 = vld [vmem:[#allocation14 + $0x30] sm:$0xff]   ;;  %v5884_v34 = vld [vmem:[#allocation5 + $0x120] ss:$12 sps:$4 sm:$0xff]  }
 0x57a   :  { %2967 = vmatpush1.bf16.msra.mxu0 %v5793_v17  ;;  %v5798_v17 = vld [vmem:[#allocation14 + $0x50] sm:$0xff]  }
 0x57b   :  { %2968 = vmatprep.subr.bf16.mxu0 %v8447_v63 }
 0x57e   :  { %2969 = vmatpush1.bf16.msra.mxu0 %v5794_v61  ;;  %v5892_v61 = vld [vmem:[#allocation5 + $0x150] ss:$12 sps:$4 sm:$0xff]  }
 0x57f   :  { %2970 = vmatprep.subr.bf16.mxu0 %v8447_v63 }
 0x580   :  { %2488 = vmatmul.mubr.bf16.gmra.mrb[160].mxu0 %v5876_v20  ;;  %5378 = vmatmul.mubr.msk.bf16.gmra.mrb[200].mxu1 %vm1320_vm0, %v5877_v15  ;;  %v5885_v20 = vld [vmem:[#allocation5 + $0x170] ss:$12 sps:$4 sm:$0xff]  }
 0x581   :  { %2495 = vmatprep.mubr.bf16.mxu0 %v5878_v4  ;;  %5381 = vmatprep.mubr.msk.bf16.mxu1 %vm1320_vm0, %v5879_v36  ;;  %v5886_v15 = vld [vmem:[#allocation5 + $0x13c] ss:$12 sps:$4 sm:$0xff]  }
 0x582   :  { %v5887_v4 = vld [vmem:[#allocation5 + $0x188] ss:$12 sps:$4 sm:$0xff]   ;;  %v5795_v36 = vld [vmem:[#allocation14 + $0x38] sm:$0xff]  }
 0x583   :  { %2971 = vmatpush1.bf16.msra.mxu0 %v5795_v36  ;;  %v5801_v36 = vld [vmem:[#allocation14 + $0x68] sm:$0xff]  }
 0x584   :  { %2972 = vmatprep.subr.bf16.mxu0 %v8447_v63 }
 0x587   :  { %2973 = vmatpush1.bf16.msra.mxu0 %v5796_v45  ;;  %v5802_v45 = vld [vmem:[#allocation14 + $0x70] sm:$0xff]  }
 0x588   :  { %2496 = vmatmul.mubr.bf16.gmra.mrb[164].mxu0 %v5880_v62  ;;  %5382 = vmatmul.mubr.msk.bf16.gmra.mrb[204].mxu1 %vm1320_vm0, %v5881_v60  ;;  %v5889_v62 = vld [vmem:[#allocation5 + $0x1a0] ss:$12 sps:$4 sm:$0xff]  }
 0x589   :  { %2503 = vmatprep.mubr.bf16.mxu0 %v5882_v10  ;;  %5385 = vmatprep.mubr.msk.bf16.mxu1 %vm1320_vm0, %v5883_v50  ;;  %v5890_v60 = vld [vmem:[#allocation5 + $0x154] ss:$12 sps:$4 sm:$0xff]   ;;  %v5891_v10 = vld [vmem:[#allocation5 + $0x1b8] ss:$12 sps:$4 sm:$0xff]   ;;  %v5797_v50 = vld [vmem:[#allocation14 + $0x48] sm:$0xff]  }
 0x58a   :  { %2974 = vmatprep.subr.bf16.mxu0 %v8447_v63 }
 0x58b   :  { %2975 = vmatpush1.bf16.msra.mxu0 %v5797_v50 }
 0x58c   :  { %2976 = vmatprep.subr.bf16.mxu0 %v8447_v63 }
 0x58f   :  { %2977 = vmatpush1.bf16.msra.mxu0 %v5798_v17 }
 0x590   :  { %2504 = vmatmul.mubr.bf16.gmra.mrb[168].mxu0 %v5884_v34  ;;  %5386 = vmatmul.mubr.msk.bf16.gmra.mrb[208].mxu1 %vm1320_vm0, %v5885_v20  ;;  %v5893_v34 = vld [vmem:[#allocation5 + $0x1d0] ss:$12 sps:$4 sm:$0xff]  }
 0x591   :  { %2511 = vmatprep.mubr.bf16.mxu0 %v5886_v15  ;;  %5389 = vmatprep.mubr.msk.bf16.mxu1 %vm1320_vm0, %v5887_v4  ;;  %v5799_v20 = vld [vmem:[#allocation14 + $0x58] sm:$0xff]   ;;  %v5894_v15 = vld [vmem:[#allocation5 + $0x4] ss:$12 sps:$4 sm:$0xff]  }
 0x592   :  { %2978 = vmatprep.subr.bf16.mxu0 %v8447_v63  ;;  %v5800_v4 = vld [vmem:[#allocation14 + $0x60] sm:$0xff]  }
 0x593   :  { %2979 = vmatpush1.bf16.msra.mxu0 %v5799_v20 }
 0x594   :  { %2980 = vmatprep.subr.bf16.mxu0 %v8447_v63 }
 0x597   :  { %2981 = vmatpush1.bf16.msra.mxu0 %v5800_v4 }
 0x598   :  { %2512 = vmatmul.mubr.bf16.gmra.mrb[172].mxu0 %v5888_v37  ;;  %5390 = vmatmul.mubr.msk.bf16.gmra.mrb[212].mxu1 %vm1320_vm0, %v5889_v62  ;;  %v5803_v37 = vld [vmem:[#allocation14 + $0x78] sm:$0xff]  }
 0x599   :  { %2519 = vmatprep.mubr.bf16.mxu0 %v5890_v60  ;;  %5393 = vmatprep.mubr.msk.bf16.mxu1 %vm1320_vm0, %v5891_v10 }
 0x59a   :  { %2982 = vmatprep.subr.bf16.mxu0 %v8447_v63 }
 0x59b   :  { %2983 = vmatpush1.bf16.msra.mxu0 %v5801_v36 }
 0x59c   :  { %2984 = vmatprep.subr.bf16.mxu0 %v8447_v63 }
 0x59f   :  { %2985 = vmatpush1.bf16.msra.mxu0 %v5802_v45 }
 0x5a0   :  { %2520 = vmatmul.mubr.bf16.gmra.mrb[176].mxu0 %v5892_v61  ;;  %5394 = vmatmul.mubr.msk.bf16.gmra.mrb[216].mxu1 %vm1320_vm0, %v5893_v34 }
 0x5a1   :  { %3201 = vmatprep.mubr.bf16.mxu1 %v5894_v15  ;;  %2986 = vmatprep.subr.bf16.mxu0 %v8447_v63 }
 0x5a3   :  { %2987 = vmatpush1.bf16.msra.mxu0 %v5803_v37 }
 0x603   :  { %v7300_v62 = vpop.f32.mrb[160].mxu1  ;;  %v2409_v60 = vpop.f32.mrb[120].mxu0 }
 0x604   :  { %v2531_v10 = vpop.f32.mrb[161].mxu1  ;;  %v2411_v50 = vpop.f32.mrb[121].mxu0 }
 0x605   :  { %v7302_v17 = vpop.f32.mrb[162].mxu1  ;;  %v2412_v61 = vpop.f32.mrb[122].mxu0 }
 0x606   :  { %v2534_v34 = vpop.f32.mrb[163].mxu1  ;;  %v2414_v20 = vpop.f32.mrb[123].mxu0 }
 0x60b   :  { %v7304_v15 = vpop.f32.mrb[164].mxu1  ;;  %v2417_v4 = vpop.f32.mrb[124].mxu0 }
 0x60c   :  { %v2539_v36 = vpop.f32.mrb[165].mxu1  ;;  %v2419_v1 = vpop.f32.mrb[125].mxu0 }
 0x60d   :  { %v7306_v45 = vpop.f32.mrb[166].mxu1  ;;  %v2420_v63 = vpop.f32.mrb[126].mxu0 }
 0x60e   :  { %v2542_v13 = vpop.f32.mrb[167].mxu1  ;;  %v2422_v37 = vpop.f32.mrb[127].mxu0 }
 0x613   :  { %v7308_v7 = vpop.f32.mrb[168].mxu1  ;;  %v2425_v23 = vpop.f32.mrb[128].mxu0 }
 0x614   :  { %v2547_v10 = vpop.f32.mrb[169].mxu1  ;;  %v2427_v50 = vpop.f32.mrb[129].mxu0 }
 0x615   :  { %v7310_v33 = vpop.f32.mrb[170].mxu1  ;;  %v2428_v27 = vpop.f32.mrb[130].mxu0 }
 0x616   :  { %v2550_v34 = vpop.f32.mrb[171].mxu1  ;;  %v2430_v20 = vpop.f32.mrb[131].mxu0 }
 0x61b   :  { %v7312_v48 = vpop.f32.mrb[172].mxu1  ;;  %v2433_v56 = vpop.f32.mrb[132].mxu0 }
 0x61c   :  { %8461 = vst [vmem:[#allocation76_spill] sm:$0xff] %v7312_v48  ;;  %v2555_v36 = vpop.f32.mrb[173].mxu1  ;;  %v2435_v1 = vpop.f32.mrb[133].mxu0 }
 0x61d   :  { %v7314_v53 = vpop.f32.mrb[174].mxu1  ;;  %v2436_v0 = vpop.f32.mrb[134].mxu0 }
 0x61e   :  { %8462 = vst [vmem:[#allocation77_spill] sm:$0xff] %v7314_v53  ;;  %v2558_v13 = vpop.f32.mrb[175].mxu1  ;;  %v2438_v37 = vpop.f32.mrb[135].mxu0 }
 0x623   :  { %v7316_v39 = vpop.f32.mrb[176].mxu1  ;;  %v2441_v38 = vpop.f32.mrb[136].mxu0 }
 0x624   :  { %8463 = vst [vmem:[#allocation78_spill] sm:$0xff] %v7316_v39  ;;  %v2563_v10 = vpop.f32.mrb[177].mxu1  ;;  %v2443_v50 = vpop.f32.mrb[137].mxu0 }
 0x625   :  { %v7318_v21 = vpop.f32.mrb[178].mxu1  ;;  %v2444_v31 = vpop.f32.mrb[138].mxu0 }
 0x626   :  { %8464 = vst [vmem:[#allocation79_spill] sm:$0xff] %v7318_v21  ;;  %v2566_v34 = vpop.f32.mrb[179].mxu1  ;;  %v2446_v20 = vpop.f32.mrb[139].mxu0 }
 0x62b   :  { %v5359_v26 = vpop.f32.mrb[180].mxu1  ;;  %v2449_v28 = vpop.f32.mrb[140].mxu0 }
 0x62c   :  { %v2611_v44 = vadd.f32 %v5359_v26, %v2417_v4  ;;  %v2602_v36 = vpop.f32.mrb[181].mxu1  ;;  %v2451_v1 = vpop.f32.mrb[141].mxu0 }
 0x62d   :  { %v2603_v12 = vadd.f32 %v2602_v36, %v2409_v60  ;;  %v5360_v53 = vpop.f32.mrb[182].mxu1  ;;  %v2452_v22 = vpop.f32.mrb[142].mxu0 }
 0x62e   :  { %v2614_v13 = vadd.f32 %v5360_v53, %v2420_v63  ;;  %v2605_v37 = vpop.f32.mrb[183].mxu1  ;;  %v2454_v48 = vpop.f32.mrb[143].mxu0  ;;  %v2763_v10 = vmul.f32 %v2611_v44, %v6921_v5 }
 0x62f   :  { %v2606_v39 = vadd.f32 %v2605_v37, %v2412_v61  ;;  %v2761_v21 = vmul.f32 %v2603_v12, %v6917_v55 }
 0x630   :  { %v2764_v50 = vmul.f32 %v2614_v13, %v6925_v11 }
 0x631   :  { %v2762_v34 = vmul.f32 %v2606_v39, %v6919_v3 }
 0x632   :  { %v2802_v20 = vpack.c.bf16 %v2764_v50, %v2763_v10 }
 0x633   :  { %v5363_v54 = vpop.f32.mrb[184].mxu1  ;;  %v2801_v26 = vpack.c.bf16 %v2762_v34, %v2761_v21  ;;  %v2457_v4 = vpop.f32.mrb[144].mxu0 }
 0x634   :  { %v2627_v1 = vadd.f32 %v5363_v54, %v2433_v56  ;;  %v2618_v60 = vpop.f32.mrb[185].mxu1  ;;  %v2459_v36 = vpop.f32.mrb[145].mxu0 }
 0x635   :  { %v2619_v59 = vadd.f32 %v2618_v60, %v2425_v23  ;;  %v5364_v63 = vpop.f32.mrb[186].mxu1  ;;  %2988 = vmatprep.mubr.bf16.mxu0 %v2801_v26  ;;  %v2460_v53 = vpop.f32.mrb[146].mxu0 }
 0x636   :  { %v2630_v48 = vadd.f32 %v5364_v63, %v2436_v0  ;;  %v2621_v61 = vpop.f32.mrb[187].mxu1  ;;  %2989 = vmatmul.mubr.bf16.vlgmr.msra.gmra.mrb[180].mxu0 %v7110_v41  ;;  %v2462_v44 = vpop.f32.mrb[147].mxu0  ;;  %v2767_v12 = vmul.f32 %v2627_v1, %v6927_v14 }
 0x637   :  { %v2622_v13 = vadd.f32 %v2621_v61, %v2428_v27  ;;  %2996 = vmatprep.mubr.bf16.mxu0 %v2802_v20  ;;  %v2765_v21 = vmul.f32 %v2619_v59, %v6923_v9 }
 0x638   :  { %v2768_v39 = vmul.f32 %v2630_v48, %v6933_v57 }
 0x639   :  { %v2766_v54 = vmul.f32 %v2622_v13, %v6929_v19 }
 0x63a   :  { %v2804_v56 = vpack.c.bf16 %v2768_v39, %v2767_v12 }
 0x63b   :  { %v5367_v23 = vpop.f32.mrb[188].mxu1  ;;  %v2803_v37 = vpack.c.bf16 %v2766_v54, %v2765_v21  ;;  %v2465_v10 = vpop.f32.mrb[148].mxu0 }
 0x63c   :  { %v2643_v50 = vadd.f32 %v5367_v23, %v2449_v28  ;;  %v2634_v0 = vpop.f32.mrb[189].mxu1  ;;  %v2467_v34 = vpop.f32.mrb[149].mxu0 }
 0x63d   :  { %v2635_v26 = vadd.f32 %v2634_v0, %v2441_v38  ;;  %v5368_v41 = vpop.f32.mrb[190].mxu1  ;;  %v2468_v60 = vpop.f32.mrb[150].mxu0 }
 0x63e   :  { %v2646_v27 = vadd.f32 %v5368_v41, %v2452_v22  ;;  %v2637_v20 = vpop.f32.mrb[191].mxu1  ;;  %2997 = vmatmul.mubr.bf16.gmra.mrb[184].mxu0 %v7118_v51  ;;  %v2470_v1 = vpop.f32.mrb[151].mxu0  ;;  %v2771_v59 = vmul.f32 %v2643_v50, %v6937_v49 }
 0x63f   :  { %v2638_v36 = vadd.f32 %v2637_v20, %v2444_v31  ;;  %3004 = vmatprep.mubr.bf16.mxu0 %v2803_v37  ;;  %v2769_v48 = vmul.f32 %v2635_v26, %v6931_v24  ;;  %v8465_v26 = vld [vmem:[#allocation40_spill] sm:$0xff] }
 0x640   :  { %v2772_v63 = vmul.f32 %v2646_v27, %v6950_v6 }
 0x641   :  { %v2770_v28 = vmul.f32 %v2638_v36, %v6941_v58 }
 0x642   :  { %v2806_v61 = vpack.c.bf16 %v2772_v63, %v2771_v59 }
 0x643   :  { %v5371_v44 = vpop.f32.mrb[192].mxu1  ;;  %v2473_v38 = vpop.f32.mrb[152].mxu0  ;;  %v2805_v13 = vpack.c.bf16 %v2770_v28, %v2769_v48 }
 0x644   :  { %v2659_v12 = vadd.f32 %v5371_v44, %v2465_v10  ;;  %v2650_v22 = vpop.f32.mrb[193].mxu1  ;;  %v2475_v39 = vpop.f32.mrb[153].mxu0 }
 0x645   :  { %v2651_v21 = vadd.f32 %v2650_v22, %v2457_v4  ;;  %v5372_v51 = vpop.f32.mrb[194].mxu1  ;;  %v2476_v54 = vpop.f32.mrb[154].mxu0  ;;  %v8467_v39 = vld [vmem:[#allocation44_spill] sm:$0xff] }
 0x646   :  { %v2662_v31 = vadd.f32 %v5372_v51, %v2468_v60  ;;  %v2653_v23 = vpop.f32.mrb[195].mxu1  ;;  %3005 = vmatmul.mubr.bf16.gmra.mrb[188].mxu0 %v7126_v32  ;;  %v2478_v37 = vpop.f32.mrb[155].mxu0  ;;  %v7336_v0 = vmul.f32 %v2659_v12, %v6959_v29  ;;  %v8466_v12 = vld [vmem:[#allocation43_spill] sm:$0xff]  ;;  %v8468_v51 = vld [vmem:[#allocation41_spill] sm:$0xff] }
 0x647   :  { %v2654_v50 = vadd.f32 %v2653_v23, %v2460_v53  ;;  %3012 = vmatprep.mubr.bf16.mxu0 %v2804_v56  ;;  %v2773_v10 = vmul.f32 %v2651_v21, %v6946_v40  ;;  %v8469_v23 = vld [vmem:[#allocation42_spill] sm:$0xff] }
 0x648   :  { %v7339_v34 = vmul.f32 %v2662_v31, %v6962_v8 }
 0x649   :  { %v2774_v41 = vmul.f32 %v2654_v50, %v8465_v26 }
 0x64b   :  { %v2481_v60 = vpop.f32.mrb[156].mxu0  ;;  %v5375_v27 = vpop.f32.mrb[196].mxu1  ;;  %v2807_v20 = vpack.c.bf16 %v2774_v41, %v2773_v10 }
 0x64c   :  { %v2675_v32 = vadd.f32 %v5375_v27, %v2481_v60  ;;  %v2483_v1 = vpop.f32.mrb[157].mxu0  ;;  %v2666_v53 = vpop.f32.mrb[197].mxu1 }
 0x64d   :  { %v2667_v56 = vadd.f32 %v2666_v53, %v2473_v38  ;;  %v2484_v36 = vpop.f32.mrb[158].mxu0  ;;  %v5376_v59 = vpop.f32.mrb[198].mxu1 }
 0x64e   :  { %v2678_v63 = vadd.f32 %v5376_v59, %v2484_v36  ;;  %v2669_v48 = vpop.f32.mrb[199].mxu1  ;;  %3013 = vmatmul.mubr.bf16.gmra.mrb[192].mxu0 %v7134_v35  ;;  %v2486_v28 = vpop.f32.mrb[159].mxu0  ;;  %v7347_v22 = vmul.f32 %v2675_v32, %v8466_v12  ;;  %v8471_v59 = vld [vmem:[#allocation46_spill] sm:$0xff] }
 0x64f   :  { %v2670_v44 = vadd.f32 %v2669_v48, %v2476_v54  ;;  %3020 = vmatprep.mubr.bf16.mxu0 %v2805_v13  ;;  %v7353_v31 = vmul.f32 %v2667_v56, %v8468_v51  ;;  %v8470_v56 = vld [vmem:[#allocation45_spill] sm:$0xff] }
 0x650   :  { %v7350_v21 = vmul.f32 %v2678_v63, %v8467_v39 }
 0x651   :  { %v7356_v38 = vmul.f32 %v2670_v44, %v8469_v23  ;;  %v8475_v44 = vld [vmem:[#allocation49_spill] sm:$0xff] }
 0x653   :  { %v5379_v50 = vpop.f32.mrb[200].mxu1  ;;  %v2489_v35 = vpop.f32.mrb[160].mxu0 }
 0x654   :  { %v2682_v54 = vpop.f32.mrb[201].mxu1  ;;  %v2491_v10 = vpop.f32.mrb[161].mxu0 }
 0x655   :  { %v2683_v41 = vadd.f32 %v2682_v54, %v2489_v35  ;;  %v5380_v60 = vpop.f32.mrb[202].mxu1  ;;  %v2492_v27 = vpop.f32.mrb[162].mxu0 }
 0x656   :  { %v2685_v32 = vpop.f32.mrb[203].mxu1  ;;  %3021 = vmatmul.mubr.bf16.gmra.mrb[196].mxu0 %v7142_v18  ;;  %v2494_v1 = vpop.f32.mrb[163].mxu0 }
 0x657   :  { %v2686_v53 = vadd.f32 %v2685_v32, %v2492_v27  ;;  %3028 = vmatprep.mubr.bf16.mxu0 %v2806_v61  ;;  %v7364_v36 = vmul.f32 %v2683_v41, %v8470_v56  ;;  %v8472_v41 = vld [vmem:[#allocation47_spill] sm:$0xff]  ;;  %v8473_v1 = vld [vmem:[#allocation48_spill] sm:$0xff] }
 0x659   :  { %v7367_v63 = vmul.f32 %v2686_v53, %v8471_v59 }
 0x65b   :  { %v2497_v48 = vpop.f32.mrb[164].mxu0  ;;  %v5383_v28 = vpop.f32.mrb[204].mxu1 }
 0x65c   :  { %v2691_v35 = vadd.f32 %v5379_v50, %v2497_v48  ;;  %v2499_v54 = vpop.f32.mrb[165].mxu0  ;;  %v2698_v10 = vpop.f32.mrb[205].mxu1 }
 0x65d   :  { %v2500_v37 = vpop.f32.mrb[166].mxu0  ;;  %v5384_v13 = vpop.f32.mrb[206].mxu1 }
 0x65e   :  { %v2694_v18 = vadd.f32 %v5380_v60, %v2500_v37  ;;  %3029 = vmatmul.mubr.bf16.gmra.mrb[200].mxu0 %v7150_v46  ;;  %v2502_v61 = vpop.f32.mrb[167].mxu0  ;;  %v2701_v27 = vpop.f32.mrb[207].mxu1  ;;  %v7373_v32 = vmul.f32 %v2691_v35, %v8472_v41 }
 0x65f   :  { %3036 = vmatprep.mubr.bf16.mxu0 %v2807_v20 }
 0x660   :  { %v7376_v53 = vmul.f32 %v2694_v18, %v8473_v1  ;;  %v8474_v1 = vpack.c.bf16 %v7339_v34, %v7336_v0 }
 0x663   :  { %v2505_v50 = vpop.f32.mrb[168].mxu0  ;;  %v5387_v48 = vpop.f32.mrb[208].mxu1 }
 0x664   :  { %v2699_v54 = vadd.f32 %v2698_v10, %v2505_v50  ;;  %v2723_v4 = vadd.f32 %v5387_v48, %v7300_v62  ;;  %v2507_v37 = vpop.f32.mrb[169].mxu0  ;;  %v2714_v60 = vpop.f32.mrb[209].mxu1  ;;  %v8476_v62 = vld [vmem:[#allocation50_spill] sm:$0xff] }
 0x665   :  { %v2508_v46 = vpop.f32.mrb[170].mxu0  ;;  %v5388_v61 = vpop.f32.mrb[210].mxu1 }
 0x666   :  { %v2702_v59 = vadd.f32 %v2701_v27, %v2508_v46  ;;  %v2726_v20 = vadd.f32 %v5388_v61, %v7302_v17  ;;  %3037 = vmatmul.mubr.bf16.gmra.mrb[204].mxu0 %v7158_v30  ;;  %v2510_v35 = vpop.f32.mrb[171].mxu0  ;;  %v2717_v18 = vpop.f32.mrb[211].mxu1  ;;  %v2785_v41 = vmul.f32 %v2699_v54, %v8475_v44  ;;  %v7388_v10 = vmul.f32 %v2723_v4, %v7060_v52 }
 0x667   :  { %3044 = vmatprep.mubr.bf16.mxu0 %v8474_v1 }
 0x668   :  { %v2786_v50 = vmul.f32 %v2702_v59, %v8476_v62  ;;  %v7392_v48 = vmul.f32 %v2726_v20, %v7062_v16 }
 0x66a   :  { %v2813_v27 = vpack.c.bf16 %v2786_v50, %v2785_v41  ;;  %v2816_v30 = vpack.c.bf16 %v7392_v48, %v7388_v10  ;;  %v8478_v48 = vld [vmem:[#allocation55_spill] sm:$0xff] }
 0x66b   :  { %v2513_v17 = vpop.f32.mrb[172].mxu0  ;;  %v5391_v37 = vpop.f32.mrb[212].mxu1 }
 0x66c   :  { %v2707_v46 = vadd.f32 %v5383_v28, %v2513_v17  ;;  %v2739_v0 = vadd.f32 %v5391_v37, %v7308_v7  ;;  %v2515_v34 = vpop.f32.mrb[173].mxu0  ;;  %v2730_v1 = vpop.f32.mrb[213].mxu1  ;;  %v8477_v28 = vpack.c.bf16 %v7356_v38, %v7353_v31  ;;  %v8479_v17 = vld [vmem:[#allocation56_spill] sm:$0xff]  ;;  %v8480_v31 = vld [vmem:[#allocation78_spill] sm:$0xff] }
 0x66d   :  { %v2731_v54 = vadd.f32 %v2730_v1, %v7304_v15  ;;  %v2516_v4 = vpop.f32.mrb[174].mxu0  ;;  %v5392_v61 = vpop.f32.mrb[214].mxu1 }
 0x66e   :  { %v2710_v35 = vadd.f32 %v5384_v13, %v2516_v4  ;;  %v2742_v59 = vadd.f32 %v5392_v61, %v7310_v33  ;;  %v2733_v20 = vpop.f32.mrb[215].mxu1  ;;  %3045 = vmatmul.mubr.bf16.gmra.mrb[208].mxu0 %v7166_v47  ;;  %v2518_v41 = vpop.f32.mrb[175].mxu0  ;;  %v2787_v7 = vmul.f32 %v2707_v46, %v7034_v43  ;;  %v2795_v50 = vmul.f32 %v2739_v0, %v7076_v2 }
 0x66f   :  { %v2734_v10 = vadd.f32 %v2733_v20, %v7306_v45  ;;  %3052 = vmatprep.mubr.bf16.mxu0 %v8477_v28  ;;  %v2793_v33 = vmul.f32 %v2731_v54, %v8478_v48  ;;  %v8481_v41 = vld [vmem:[#allocation76_spill] sm:$0xff]  ;;  %v8483_v48 = vld [vmem:[#allocation63_spill] sm:$0xff] }
 0x670   :  { %v2788_v15 = vmul.f32 %v2710_v35, %v7042_v25  ;;  %v2796_v13 = vmul.f32 %v2742_v59, %v7078_v42  ;;  %v8482_v59 = vld [vmem:[#allocation79_spill] sm:$0xff] }
 0x671   :  { %v2794_v37 = vmul.f32 %v2734_v10, %v8479_v17 }
 0x672   :  { %v2814_v47 = vpack.c.bf16 %v2788_v15, %v2787_v7  ;;  %v2818_v34 = vpack.c.bf16 %v2796_v13, %v2795_v50  ;;  %v8484_v7 = vld [vmem:[#allocation77_spill] sm:$0xff]  ;;  %v8486_v15 = vld [vmem:[#allocation51_spill] sm:$0xff] }
 0x673   :  { %v2521_v1 = vpop.f32.mrb[176].mxu0  ;;  %v5395_v45 = vpop.f32.mrb[216].mxu1  ;;  %v2817_v4 = vpack.c.bf16 %v2794_v37, %v2793_v33  ;;  %v8487_v33 = vld [vmem:[#allocation61_spill] sm:$0xff] }
 0x674   :  { %v2715_v61 = vadd.f32 %v2714_v60, %v2521_v1  ;;  %v2755_v38 = vadd.f32 %v5395_v45, %v8480_v31  ;;  %v2523_v20 = vpop.f32.mrb[177].mxu0  ;;  %v2746_v46 = vpop.f32.mrb[217].mxu1  ;;  %v8485_v60 = vpack.c.bf16 %v7350_v21, %v7347_v22  ;;  %v8488_v1 = vld [vmem:[#allocation52_spill] sm:$0xff]  ;;  %v8489_v31 = vld [vmem:[#allocation62_spill] sm:$0xff]  ;;  %v8493_v22 = vpack.c.bf16 %v7367_v63, %v7364_v36  ;;  %v8494_v21 = vld [vmem:[#allocation65_spill] sm:$0xff] }
 0x675   :  { %v2747_v0 = vadd.f32 %v2746_v46, %v8481_v41  ;;  %v2524_v28 = vpop.f32.mrb[178].mxu0  ;;  %v5396_v35 = vpop.f32.mrb[218].mxu1  ;;  %v8490_v20 = vld [vmem:[#allocation59_spill] sm:$0xff]  ;;  %v8491_v41 = vld [vmem:[#allocation60_spill] sm:$0xff]  ;;  %v8500_v36 = vld [vmem:[#allocation70_spill] sm:$0xff] }
 0x676   :  { %v2718_v2 = vadd.f32 %v2717_v18, %v2524_v28  ;;  %v2758_v42 = vadd.f32 %v5396_v35, %v8482_v59  ;;  %v2749_v54 = vpop.f32.mrb[219].mxu1  ;;  %3053 = vmatmul.mubr.bf16.gmra.mrb[212].mxu0 %v8483_v48  ;;  %v2526_v10 = vpop.f32.mrb[179].mxu0  ;;  %v2789_v13 = vmul.f32 %v2715_v61, %v8486_v15  ;;  %v2799_v37 = vmul.f32 %v2755_v38, %v8487_v33  ;;  %v8497_v61 = vld [vmem:[#allocation67_spill] sm:$0xff]  ;;  %v8498_v38 = vld [vmem:[#allocation68_spill] sm:$0xff] }
 0x677   :  { %v2750_v50 = vadd.f32 %v2749_v54, %v8484_v7  ;;  %3060 = vmatprep.mubr.bf16.mxu0 %v8485_v60  ;;  %v2797_v46 = vmul.f32 %v2747_v0, %v8490_v20  ;;  %v8492_v54 = vld [vmem:[#allocation64_spill] sm:$0xff]  ;;  %v8499_v0 = vld [vmem:[#allocation69_spill] sm:$0xff]  ;;  %v8501_v63 = vld [vmem:[#allocation71_spill] sm:$0xff] }
 0x678   :  { %v2790_v45 = vmul.f32 %v2718_v2, %v8488_v1  ;;  %v2800_v18 = vmul.f32 %v2758_v42, %v8489_v31  ;;  %v8495_v2 = vpack.c.bf16 %v7376_v53, %v7373_v32  ;;  %v8496_v42 = vld [vmem:[#allocation66_spill] sm:$0xff]  ;;  %v8502_v32 = vld [vmem:[#allocation72_spill] sm:$0xff]  ;;  %v8503_v53 = vld [vmem:[#allocation73_spill] sm:$0xff] }
 0x679   :  { %v2798_v28 = vmul.f32 %v2750_v50, %v8491_v41  ;;  %v7443_v10 = vld [vmem:[#allocation16] ss:$0 sm:$0xff] }
 0x67a   :  { %v2815_v48 = vpack.c.bf16 %v2790_v45, %v2789_v13  ;;  %v2820_v35 = vpack.c.bf16 %v2800_v18, %v2799_v37  ;;  %v8506_v45 = vmov 0  }
 0x67b   :  { %v2819_v59 = vpack.c.bf16 %v2798_v28, %v2797_v46 }
 0x67e   :  { %3061 = vmatmul.mubr.bf16.gmra.mrb[216].mxu0 %v8492_v54 }
 0x67f   :  { %3068 = vmatprep.mubr.bf16.mxu0 %v8493_v22 }
 0x686   :  { %3069 = vmatmul.mubr.bf16.gmra.mrb[220].mxu0 %v8494_v21 }
 0x687   :  { %3076 = vmatprep.mubr.bf16.mxu0 %v8495_v2 }
 0x68e   :  { %3077 = vmatmul.mubr.bf16.gmra.mrb[224].mxu0 %v8496_v42 }
 0x68f   :  { %3084 = vmatprep.mubr.bf16.mxu0 %v2813_v27  ;;  %v8504_v27 = vld [vmem:[#allocation74_spill] sm:$0xff] }
 0x696   :  { %3085 = vmatmul.mubr.bf16.gmra.mrb[228].mxu0 %v8497_v61 }
 0x697   :  { %3092 = vmatprep.mubr.bf16.mxu0 %v2814_v47  ;;  %v8505_v47 = vld [vmem:[#allocation75_spill] sm:$0xff] }
 0x69e   :  { %3093 = vmatmul.mubr.bf16.gmra.mrb[232].mxu0 %v8498_v38 }
 0x69f   :  { %3100 = vmatprep.mubr.bf16.mxu0 %v2815_v48 }
 0x6a6   :  { %3101 = vmatmul.mubr.bf16.gmra.mrb[236].mxu0 %v8499_v0 }
 0x6a7   :  { %3108 = vmatprep.mubr.bf16.mxu0 %v2816_v30 }
 0x6ae   :  { %3109 = vmatmul.mubr.bf16.gmra.mrb[240].mxu0 %v8500_v36 }
 0x6af   :  { %3116 = vmatprep.mubr.bf16.mxu0 %v2817_v4 }
 0x6b6   :  { %3117 = vmatmul.mubr.bf16.gmra.mrb[244].mxu0 %v8501_v63 }
 0x6b7   :  { %3124 = vmatprep.mubr.bf16.mxu0 %v2818_v34 }
 0x6be   :  { %3125 = vmatmul.mubr.bf16.gmra.mrb[248].mxu0 %v8502_v32 }
 0x6bf   :  { %3132 = vmatprep.mubr.bf16.mxu0 %v2819_v59 }
 0x6c6   :  { %3133 = vmatmul.mubr.bf16.gmra.mrb[252].mxu0 %v8503_v53 }
 0x6c7   :  { %3140 = vmatprep.mubr.bf16.mxu0 %v2820_v35 }
 0x6ce   :  { %3141 = vmatmul.mubr.bf16.gmra.mrb[0].mxu0 %v8504_v27 }
 0x6cf   :  { %5405 = vmatprep.mubr.msk.bf16.mxu0 %vm1320_vm0, %v8505_v47 }
 0x709   :  { %v2990_v30 = vpop.f32.mrb[180].mxu0 }
 0x70a   :  { %v2992_v7 = vpop.f32.mrb[181].mxu0  ;;  %v2991_v4 = vadd.f32 %v7443_v10, %v2990_v30 }
 0x70b   :  { %v2993_v50 = vpop.f32.mrb[182].mxu0 }
 0x70c   :  { %v2994_v34 = vadd.f32 %v7443_v10, %v2993_v50  ;;  %v2995_v60 = vpop.f32.mrb[183].mxu0 }
 0x70e   :  { %v7447_v13 = vpack.c.bf16 %v2994_v34, %v2991_v4 }
 0x710   :  { %3170 = vmatpush1.bf16.msra.mxu1 %v7447_v13 }
 0x711   :  { %v2998_v37 = vpop.f32.mrb[184].mxu0  ;;  %3171 = vmatprep.subr.bf16.mxu1 %v8506_v45 }
 0x712   :  { %v3000_v18 = vpop.f32.mrb[185].mxu0  ;;  %v2999_v28 = vadd.f32 %v7443_v10, %v2998_v37 }
 0x713   :  { %v3001_v46 = vpop.f32.mrb[186].mxu0 }
 0x714   :  { %v3002_v48 = vadd.f32 %v7443_v10, %v3001_v46  ;;  %v3003_v35 = vpop.f32.mrb[187].mxu0 }
 0x716   :  { %v7453_v59 = vpack.c.bf16 %v3002_v48, %v2999_v28 }
 0x718   :  { %3172 = vmatpush1.bf16.msra.mxu1 %v7453_v59 }
 0x719   :  { %v3006_v54 = vpop.f32.mrb[188].mxu0  ;;  %3173 = vmatprep.subr.bf16.mxu1 %v8506_v45 }
 0x71a   :  { %v3008_v22 = vpop.f32.mrb[189].mxu0  ;;  %v3007_v2 = vadd.f32 %v7443_v10, %v3006_v54 }
 0x71b   :  { %v3009_v21 = vpop.f32.mrb[190].mxu0 }
 0x71c   :  { %v3010_v42 = vadd.f32 %v7443_v10, %v3009_v21  ;;  %v3011_v61 = vpop.f32.mrb[191].mxu0 }
 0x71e   :  { %v7459_v38 = vpack.c.bf16 %v3010_v42, %v3007_v2 }
 0x720   :  { %3174 = vmatpush1.bf16.msra.mxu1 %v7459_v38 }
 0x721   :  { %v3014_v0 = vpop.f32.mrb[192].mxu0  ;;  %3175 = vmatprep.subr.bf16.mxu1 %v8506_v45 }
 0x722   :  { %v3016_v36 = vpop.f32.mrb[193].mxu0  ;;  %v3015_v32 = vadd.f32 %v7443_v10, %v3014_v0 }
 0x723   :  { %v3017_v63 = vpop.f32.mrb[194].mxu0 }
 0x724   :  { %v3018_v53 = vadd.f32 %v7443_v10, %v3017_v63  ;;  %v3019_v27 = vpop.f32.mrb[195].mxu0 }
 0x726   :  { %v7465_v47 = vpack.c.bf16 %v3018_v53, %v3015_v32 }
 0x728   :  { %3176 = vmatpush1.bf16.msra.mxu1 %v7465_v47 }
 0x729   :  { %v3022_v30 = vpop.f32.mrb[196].mxu0  ;;  %3177 = vmatprep.subr.bf16.mxu1 %v8506_v45 }
 0x72a   :  { %v3024_v7 = vpop.f32.mrb[197].mxu0  ;;  %v3023_v4 = vadd.f32 %v7443_v10, %v3022_v30 }
 0x72b   :  { %v3025_v50 = vpop.f32.mrb[198].mxu0 }
 0x72c   :  { %v3026_v34 = vadd.f32 %v7443_v10, %v3025_v50  ;;  %v3027_v60 = vpop.f32.mrb[199].mxu0 }
 0x72e   :  { %v7471_v37 = vpack.c.bf16 %v3026_v34, %v3023_v4 }
 0x730   :  { %3178 = vmatpush1.bf16.msra.mxu1 %v7471_v37 }
 0x731   :  { %v3030_v18 = vpop.f32.mrb[200].mxu0  ;;  %3179 = vmatprep.subr.bf16.mxu1 %v8506_v45 }
 0x732   :  { %v3032_v46 = vpop.f32.mrb[201].mxu0  ;;  %v3031_v48 = vadd.f32 %v7443_v10, %v3030_v18 }
 0x733   :  { %v3033_v28 = vpop.f32.mrb[202].mxu0 }
 0x734   :  { %v3034_v35 = vadd.f32 %v7443_v10, %v3033_v28  ;;  %v3035_v54 = vpop.f32.mrb[203].mxu0 }
 0x736   :  { %v7477_v22 = vpack.c.bf16 %v3034_v35, %v3031_v48 }
 0x738   :  { %3180 = vmatpush1.bf16.msra.mxu1 %v7477_v22 }
 0x739   :  { %v3038_v21 = vpop.f32.mrb[204].mxu0  ;;  %3181 = vmatprep.subr.bf16.mxu1 %v8506_v45 }
 0x73a   :  { %v3040_v2 = vpop.f32.mrb[205].mxu0  ;;  %v3039_v61 = vadd.f32 %v7443_v10, %v3038_v21 }
 0x73b   :  { %v3041_v42 = vpop.f32.mrb[206].mxu0 }
 0x73c   :  { %v3042_v0 = vadd.f32 %v7443_v10, %v3041_v42  ;;  %v3043_v36 = vpop.f32.mrb[207].mxu0 }
 0x73e   :  { %v7483_v63 = vpack.c.bf16 %v3042_v0, %v3039_v61 }
 0x740   :  { %3182 = vmatpush1.bf16.msra.mxu1 %v7483_v63 }
 0x741   :  { %v3046_v32 = vpop.f32.mrb[208].mxu0  ;;  %3183 = vmatprep.subr.bf16.mxu1 %v8506_v45 }
 0x742   :  { %v3048_v53 = vpop.f32.mrb[209].mxu0  ;;  %v3047_v30 = vadd.f32 %v7443_v10, %v3046_v32 }
 0x743   :  { %v3049_v27 = vpop.f32.mrb[210].mxu0 }
 0x744   :  { %v3050_v7 = vadd.f32 %v7443_v10, %v3049_v27  ;;  %v3051_v50 = vpop.f32.mrb[211].mxu0 }
 0x746   :  { %v7489_v4 = vpack.c.bf16 %v3050_v7, %v3047_v30 }
 0x748   :  { %3184 = vmatpush1.bf16.msra.mxu1 %v7489_v4 }
 0x749   :  { %v3054_v34 = vpop.f32.mrb[212].mxu0  ;;  %3185 = vmatprep.subr.bf16.mxu1 %v8506_v45 }
 0x74a   :  { %v3056_v60 = vpop.f32.mrb[213].mxu0  ;;  %v3055_v46 = vadd.f32 %v7443_v10, %v3054_v34 }
 0x74b   :  { %v3057_v18 = vpop.f32.mrb[214].mxu0 }
 0x74c   :  { %v3058_v28 = vadd.f32 %v7443_v10, %v3057_v18  ;;  %v3059_v48 = vpop.f32.mrb[215].mxu0 }
 0x74e   :  { %v7495_v35 = vpack.c.bf16 %v3058_v28, %v3055_v46 }
 0x750   :  { %3186 = vmatpush1.bf16.msra.mxu1 %v7495_v35 }
 0x751   :  { %v3062_v54 = vpop.f32.mrb[216].mxu0  ;;  %3187 = vmatprep.subr.bf16.mxu1 %v8506_v45 }
 0x752   :  { %v3064_v21 = vpop.f32.mrb[217].mxu0  ;;  %v3063_v42 = vadd.f32 %v7443_v10, %v3062_v54 }
 0x753   :  { %v3065_v2 = vpop.f32.mrb[218].mxu0 }
 0x754   :  { %v3066_v61 = vadd.f32 %v7443_v10, %v3065_v2  ;;  %v3067_v0 = vpop.f32.mrb[219].mxu0 }
 0x756   :  { %v7501_v36 = vpack.c.bf16 %v3066_v61, %v3063_v42 }
 0x758   :  { %3188 = vmatpush1.bf16.msra.mxu1 %v7501_v36 }
 0x759   :  { %v3070_v32 = vpop.f32.mrb[220].mxu0  ;;  %3189 = vmatprep.subr.bf16.mxu1 %v8506_v45 }
 0x75a   :  { %v3072_v53 = vpop.f32.mrb[221].mxu0  ;;  %v3071_v30 = vadd.f32 %v7443_v10, %v3070_v32 }
 0x75b   :  { %v3073_v27 = vpop.f32.mrb[222].mxu0 }
 0x75c   :  { %v3074_v7 = vadd.f32 %v7443_v10, %v3073_v27  ;;  %v3075_v50 = vpop.f32.mrb[223].mxu0 }
 0x75e   :  { %v7507_v34 = vpack.c.bf16 %v3074_v7, %v3071_v30 }
 0x760   :  { %8507 = vst [vmem:[#allocation40_spill] sm:$0xff] %v7507_v34  ;;  %3190 = vmatpush1.bf16.msra.mxu1 %v7507_v34 }
 0x761   :  { %v3078_v60 = vpop.f32.mrb[224].mxu0  ;;  %3191 = vmatprep.subr.bf16.mxu1 %v8506_v45 }
 0x762   :  { %v3080_v18 = vpop.f32.mrb[225].mxu0  ;;  %v3079_v28 = vadd.f32 %v7443_v10, %v3078_v60 }
 0x763   :  { %v3081_v46 = vpop.f32.mrb[226].mxu0 }
 0x764   :  { %v3082_v48 = vadd.f32 %v7443_v10, %v3081_v46  ;;  %v3083_v54 = vpop.f32.mrb[227].mxu0 }
 0x766   :  { %v7513_v21 = vpack.c.bf16 %v3082_v48, %v3079_v28 }
 0x768   :  { %8508 = vst [vmem:[#allocation43_spill] sm:$0xff] %v7513_v21  ;;  %3192 = vmatpush1.bf16.msra.mxu1 %v7513_v21 }
 0x769   :  { %v3086_v2 = vpop.f32.mrb[228].mxu0  ;;  %3193 = vmatprep.subr.bf16.mxu1 %v8506_v45 }
 0x76a   :  { %v3088_v42 = vpop.f32.mrb[229].mxu0  ;;  %v3087_v0 = vadd.f32 %v7443_v10, %v3086_v2 }
 0x76b   :  { %v3089_v61 = vpop.f32.mrb[230].mxu0 }
 0x76c   :  { %v3090_v32 = vadd.f32 %v7443_v10, %v3089_v61  ;;  %v3091_v53 = vpop.f32.mrb[231].mxu0 }
 0x76e   :  { %v7519_v27 = vpack.c.bf16 %v3090_v32, %v3087_v0 }
 0x770   :  { %8509 = vst [vmem:[#allocation44_spill] sm:$0xff] %v7519_v27  ;;  %3194 = vmatpush1.bf16.msra.mxu1 %v7519_v27 }
 0x771   :  { %v3094_v30 = vpop.f32.mrb[232].mxu0  ;;  %3195 = vmatprep.subr.bf16.mxu1 %v8506_v45 }
 0x772   :  { %v3096_v7 = vpop.f32.mrb[233].mxu0  ;;  %v3095_v60 = vadd.f32 %v7443_v10, %v3094_v30 }
 0x773   :  { %v3097_v50 = vpop.f32.mrb[234].mxu0 }
 0x774   :  { %v3098_v18 = vadd.f32 %v7443_v10, %v3097_v50  ;;  %v3099_v46 = vpop.f32.mrb[235].mxu0 }
 0x776   :  { %v7525_v28 = vpack.c.bf16 %v3098_v18, %v3095_v60 }
 0x778   :  { %8510 = vst [vmem:[#allocation41_spill] sm:$0xff] %v7525_v28  ;;  %3196 = vmatpush1.bf16.msra.mxu1 %v7525_v28 }
 0x779   :  { %v3102_v48 = vpop.f32.mrb[236].mxu0  ;;  %3197 = vmatprep.subr.bf16.mxu1 %v8506_v45 }
 0x77a   :  { %v3104_v54 = vpop.f32.mrb[237].mxu0  ;;  %v3103_v42 = vadd.f32 %v7443_v10, %v3102_v48 }
 0x77b   :  { %v3105_v2 = vpop.f32.mrb[238].mxu0 }
 0x77c   :  { %v3106_v61 = vadd.f32 %v7443_v10, %v3105_v2  ;;  %v3107_v0 = vpop.f32.mrb[239].mxu0 }
 0x77e   :  { %v7531_v32 = vpack.c.bf16 %v3106_v61, %v3103_v42  ;;  %v5895_v42 = vld [vmem:[#allocation5] ss:$12 sps:$4 sm:$0xff]  }
 0x780   :  { %8511 = vst [vmem:[#allocation42_spill] sm:$0xff] %v7531_v32  ;;  %3198 = vmatpush1.bf16.msra.mxu1 %v7531_v32 }
 0x781   :  { %v3110_v53 = vpop.f32.mrb[240].mxu0  ;;  %3199 = vmatprep.subr.bf16.mxu1 %v8506_v45 }
 0x782   :  { %v3112_v30 = vpop.f32.mrb[241].mxu0  ;;  %v3111_v50 = vadd.f32 %v7443_v10, %v3110_v53  ;;  %v5896_v53 = vld [vmem:[#allocation5 + $0x1c] ss:$12 sps:$4 sm:$0xff]  }
 0x783   :  { %v3113_v7 = vpop.f32.mrb[242].mxu0 }
 0x784   :  { %v3114_v60 = vadd.f32 %v7443_v10, %v3113_v7  ;;  %v3115_v18 = vpop.f32.mrb[243].mxu0 }
 0x786   :  { %v7537_v46 = vpack.c.bf16 %v3114_v60, %v3111_v50 }
 0x788   :  { %8512 = vst [vmem:[#allocation45_spill] sm:$0xff] %v7537_v46  ;;  %3200 = vmatpush1.bf16.msra.mxu1 %v7537_v46 }
 0x789   :  { %v3118_v48 = vpop.f32.mrb[244].mxu0  ;;  %3750 = vmatprep.subr.bf16.mxu1 %v8506_v45 }
 0x78a   :  { %v3120_v54 = vpop.f32.mrb[245].mxu0  ;;  %v3119_v61 = vadd.f32 %v7443_v10, %v3118_v48 }
 0x78b   :  { %v3121_v2 = vpop.f32.mrb[246].mxu0  ;;  %3202 = vmatmul.mubr.bf16.vlgmr.msra.gmra.mrb[220].mxu1 %v5895_v42  ;;  %v5897_v54 = vld [vmem:[#allocation5 + $0x18] ss:$12 sps:$4 sm:$0xff]  }
 0x78c   :  { %v3122_v0 = vadd.f32 %v7443_v10, %v3121_v2  ;;  %v3123_v30 = vpop.f32.mrb[247].mxu0  ;;  %3209 = vmatprep.mubr.bf16.mxu1 %v5896_v53  ;;  %v5898_v2 = vld [vmem:[#allocation5 + $0x34] ss:$12 sps:$4 sm:$0xff]  }
 0x78e   :  { %v7543_v7 = vpack.c.bf16 %v3122_v0, %v3119_v61 }
 0x790   :  { %8513 = vst [vmem:[#allocation49_spill] sm:$0xff] %v7543_v7  ;;  %5397 = vmatprep.subr.bf16.mxu0 %v7543_v7 }
 0x791   :  { %v3126_v50 = vpop.f32.mrb[248].mxu0  ;;  %5398 = vmatpush3.bf16.msra.mxu0 %v7543_v7 }
 0x792   :  { %v3128_v60 = vpop.f32.mrb[249].mxu0  ;;  %v3127_v42 = vadd.f32 %v7443_v10, %v3126_v50 }
 0x793   :  { %v3129_v18 = vpop.f32.mrb[250].mxu0  ;;  %3210 = vmatmul.mubr.bf16.gmra.mrb[224].mxu1 %v5897_v54  ;;  %v5899_v60 = vld [vmem:[#allocation5 + $0x30] ss:$12 sps:$4 sm:$0xff]  }
 0x794   :  { %v3130_v48 = vadd.f32 %v7443_v10, %v3129_v18  ;;  %v3131_v46 = vpop.f32.mrb[251].mxu0  ;;  %3217 = vmatprep.mubr.bf16.mxu1 %v5898_v2  ;;  %v5900_v18 = vld [vmem:[#allocation5 + $0x4c] ss:$12 sps:$4 sm:$0xff]  }
 0x796   :  { %v7549_v30 = vpack.c.bf16 %v3130_v48, %v3127_v42 }
 0x798   :  { %8514 = vst [vmem:[#allocation50_spill] sm:$0xff] %v7549_v30  ;;  %5399 = vmatprep.subr.bf16.mxu0 %v7549_v30 }
 0x799   :  { %v3134_v61 = vpop.f32.mrb[252].mxu0  ;;  %5400 = vmatpush3.bf16.msra.mxu0 %v7549_v30  ;;  %v5804_v30 = vld [vmem:[#allocation17] sm:$0xff]  }
 0x79a   :  { %v3136_v0 = vpop.f32.mrb[253].mxu0  ;;  %v3135_v54 = vadd.f32 %v7443_v10, %v3134_v61  ;;  %3751 = vmatpush1.bf16.msra.mxu1 %v5804_v30  ;;  %v5906_v30 = vld [vmem:[#allocation5 + $0x38] ss:$12 sps:$4 sm:$0xff]  }
 0x79b   :  { %v3137_v53 = vpop.f32.mrb[254].mxu0  ;;  %3218 = vmatmul.mubr.bf16.gmra.mrb[228].mxu1 %v5899_v60  ;;  %v5901_v0 = vld [vmem:[#allocation5 + $0x48] ss:$12 sps:$4 sm:$0xff]   ;;  %3752 = vmatprep.subr.bf16.mxu1 %v8506_v45 }
 0x79c   :  { %v3138_v50 = vadd.f32 %v7443_v10, %v3137_v53  ;;  %v3139_v7 = vpop.f32.mrb[255].mxu0  ;;  %3225 = vmatprep.mubr.bf16.mxu1 %v5900_v18  ;;  %v5806_v18 = vld [vmem:[#allocation17 + $0x10] sm:$0xff]  }
 0x79d   :  { %v5902_v7 = vld [vmem:[#allocation5 + $0x64] ss:$12 sps:$4 sm:$0xff]  }
 0x79e   :  { %v7555_v46 = vpack.c.bf16 %v3138_v50, %v3135_v54  ;;  %v5805_v54 = vld [vmem:[#allocation17 + $0x8] sm:$0xff]  }
 0x79f   :  { %3753 = vmatpush1.bf16.msra.mxu1 %v5805_v54  ;;  %v5809_v54 = vld [vmem:[#allocation17 + $0x28] sm:$0xff]  }
 0x7a0   :  { %8515 = vst [vmem:[#allocation78_spill] sm:$0xff] %v7555_v46  ;;  %5401 = vmatprep.subr.bf16.mxu0 %v7555_v46  ;;  %3754 = vmatprep.subr.bf16.mxu1 %v8506_v45 }
 0x7a1   :  { %v3142_v42 = vpop.f32.mrb[0].mxu0  ;;  %5402 = vmatpush3.bf16.msra.mxu0 %v7555_v46 }
 0x7a2   :  { %v3144_v48 = vpop.f32.mrb[1].mxu0  ;;  %v3143_v60 = vadd.f32 %v7443_v10, %v3142_v42  ;;  %v5903_v42 = vld [vmem:[#allocation5 + $0x60] ss:$12 sps:$4 sm:$0xff]  }
 0x7a3   :  { %v3145_v2 = vpop.f32.mrb[2].mxu0  ;;  %3226 = vmatmul.mubr.bf16.gmra.mrb[232].mxu1 %v5901_v0  ;;  %v5905_v48 = vld [vmem:[#allocation5 + $0x7c] ss:$12 sps:$4 sm:$0xff]  }
 0x7a4   :  { %v3146_v61 = vadd.f32 %v7443_v10, %v3145_v2  ;;  %v3147_v53 = vpop.f32.mrb[3].mxu0  ;;  %3233 = vmatprep.mubr.bf16.mxu1 %v5902_v7  ;;  %v5904_v10 = vld [vmem:[#allocation5 + $0x20] ss:$12 sps:$4 sm:$0xff]   ;;  %3755 = vmatpush1.bf16.msra.mxu1 %v5806_v18  ;;  %v5910_v7 = vld [vmem:[#allocation5 + $0x68] ss:$12 sps:$4 sm:$0xff]  }
 0x7a5   :  { %v5807_v2 = vld [vmem:[#allocation17 + $0x18] sm:$0xff]   ;;  %3756 = vmatprep.subr.bf16.mxu1 %v8506_v45  ;;  %v5808_v0 = vld [vmem:[#allocation17 + $0x20] sm:$0xff]   ;;  %v5810_v18 = vld [vmem:[#allocation17 + $0x30] sm:$0xff]  }
 0x7a6   :  { %v7561_v50 = vpack.c.bf16 %v3146_v61, %v3143_v60  ;;  %v5907_v60 = vld [vmem:[#allocation5 + $0x78] ss:$12 sps:$4 sm:$0xff]   ;;  %v5908_v61 = vld [vmem:[#allocation5 + $0x50] ss:$12 sps:$4 sm:$0xff]   ;;  %v5909_v53 = vld [vmem:[#allocation5 + $0x94] ss:$12 sps:$4 sm:$0xff]  }
 0x7a8   :  { %8516 = vst [vmem:[#allocation76_spill] sm:$0xff] %v7561_v50  ;;  %5403 = vmatprep.subr.bf16.mxu0 %v7561_v50  ;;  %3757 = vmatpush1.bf16.msra.mxu1 %v5807_v2  ;;  %v5811_v2 = vld [vmem:[#allocation17 + $0x38] sm:$0xff]  }
 0x7a9   :  { %5404 = vmatpush3.bf16.msra.mxu0 %v7561_v50  ;;  %3758 = vmatprep.subr.bf16.mxu1 %v8506_v45 }
 0x7ab   :  { %3234 = vmatmul.mubr.bf16.gmra.mrb[236].mxu1 %v5903_v42  ;;  %v5911_v42 = vld [vmem:[#allocation5 + $0x90] ss:$12 sps:$4 sm:$0xff]  }
 0x7ac   :  { %5406 = vmatmul.mubr.msk.bf16.vlgmr.msra.gmra.mrb[4].mxu0 %vm1320_vm0, %v5904_v10  ;;  %3241 = vmatprep.mubr.bf16.mxu1 %v5905_v48  ;;  %v5912_v10 = vld [vmem:[#allocation5 + $0x80] ss:$12 sps:$4 sm:$0xff]  }
 0x7ad   :  { %5409 = vmatprep.mubr.msk.bf16.mxu0 %vm1320_vm0, %v5906_v30  ;;  %3759 = vmatpush1.bf16.msra.mxu1 %v5808_v0  ;;  %v5913_v48 = vld [vmem:[#allocation5 + $0xac] ss:$12 sps:$4 sm:$0xff]  }
 0x7ae   :  { %3760 = vmatprep.subr.bf16.mxu1 %v8506_v45  ;;  %v5914_v30 = vld [vmem:[#allocation5 + $0x98] ss:$12 sps:$4 sm:$0xff]  }
 0x7af   :  { %v5812_v0 = vld [vmem:[#allocation17 + $0x40] sm:$0xff]  }
 0x7b1   :  { %3761 = vmatpush1.bf16.msra.mxu1 %v5809_v54  ;;  %v5813_v54 = vld [vmem:[#allocation17 + $0x48] sm:$0xff]  }
 0x7b2   :  { %3762 = vmatprep.subr.bf16.mxu1 %v8506_v45 }
 0x7b3   :  { %3242 = vmatmul.mubr.bf16.gmra.mrb[240].mxu1 %v5907_v60  ;;  %v5915_v60 = vld [vmem:[#allocation5 + $0xa8] ss:$12 sps:$4 sm:$0xff]  }
 0x7b4   :  { %5410 = vmatmul.mubr.msk.bf16.gmra.mrb[8].mxu0 %vm1320_vm0, %v5908_v61  ;;  %3249 = vmatprep.mubr.bf16.mxu1 %v5909_v53  ;;  %v5916_v61 = vld [vmem:[#allocation5 + $0xb0] ss:$12 sps:$4 sm:$0xff]  }
 0x7b5   :  { %5413 = vmatprep.mubr.msk.bf16.mxu0 %vm1320_vm0, %v5910_v7  ;;  %3763 = vmatpush1.bf16.msra.mxu1 %v5810_v18  ;;  %v5917_v53 = vld [vmem:[#allocation5 + $0xc4] ss:$12 sps:$4 sm:$0xff]   ;;  %v5918_v7 = vld [vmem:[#allocation5 + $0xc8] ss:$12 sps:$4 sm:$0xff]  }
 0x7b6   :  { %3764 = vmatprep.subr.bf16.mxu1 %v8506_v45  ;;  %v5814_v18 = vld [vmem:[#allocation17 + $0x50] sm:$0xff]  }
 0x7b9   :  { %3765 = vmatpush1.bf16.msra.mxu1 %v5811_v2  ;;  %v5815_v2 = vld [vmem:[#allocation17 + $0x58] sm:$0xff]  }
 0x7ba   :  { %3766 = vmatprep.subr.bf16.mxu1 %v8506_v45 }
 0x7bb   :  { %3250 = vmatmul.mubr.bf16.gmra.mrb[244].mxu1 %v5911_v42  ;;  %v5919_v42 = vld [vmem:[#allocation5 + $0xc0] ss:$12 sps:$4 sm:$0xff]  }
 0x7bc   :  { %5414 = vmatmul.mubr.msk.bf16.gmra.mrb[12].mxu0 %vm1320_vm0, %v5912_v10  ;;  %3257 = vmatprep.mubr.bf16.mxu1 %v5913_v48  ;;  %v5920_v10 = vld [vmem:[#allocation5 + $0xe0] ss:$12 sps:$4 sm:$0xff]   ;;  %v5921_v48 = vld [vmem:[#allocation5 + $0xdc] ss:$12 sps:$4 sm:$0xff]  }
 0x7bd   :  { %5417 = vmatprep.mubr.msk.bf16.mxu0 %vm1320_vm0, %v5914_v30  ;;  %3767 = vmatpush1.bf16.msra.mxu1 %v5812_v0  ;;  %v5922_v30 = vld [vmem:[#allocation5 + $0xf8] ss:$12 sps:$4 sm:$0xff]  }
 0x7be   :  { %3768 = vmatprep.subr.bf16.mxu1 %v8506_v45  ;;  %v5923_v0 = vld [vmem:[#allocation5 + $0xd8] ss:$12 sps:$4 sm:$0xff]  }
 0x7c1   :  { %3769 = vmatpush1.bf16.msra.mxu1 %v5813_v54  ;;  %v5928_v54 = vld [vmem:[#allocation5 + $0x10c] ss:$12 sps:$4 sm:$0xff]  }
 0x7c2   :  { %3770 = vmatprep.subr.bf16.mxu1 %v8506_v45 }
 0x7c3   :  { %3258 = vmatmul.mubr.bf16.gmra.mrb[248].mxu1 %v5915_v60  ;;  %v5924_v60 = vld [vmem:[#allocation5 + $0xf4] ss:$12 sps:$4 sm:$0xff]  }
 0x7c4   :  { %5418 = vmatmul.mubr.msk.bf16.gmra.mrb[16].mxu0 %vm1320_vm0, %v5916_v61  ;;  %3265 = vmatprep.mubr.bf16.mxu1 %v5917_v53  ;;  %v5925_v61 = vld [vmem:[#allocation5 + $0x110] ss:$12 sps:$4 sm:$0xff]   ;;  %v5926_v53 = vld [vmem:[#allocation5 + $0x128] ss:$12 sps:$4 sm:$0xff]  }
 0x7c5   :  { %5421 = vmatprep.mubr.msk.bf16.mxu0 %vm1320_vm0, %v5918_v7  ;;  %3771 = vmatpush1.bf16.msra.mxu1 %v5814_v18  ;;  %v5927_v7 = vld [vmem:[#allocation5 + $0xf0] ss:$12 sps:$4 sm:$0xff]   ;;  %v5929_v18 = vld [vmem:[#allocation5 + $0x140] ss:$12 sps:$4 sm:$0xff]  }
 0x7c6   :  { %3772 = vmatprep.subr.bf16.mxu1 %v8506_v45 }
 0x7c9   :  { %3773 = vmatpush1.bf16.msra.mxu1 %v5815_v2  ;;  %v5933_v2 = vld [vmem:[#allocation5 + $0x170] ss:$12 sps:$4 sm:$0xff]  }
 0x7ca   :  { %3774 = vmatprep.subr.bf16.mxu1 %v8506_v45 }
 0x7cb   :  { %3266 = vmatmul.mubr.bf16.gmra.mrb[252].mxu1 %v5919_v42  ;;  %v5930_v42 = vld [vmem:[#allocation5 + $0x158] ss:$12 sps:$4 sm:$0xff]  }
 0x7cc   :  { %5422 = vmatmul.mubr.msk.bf16.gmra.mrb[20].mxu0 %vm1320_vm0, %v5920_v10  ;;  %3273 = vmatprep.mubr.bf16.mxu1 %v5921_v48  ;;  %v5816_v10 = vld [vmem:[#allocation17 + $0x60] sm:$0xff]  }
 0x7cd   :  { %5425 = vmatprep.mubr.msk.bf16.mxu0 %vm1320_vm0, %v5922_v30  ;;  %3775 = vmatpush1.bf16.msra.mxu1 %v5816_v10  ;;  %v5931_v48 = vld [vmem:[#allocation5 + $0x108] ss:$12 sps:$4 sm:$0xff]   ;;  %v5932_v30 = vld [vmem:[#allocation5 + $0x124] ss:$12 sps:$4 sm:$0xff]  }
 0x7ce   :  { %3776 = vmatprep.subr.bf16.mxu1 %v8506_v45  ;;  %v5942_v10 = vld [vmem:[#allocation5 + $0x150] ss:$12 sps:$4 sm:$0xff]  }
 0x7d3   :  { %3274 = vmatmul.mubr.bf16.gmra.mrb[0].mxu1 %v5923_v0  ;;  %v5934_v0 = vld [vmem:[#allocation5 + $0x188] ss:$12 sps:$4 sm:$0xff]  }
 0x7d4   :  { %3281 = vmatprep.mubr.bf16.mxu1 %v5924_v60  ;;  %5426 = vmatmul.mubr.msk.bf16.gmra.mrb[24].mxu0 %vm1320_vm0, %v5925_v61  ;;  %v5935_v60 = vld [vmem:[#allocation5 + $0x120] ss:$12 sps:$4 sm:$0xff]   ;;  %v5936_v61 = vld [vmem:[#allocation5 + $0x13c] ss:$12 sps:$4 sm:$0xff]  }
 0x7d5   :  { %5429 = vmatprep.mubr.msk.bf16.mxu0 %vm1320_vm0, %v5926_v53  ;;  %v5937_v53 = vld [vmem:[#allocation5 + $0x1a0] ss:$12 sps:$4 sm:$0xff]  }
 0x7db   :  { %3282 = vmatmul.mubr.bf16.gmra.mrb[4].mxu1 %v5927_v7  ;;  %v5938_v7 = vld [vmem:[#allocation5 + $0x1b8] ss:$12 sps:$4 sm:$0xff]  }
 0x7dc   :  { %3289 = vmatprep.mubr.bf16.mxu1 %v5928_v54  ;;  %5430 = vmatmul.mubr.msk.bf16.gmra.mrb[28].mxu0 %vm1320_vm0, %v5929_v18  ;;  %v5939_v54 = vld [vmem:[#allocation5 + $0x138] ss:$12 sps:$4 sm:$0xff]   ;;  %v5940_v18 = vld [vmem:[#allocation5 + $0x154] ss:$12 sps:$4 sm:$0xff]  }
 0x7dd   :  { %5433 = vmatprep.mubr.msk.bf16.mxu0 %vm1320_vm0, %v5930_v42  ;;  %v5941_v42 = vld [vmem:[#allocation5 + $0x1d0] ss:$12 sps:$4 sm:$0xff]  }
 0x7e3   :  { %3290 = vmatmul.mubr.bf16.gmra.mrb[8].mxu1 %v5931_v48  ;;  %v5943_v48 = vld [vmem:[#allocation5 + $0x16c] ss:$12 sps:$4 sm:$0xff]  }
 0x7e4   :  { %3297 = vmatprep.mubr.bf16.mxu1 %v5932_v30  ;;  %5434 = vmatmul.mubr.msk.bf16.gmra.mrb[32].mxu0 %vm1320_vm0, %v5933_v2  ;;  %v5817_v30 = vld [vmem:[#allocation17 + $0x68] sm:$0xff]   ;;  %v5818_v2 = vld [vmem:[#allocation17 + $0x70] sm:$0xff]  }
 0x7e5   :  { %5437 = vmatprep.mubr.msk.bf16.mxu0 %vm1320_vm0, %v5934_v0  ;;  %3777 = vmatpush1.bf16.msra.mxu1 %v5817_v30  ;;  %v5944_v0 = vld [vmem:[#allocation5 + $0x168] ss:$12 sps:$4 sm:$0xff]  }
 0x7e6   :  { %3778 = vmatprep.subr.bf16.mxu1 %v8506_v45 }
 0x7e9   :  { %3779 = vmatpush1.bf16.msra.mxu1 %v5818_v2 }
 0x7ea   :  { %3780 = vmatprep.subr.bf16.mxu1 %v8506_v45 }
 0x7eb   :  { %3298 = vmatmul.mubr.bf16.gmra.mrb[12].mxu1 %v5935_v60  ;;  %v5945_v60 = vld [vmem:[#allocation5 + $0x184] ss:$12 sps:$4 sm:$0xff]  }
 0x7ec   :  { %3305 = vmatprep.mubr.bf16.mxu1 %v5936_v61  ;;  %5438 = vmatmul.mubr.msk.bf16.gmra.mrb[36].mxu0 %vm1320_vm0, %v5937_v53  ;;  %v5819_v61 = vld [vmem:[#allocation17 + $0x78] sm:$0xff]  }
 0x7ed   :  { %5441 = vmatprep.mubr.msk.bf16.mxu0 %vm1320_vm0, %v5938_v7  ;;  %3781 = vmatpush1.bf16.msra.mxu1 %v5819_v61  ;;  %v5946_v53 = vld [vmem:[#allocation5 + $0x180] ss:$12 sps:$4 sm:$0xff]   ;;  %v5947_v7 = vld [vmem:[#allocation5 + $0x19c] ss:$12 sps:$4 sm:$0xff]  }
 0x7f3   :  { %3306 = vmatmul.mubr.bf16.gmra.mrb[16].mxu1 %v5939_v54  ;;  %v5948_v54 = vld [vmem:[#allocation5 + $0x198] ss:$12 sps:$4 sm:$0xff]  }
 0x7f4   :  { %3313 = vmatprep.mubr.bf16.mxu1 %v5940_v18  ;;  %5442 = vmatmul.mubr.msk.bf16.gmra.mrb[40].mxu0 %vm1320_vm0, %v5941_v42  ;;  %v5949_v18 = vld [vmem:[#allocation5 + $0x1b4] ss:$12 sps:$4 sm:$0xff]   ;;  %v5950_v42 = vld [vmem:[#allocation5 + $0x1b0] ss:$12 sps:$4 sm:$0xff]  }
 0x7fb   :  { %3314 = vmatmul.mubr.bf16.gmra.mrb[20].mxu1 %v5942_v10  ;;  %v5951_v10 = vld [vmem:[#allocation5 + $0x1cc] ss:$12 sps:$4 sm:$0xff]  }
 0x7fc   :  { %3321 = vmatprep.mubr.bf16.mxu1 %v5943_v48  ;;  %v5952_v48 = vld [vmem:[#allocation5 + $0x1c8] ss:$12 sps:$4 sm:$0xff]  }
 0x803   :  { %3322 = vmatmul.mubr.bf16.gmra.mrb[24].mxu1 %v5944_v0 }
 0x804   :  { %3329 = vmatprep.mubr.bf16.mxu1 %v5945_v60 }
 0x80b   :  { %3330 = vmatmul.mubr.bf16.gmra.mrb[28].mxu1 %v5946_v53 }
 0x80c   :  { %3337 = vmatprep.mubr.bf16.mxu1 %v5947_v7 }
 0x813   :  { %3338 = vmatmul.mubr.bf16.gmra.mrb[32].mxu1 %v5948_v54 }
 0x814   :  { %3345 = vmatprep.mubr.bf16.mxu1 %v5949_v18 }
 0x81b   :  { %3346 = vmatmul.mubr.bf16.gmra.mrb[36].mxu1 %v5950_v42 }
 0x81c   :  { %3353 = vmatprep.mubr.bf16.mxu1 %v5951_v10 }
 0x823   :  { %3354 = vmatmul.mubr.bf16.gmra.mrb[40].mxu1 %v5952_v48 }
 0x85e   :  { %v3203_v30 = vpop.f32.mrb[220].mxu1 }
 0x85f   :  { %v3205_v2 = vpop.f32.mrb[221].mxu1 }
 0x860   :  { %v3206_v0 = vpop.f32.mrb[222].mxu1 }
 0x861   :  { %v3208_v45 = vpop.f32.mrb[223].mxu1 }
 0x866   :  { %v3211_v60 = vpop.f32.mrb[224].mxu1 }
 0x867   :  { %v3213_v61 = vpop.f32.mrb[225].mxu1 }
 0x868   :  { %v3214_v50 = vpop.f32.mrb[226].mxu1 }
 0x869   :  { %v3216_v53 = vpop.f32.mrb[227].mxu1 }
 0x86e   :  { %v3219_v46 = vpop.f32.mrb[228].mxu1 }
 0x86f   :  { %v3221_v7 = vpop.f32.mrb[229].mxu1 }
 0x870   :  { %v3222_v31 = vpop.f32.mrb[230].mxu1 }
 0x871   :  { %v3224_v54 = vpop.f32.mrb[231].mxu1 }
 0x876   :  { %v3227_v33 = vpop.f32.mrb[232].mxu1 }
 0x877   :  { %v3229_v18 = vpop.f32.mrb[233].mxu1 }
 0x878   :  { %v3230_v32 = vpop.f32.mrb[234].mxu1 }
 0x879   :  { %v3232_v42 = vpop.f32.mrb[235].mxu1 }
 0x87e   :  { %v3235_v41 = vpop.f32.mrb[236].mxu1 }
 0x87f   :  { %v5407_v10 = vpop.f32.mrb[4].mxu0  ;;  %v3237_v20 = vpop.f32.mrb[237].mxu1 }
 0x880   :  { %v3405_v48 = vadd.f32 %v5407_v10, %v3211_v60  ;;  %v3396_v28 = vpop.f32.mrb[5].mxu0  ;;  %v3238_v2 = vpop.f32.mrb[238].mxu1 }
 0x881   :  { %v3397_v27 = vadd.f32 %v3396_v28, %v3203_v30  ;;  %v5408_v45 = vpop.f32.mrb[6].mxu0  ;;  %v3240_v17 = vpop.f32.mrb[239].mxu1 }
 0x882   :  { %v3408_v61 = vadd.f32 %v5408_v45, %v3214_v50  ;;  %v3399_v21 = vpop.f32.mrb[7].mxu0  ;;  %v3557_v7 = vmul.f32 %v3405_v48, %v6921_v5 }
 0x883   :  { %v3400_v53 = vadd.f32 %v3399_v21, %v3206_v0  ;;  %v3555_v18 = vmul.f32 %v3397_v27, %v6917_v55 }
 0x884   :  { %v3558_v54 = vmul.f32 %v3408_v61, %v6925_v11 }
 0x885   :  { %v3556_v42 = vmul.f32 %v3400_v53, %v6919_v3 }
 0x886   :  { %v3596_v16 = vpack.c.bf16 %v3558_v54, %v3557_v7  ;;  %v3243_v52 = vpop.f32.mrb[240].mxu1 }
 0x887   :  { %v5411_v20 = vpop.f32.mrb[8].mxu0  ;;  %v3595_v60 = vpack.c.bf16 %v3556_v42, %v3555_v18  ;;  %v3245_v10 = vpop.f32.mrb[241].mxu1 }
 0x888   :  { %v3421_v34 = vadd.f32 %v5411_v20, %v3227_v33  ;;  %v3412_v28 = vpop.f32.mrb[9].mxu0  ;;  %v3246_v30 = vpop.f32.mrb[242].mxu1 }
 0x889   :  { %v3413_v17 = vadd.f32 %v3412_v28, %v3219_v46  ;;  %v5412_v50 = vpop.f32.mrb[10].mxu0  ;;  %3782 = vmatprep.mubr.bf16.mxu1 %v3595_v60  ;;  %v3248_v21 = vpop.f32.mrb[243].mxu1 }
 0x88a   :  { %v3424_v0 = vadd.f32 %v5412_v50, %v3230_v32  ;;  %v3415_v5 = vpop.f32.mrb[11].mxu0  ;;  %3783 = vmatmul.mubr.bf16.vlgmr.msra.gmra.mrb[44].mxu1 %v7447_v13  ;;  %v3561_v55 = vmul.f32 %v3421_v34, %v6927_v14 }
 0x88b   :  { %v3416_v11 = vadd.f32 %v3415_v5, %v3222_v31  ;;  %3790 = vmatprep.mubr.bf16.mxu1 %v3596_v16  ;;  %v3559_v27 = vmul.f32 %v3413_v17, %v6923_v9 }
 0x88c   :  { %v3562_v3 = vmul.f32 %v3424_v0, %v6933_v57 }
 0x88d   :  { %v3560_v33 = vmul.f32 %v3416_v11, %v6929_v19 }
 0x88e   :  { %v3251_v48 = vpop.f32.mrb[244].mxu1  ;;  %v3598_v45 = vpack.c.bf16 %v3562_v3, %v3561_v55 }
 0x88f   :  { %v5415_v46 = vpop.f32.mrb[12].mxu0  ;;  %v3597_v61 = vpack.c.bf16 %v3560_v33, %v3559_v27  ;;  %v3253_v53 = vpop.f32.mrb[245].mxu1 }
 0x890   :  { %v3437_v7 = vadd.f32 %v5415_v46, %v3243_v52  ;;  %v3428_v32 = vpop.f32.mrb[13].mxu0  ;;  %v3254_v54 = vpop.f32.mrb[246].mxu1 }
 0x891   :  { %v3429_v18 = vadd.f32 %v3428_v32, %v3235_v41  ;;  %v5416_v13 = vpop.f32.mrb[14].mxu0  ;;  %v3256_v31 = vpop.f32.mrb[247].mxu1 }
 0x892   :  { %v3440_v16 = vadd.f32 %v5416_v13, %v3246_v30  ;;  %v3431_v42 = vpop.f32.mrb[15].mxu0  ;;  %3791 = vmatmul.mubr.bf16.gmra.mrb[48].mxu1 %v7453_v59  ;;  %v3565_v9 = vmul.f32 %v3437_v7, %v6937_v49 }
 0x893   :  { %v3432_v14 = vadd.f32 %v3431_v42, %v3238_v2  ;;  %3798 = vmatprep.mubr.bf16.mxu1 %v3597_v61  ;;  %v3563_v57 = vmul.f32 %v3429_v18, %v6931_v24 }
 0x894   :  { %v3566_v19 = vmul.f32 %v3440_v16, %v6950_v6 }
 0x895   :  { %v3564_v34 = vmul.f32 %v3432_v14, %v6941_v58 }
 0x896   :  { %v3259_v52 = vpop.f32.mrb[248].mxu1  ;;  %v3600_v20 = vpack.c.bf16 %v3566_v19, %v3565_v9 }
 0x897   :  { %v5419_v60 = vpop.f32.mrb[16].mxu0  ;;  %v3261_v41 = vpop.f32.mrb[249].mxu1  ;;  %v3599_v10 = vpack.c.bf16 %v3564_v34, %v3563_v57 }
 0x898   :  { %v3453_v28 = vadd.f32 %v5419_v60, %v3259_v52  ;;  %v3444_v30 = vpop.f32.mrb[17].mxu0  ;;  %v3262_v17 = vpop.f32.mrb[250].mxu1 }
 0x899   :  { %v3445_v50 = vadd.f32 %v3444_v30, %v3251_v48  ;;  %v5420_v59 = vpop.f32.mrb[18].mxu0  ;;  %v3264_v2 = vpop.f32.mrb[251].mxu1 }
 0x89a   :  { %v3456_v21 = vadd.f32 %v5420_v59, %v3262_v17  ;;  %v3447_v0 = vpop.f32.mrb[19].mxu0  ;;  %3799 = vmatmul.mubr.bf16.gmra.mrb[52].mxu1 %v7459_v38  ;;  %v7615_v24 = vmul.f32 %v3453_v28, %v6959_v29 }
 0x89b   :  { %v3448_v49 = vadd.f32 %v3447_v0, %v3254_v54  ;;  %3806 = vmatprep.mubr.bf16.mxu1 %v3598_v45  ;;  %v3567_v6 = vmul.f32 %v3445_v50, %v6946_v40  ;;  %v8517_v50 = vld [vmem:[#allocation46_spill] sm:$0xff] }
 0x89c   :  { %v7618_v58 = vmul.f32 %v3456_v21, %v6962_v8 }
 0x89d   :  { %v3568_v5 = vmul.f32 %v3448_v49, %v8465_v26 }
 0x89e   :  { %v3267_v11 = vpop.f32.mrb[252].mxu1  ;;  %v3602_v55 = vpack.c.bf16 %v7618_v58, %v7615_v24 }
 0x89f   :  { %v5423_v3 = vpop.f32.mrb[20].mxu0  ;;  %v3269_v27 = vpop.f32.mrb[253].mxu1  ;;  %v3601_v33 = vpack.c.bf16 %v3568_v5, %v3567_v6 }
 0x8a0   :  { %v3460_v38 = vpop.f32.mrb[21].mxu0  ;;  %v3270_v48 = vpop.f32.mrb[254].mxu1 }
 0x8a1   :  { %v3461_v45 = vadd.f32 %v3460_v38, %v3267_v11  ;;  %v5424_v46 = vpop.f32.mrb[22].mxu0  ;;  %v3272_v29 = vpop.f32.mrb[255].mxu1 }
 0x8a2   :  { %v3463_v61 = vpop.f32.mrb[23].mxu0  ;;  %3807 = vmatmul.mubr.bf16.gmra.mrb[56].mxu1 %v7465_v47 }
 0x8a3   :  { %v3464_v8 = vadd.f32 %v3463_v61, %v3270_v48  ;;  %3814 = vmatprep.mubr.bf16.mxu1 %v3599_v10  ;;  %v3571_v40 = vmul.f32 %v3461_v45, %v8468_v51 }
 0x8a5   :  { %v3572_v26 = vmul.f32 %v3464_v8, %v8469_v23 }
 0x8a6   :  { %v3275_v53 = vpop.f32.mrb[0].mxu1 }
 0x8a7   :  { %v3469_v7 = vadd.f32 %v5423_v3, %v3275_v53  ;;  %v3277_v32 = vpop.f32.mrb[1].mxu1  ;;  %v5427_v54 = vpop.f32.mrb[24].mxu0  ;;  %v3603_v18 = vpack.c.bf16 %v3572_v26, %v3571_v40  ;;  %v8519_v3 = vld [vmem:[#allocation48_spill] sm:$0xff] }
 0x8a8   :  { %v3278_v13 = vpop.f32.mrb[2].mxu1  ;;  %v3476_v31 = vpop.f32.mrb[25].mxu0 }
 0x8a9   :  { %v3472_v16 = vadd.f32 %v5424_v46, %v3278_v13  ;;  %v3280_v42 = vpop.f32.mrb[3].mxu1  ;;  %v5428_v14 = vpop.f32.mrb[26].mxu0  ;;  %v3573_v47 = vmul.f32 %v3469_v7, %v8466_v12 }
 0x8aa   :  { %3815 = vmatmul.mubr.bf16.gmra.mrb[60].mxu1 %v7471_v37  ;;  %v3479_v9 = vpop.f32.mrb[27].mxu0 }
 0x8ab   :  { %v3574_v19 = vmul.f32 %v3472_v16, %v8467_v39  ;;  %3822 = vmatprep.mubr.bf16.mxu1 %v3600_v20 }
 0x8ad   :  { %v3604_v51 = vpack.c.bf16 %v3574_v19, %v3573_v47 }
 0x8ae   :  { %v3283_v23 = vpop.f32.mrb[4].mxu1 }
 0x8af   :  { %v3477_v57 = vadd.f32 %v3476_v31, %v3283_v23  ;;  %v3285_v34 = vpop.f32.mrb[5].mxu1  ;;  %v5431_v52 = vpop.f32.mrb[28].mxu0 }
 0x8b0   :  { %v3286_v60 = vpop.f32.mrb[6].mxu1  ;;  %v3492_v41 = vpop.f32.mrb[29].mxu0 }
 0x8b1   :  { %v3480_v10 = vadd.f32 %v3479_v9, %v3286_v60  ;;  %v3288_v28 = vpop.f32.mrb[7].mxu1  ;;  %v5432_v30 = vpop.f32.mrb[30].mxu0  ;;  %v3575_v37 = vmul.f32 %v3477_v57, %v8470_v56 }
 0x8b2   :  { %3823 = vmatmul.mubr.bf16.gmra.mrb[64].mxu1 %v7477_v22  ;;  %v3495_v17 = vpop.f32.mrb[31].mxu0  ;;  %v8518_v22 = vld [vmem:[#allocation47_spill] sm:$0xff] }
 0x8b3   :  { %v3576_v12 = vmul.f32 %v3480_v10, %v8517_v50  ;;  %3830 = vmatprep.mubr.bf16.mxu1 %v3601_v33 }
 0x8b5   :  { %v3605_v39 = vpack.c.bf16 %v3576_v12, %v3575_v37  ;;  %v8521_v37 = vld [vmem:[#allocation53_spill] sm:$0xff]  ;;  %v8522_v12 = vld [vmem:[#allocation54_spill] sm:$0xff] }
 0x8b6   :  { %v3291_v20 = vpop.f32.mrb[8].mxu1 }
 0x8b7   :  { %v3485_v59 = vadd.f32 %v5427_v54, %v3291_v20  ;;  %v3293_v2 = vpop.f32.mrb[9].mxu1  ;;  %v5435_v21 = vpop.f32.mrb[32].mxu0 }
 0x8b8   :  { %v3294_v0 = vpop.f32.mrb[10].mxu1  ;;  %v3508_v49 = vpop.f32.mrb[33].mxu0 }
 0x8b9   :  { %v3488_v24 = vadd.f32 %v5428_v14, %v3294_v0  ;;  %v3296_v58 = vpop.f32.mrb[11].mxu1  ;;  %v5436_v6 = vpop.f32.mrb[34].mxu0  ;;  %v3577_v11 = vmul.f32 %v3485_v59, %v8518_v22 }
 0x8ba   :  { %3831 = vmatmul.mubr.bf16.gmra.mrb[68].mxu1 %v7483_v63  ;;  %v3511_v5 = vpop.f32.mrb[35].mxu0  ;;  %v8525_v58 = vld [vmem:[#allocation56_spill] sm:$0xff] }
 0x8bb   :  { %v3578_v56 = vmul.f32 %v3488_v24, %v8519_v3  ;;  %3838 = vmatprep.mubr.bf16.mxu1 %v3602_v55 }
 0x8bd   :  { %v3606_v27 = vpack.c.bf16 %v3578_v56, %v3577_v11 }
 0x8be   :  { %v3299_v33 = vpop.f32.mrb[12].mxu1 }
 0x8bf   :  { %v3493_v38 = vadd.f32 %v3492_v41, %v3299_v33  ;;  %v3301_v48 = vpop.f32.mrb[13].mxu1  ;;  %v5439_v45 = vpop.f32.mrb[36].mxu0 }
 0x8c0   :  { %v3302_v46 = vpop.f32.mrb[14].mxu1  ;;  %v3524_v29 = vpop.f32.mrb[37].mxu0  ;;  %v8527_v48 = vld [vmem:[#allocation57_spill] sm:$0xff] }
 0x8c1   :  { %v3496_v61 = vadd.f32 %v3495_v17, %v3302_v46  ;;  %v3304_v8 = vpop.f32.mrb[15].mxu1  ;;  %v5440_v40 = vpop.f32.mrb[38].mxu0  ;;  %v3579_v63 = vmul.f32 %v3493_v38, %v8475_v44  ;;  %v8520_v17 = vld [vmem:[#allocation40_spill] sm:$0xff] }
 0x8c2   :  { %3839 = vmatmul.mubr.bf16.gmra.mrb[72].mxu1 %v7489_v4  ;;  %v3527_v26 = vpop.f32.mrb[39].mxu0  ;;  %v8526_v38 = vld [vmem:[#allocation44_spill] sm:$0xff] }
 0x8c3   :  { %v3580_v53 = vmul.f32 %v3496_v61, %v8476_v62  ;;  %3846 = vmatprep.mubr.bf16.mxu1 %v3603_v18 }
 0x8c5   :  { %v3607_v7 = vpack.c.bf16 %v3580_v53, %v3579_v63 }
 0x8c6   :  { %v3307_v55 = vpop.f32.mrb[16].mxu1 }
 0x8c7   :  { %v3501_v32 = vadd.f32 %v5431_v52, %v3307_v55  ;;  %v3309_v54 = vpop.f32.mrb[17].mxu1  ;;  %v7639_v13 = vpop.f32.mrb[40].mxu0 }
 0x8c8   :  { %v3310_v31 = vpop.f32.mrb[18].mxu1  ;;  %v3540_v16 = vpop.f32.mrb[41].mxu0  ;;  %v8529_v54 = vld [vmem:[#allocation41_spill] sm:$0xff] }
 0x8c9   :  { %v3504_v42 = vadd.f32 %v5432_v30, %v3310_v31  ;;  %v3312_v14 = vpop.f32.mrb[19].mxu1  ;;  %v7641_v9 = vpop.f32.mrb[42].mxu0  ;;  %v3581_v44 = vmul.f32 %v3501_v32, %v7034_v43 }
 0x8ca   :  { %3847 = vmatmul.mubr.bf16.gmra.mrb[76].mxu1 %v7495_v35  ;;  %v3543_v4 = vpop.f32.mrb[43].mxu0 }
 0x8cb   :  { %v3582_v62 = vmul.f32 %v3504_v42, %v7042_v25  ;;  %3854 = vmatprep.mubr.bf16.mxu1 %v3604_v51 }
 0x8cd   :  { %v3608_v18 = vpack.c.bf16 %v3582_v62, %v3581_v44 }
 0x8ce   :  { %v3315_v47 = vpop.f32.mrb[20].mxu1 }
 0x8cf   :  { %v3509_v19 = vadd.f32 %v3508_v49, %v3315_v47  ;;  %v3317_v23 = vpop.f32.mrb[21].mxu1  ;;  %v8523_v49 = vld [vmem:[#allocation43_spill] sm:$0xff] }
 0x8d0   :  { %v3318_v57 = vpop.f32.mrb[22].mxu1  ;;  %v8532_v23 = vld [vmem:[#allocation42_spill] sm:$0xff] }
 0x8d1   :  { %v3512_v34 = vadd.f32 %v3511_v5, %v3318_v57  ;;  %v3320_v52 = vpop.f32.mrb[23].mxu1  ;;  %v3583_v60 = vmul.f32 %v3509_v19, %v8486_v15 }
 0x8d2   :  { %3855 = vmatmul.mubr.bf16.gmra.mrb[80].mxu1 %v7501_v36 }
 0x8d3   :  { %v3584_v41 = vmul.f32 %v3512_v34, %v8488_v1  ;;  %3862 = vmatprep.mubr.bf16.mxu1 %v3605_v39  ;;  %v8534_v34 = vld [vmem:[#allocation62_spill] sm:$0xff] }
 0x8d5   :  { %v3609_v35 = vpack.c.bf16 %v3584_v41, %v3583_v60  ;;  %v8535_v41 = vld [vmem:[#allocation45_spill] sm:$0xff] }
 0x8d6   :  { %v3323_v10 = vpop.f32.mrb[24].mxu1 }
 0x8d7   :  { %v3517_v43 = vadd.f32 %v5435_v21, %v3323_v10  ;;  %v3325_v28 = vpop.f32.mrb[25].mxu1  ;;  %v8524_v21 = vld [vmem:[#allocation55_spill] sm:$0xff]  ;;  %v8538_v10 = vld [vmem:[#allocation78_spill] sm:$0xff] }
 0x8d8   :  { %v3326_v25 = vpop.f32.mrb[26].mxu1 }
 0x8d9   :  { %v3520_v51 = vadd.f32 %v5436_v6, %v3326_v25  ;;  %v3328_v30 = vpop.f32.mrb[27].mxu1  ;;  %v3585_v50 = vmul.f32 %v3517_v43, %v8521_v37 }
 0x8da   :  { %3863 = vmatmul.mubr.bf16.gmra.mrb[84].mxu1 %v8520_v17 }
 0x8db   :  { %v3586_v20 = vmul.f32 %v3520_v51, %v8522_v12  ;;  %3870 = vmatprep.mubr.bf16.mxu1 %v3606_v27 }
 0x8dd   :  { %v3610_v36 = vpack.c.bf16 %v3586_v20, %v3585_v50 }
 0x8de   :  { %v3331_v59 = vpop.f32.mrb[28].mxu1 }
 0x8df   :  { %v3525_v15 = vadd.f32 %v3524_v29, %v3331_v59  ;;  %v3333_v2 = vpop.f32.mrb[29].mxu1  ;;  %v8528_v29 = vld [vmem:[#allocation58_spill] sm:$0xff] }
 0x8e0   :  { %v3334_v1 = vpop.f32.mrb[30].mxu1 }
 0x8e1   :  { %v3528_v39 = vadd.f32 %v3527_v26, %v3334_v1  ;;  %v3336_v0 = vpop.f32.mrb[31].mxu1  ;;  %v3587_v24 = vmul.f32 %v3525_v15, %v8524_v21 }
 0x8e2   :  { %3871 = vmatmul.mubr.bf16.gmra.mrb[88].mxu1 %v8523_v49  ;;  %v7671_v0 = vld [vmem:[#allocation19] ss:$0 sm:$0xff] }
 0x8e3   :  { %v3588_v6 = vmul.f32 %v3528_v39, %v8525_v58  ;;  %3878 = vmatprep.mubr.bf16.mxu1 %v3607_v7 }
 0x8e5   :  { %v3611_v5 = vpack.c.bf16 %v3588_v6, %v3587_v24 }
 0x8e6   :  { %v3339_v22 = vpop.f32.mrb[32].mxu1 }
 0x8e7   :  { %v3533_v11 = vadd.f32 %v5439_v45, %v3339_v22  ;;  %v3341_v3 = vpop.f32.mrb[33].mxu1  ;;  %v8530_v45 = vld [vmem:[#allocation59_spill] sm:$0xff] }
 0x8e8   :  { %v3342_v56 = vpop.f32.mrb[34].mxu1 }
 0x8e9   :  { %v3536_v27 = vadd.f32 %v5440_v40, %v3342_v56  ;;  %v3344_v33 = vpop.f32.mrb[35].mxu1  ;;  %v3589_v46 = vmul.f32 %v3533_v11, %v8527_v48  ;;  %v8531_v40 = vld [vmem:[#allocation60_spill] sm:$0xff] }
 0x8ea   :  { %3879 = vmatmul.mubr.bf16.gmra.mrb[92].mxu1 %v8526_v38 }
 0x8eb   :  { %v3590_v61 = vmul.f32 %v3536_v27, %v8528_v29  ;;  %3886 = vmatprep.mubr.bf16.mxu1 %v3608_v18 }
 0x8ed   :  { %v3612_v8 = vpack.c.bf16 %v3590_v61, %v3589_v46 }
 0x8ee   :  { %v3347_v26 = vpop.f32.mrb[36].mxu1 }
 0x8ef   :  { %v3541_v63 = vadd.f32 %v3540_v16, %v3347_v26  ;;  %v3349_v53 = vpop.f32.mrb[37].mxu1 }
 0x8f0   :  { %v3350_v55 = vpop.f32.mrb[38].mxu1 }
 0x8f1   :  { %v3544_v7 = vadd.f32 %v3543_v4, %v3350_v55  ;;  %v3352_v32 = vpop.f32.mrb[39].mxu1  ;;  %v3591_v31 = vmul.f32 %v3541_v63, %v8530_v45  ;;  %v8533_v4 = vld [vmem:[#allocation61_spill] sm:$0xff] }
 0x8f2   :  { %3887 = vmatmul.mubr.bf16.gmra.mrb[96].mxu1 %v8529_v54 }
 0x8f3   :  { %v3592_v42 = vmul.f32 %v3544_v7, %v8531_v40  ;;  %3894 = vmatprep.mubr.bf16.mxu1 %v3609_v35  ;;  %v8536_v35 = vld [vmem:[#allocation49_spill] sm:$0xff] }
 0x8f5   :  { %v3613_v14 = vpack.c.bf16 %v3592_v42, %v3591_v31 }
 0x8f6   :  { %v3355_v44 = vpop.f32.mrb[40].mxu1 }
 0x8f7   :  { %v3549_v62 = vadd.f32 %v7639_v13, %v3355_v44  ;;  %v3357_v47 = vpop.f32.mrb[41].mxu1  ;;  %v8537_v13 = vld [vmem:[#allocation50_spill] sm:$0xff] }
 0x8f8   :  { %v3358_v18 = vpop.f32.mrb[42].mxu1 }
 0x8f9   :  { %v3552_v19 = vadd.f32 %v7641_v9, %v3358_v18  ;;  %v3360_v16 = vpop.f32.mrb[43].mxu1  ;;  %v3593_v57 = vmul.f32 %v3549_v62, %v8533_v4  ;;  %v8539_v9 = vld [vmem:[#allocation76_spill] sm:$0xff] }
 0x8fa   :  { %3895 = vmatmul.mubr.bf16.gmra.mrb[100].mxu1 %v8532_v23 }
 0x8fb   :  { %v3594_v52 = vmul.f32 %v3552_v19, %v8534_v34  ;;  %3902 = vmatprep.mubr.bf16.mxu1 %v3610_v36 }
 0x8fd   :  { %v3614_v60 = vpack.c.bf16 %v3594_v52, %v3593_v57 }
 0x902   :  { %3903 = vmatmul.mubr.bf16.gmra.mrb[104].mxu1 %v8535_v41 }
 0x903   :  { %3910 = vmatprep.mubr.bf16.mxu1 %v3611_v5 }
 0x90a   :  { %3911 = vmatmul.mubr.bf16.gmra.mrb[108].mxu1 %v8536_v35 }
 0x90b   :  { %3918 = vmatprep.mubr.bf16.mxu1 %v3612_v8 }
 0x912   :  { %3919 = vmatmul.mubr.bf16.gmra.mrb[112].mxu1 %v8537_v13 }
 0x913   :  { %3926 = vmatprep.mubr.bf16.mxu1 %v3613_v14 }
 0x91a   :  { %3927 = vmatmul.mubr.bf16.gmra.mrb[116].mxu1 %v8538_v10 }
 0x91b   :  { %3934 = vmatprep.mubr.bf16.mxu1 %v3614_v60 }
 0x922   :  { %3935 = vmatmul.mubr.bf16.gmra.mrb[120].mxu1 %v8539_v9 }
 0x95d   :  { %v3784_v43 = vpop.f32.mrb[44].mxu1 }
 0x95e   :  { %v3786_v28 = vpop.f32.mrb[45].mxu1  ;;  %v7677_v6 = vadd.f32 %v7671_v0, %v3784_v43 }
 0x95f   :  { %v3787_v25 = vpop.f32.mrb[46].mxu1 }
 0x960   :  { %v3789_v51 = vpop.f32.mrb[47].mxu1  ;;  %v7674_v21 = vadd.f32 %v7671_v0, %v3787_v25 }
 0x962   :  { %v3943_v11 = vadd.f32 %v7674_v21, %v7677_v6 }
 0x965   :  { %v3792_v30 = vpop.f32.mrb[48].mxu1 }
 0x966   :  { %v3794_v17 = vpop.f32.mrb[49].mxu1  ;;  %v7680_v5 = vadd.f32 %v7671_v0, %v3792_v30 }
 0x967   :  { %v3795_v37 = vpop.f32.mrb[50].mxu1 }
 0x968   :  { %v3797_v50 = vpop.f32.mrb[51].mxu1  ;;  %v3944_v3 = vadd.f32 %v3943_v11, %v7680_v5  ;;  %v7686_v56 = vadd.f32 %v7671_v0, %v3795_v37 }
 0x96a   :  { %v3945_v46 = vadd.f32 %v3944_v3, %v7686_v56 }
 0x96d   :  { %v3800_v12 = vpop.f32.mrb[52].mxu1 }
 0x96e   :  { %v3802_v20 = vpop.f32.mrb[53].mxu1  ;;  %v7689_v33 = vadd.f32 %v7671_v0, %v3800_v12 }
 0x96f   :  { %v3803_v36 = vpop.f32.mrb[54].mxu1 }
 0x970   :  { %v3805_v59 = vpop.f32.mrb[55].mxu1  ;;  %v3946_v61 = vadd.f32 %v3945_v46, %v7689_v33  ;;  %v7694_v8 = vadd.f32 %v7671_v0, %v3803_v36 }
 0x972   :  { %v3947_v53 = vadd.f32 %v3946_v61, %v7694_v8 }
 0x975   :  { %v3808_v15 = vpop.f32.mrb[56].mxu1 }
 0x976   :  { %v3810_v2 = vpop.f32.mrb[57].mxu1  ;;  %v7697_v26 = vadd.f32 %v7671_v0, %v3808_v15 }
 0x977   :  { %v3811_v1 = vpop.f32.mrb[58].mxu1 }
 0x978   :  { %v3813_v39 = vpop.f32.mrb[59].mxu1  ;;  %v3948_v32 = vadd.f32 %v3947_v53, %v7697_v26  ;;  %v7702_v54 = vadd.f32 %v7671_v0, %v3811_v1 }
 0x97a   :  { %v3949_v40 = vadd.f32 %v3948_v32, %v7702_v54 }
 0x97d   :  { %v3816_v49 = vpop.f32.mrb[60].mxu1 }
 0x97e   :  { %v3818_v24 = vpop.f32.mrb[61].mxu1  ;;  %v7705_v31 = vadd.f32 %v7671_v0, %v3816_v49 }
 0x97f   :  { %v3819_v58 = vpop.f32.mrb[62].mxu1 }
 0x980   :  { %v3821_v22 = vpop.f32.mrb[63].mxu1  ;;  %v3950_v14 = vadd.f32 %v3949_v40, %v7705_v31  ;;  %v7710_v44 = vadd.f32 %v7671_v0, %v3819_v58 }
 0x982   :  { %v3951_v16 = vadd.f32 %v3950_v14, %v7710_v44 }
 0x985   :  { %v3824_v27 = vpop.f32.mrb[64].mxu1 }
 0x986   :  { %v3826_v38 = vpop.f32.mrb[65].mxu1  ;;  %v7713_v18 = vadd.f32 %v7671_v0, %v3824_v27 }
 0x987   :  { %v3827_v48 = vpop.f32.mrb[66].mxu1 }
 0x988   :  { %v3829_v29 = vpop.f32.mrb[67].mxu1  ;;  %v3952_v23 = vadd.f32 %v3951_v16, %v7713_v18  ;;  %v7718_v4 = vadd.f32 %v7671_v0, %v3827_v48 }
 0x98a   :  { %v3953_v41 = vadd.f32 %v3952_v23, %v7718_v4 }
 0x98d   :  { %v3832_v63 = vpop.f32.mrb[68].mxu1 }
 0x98e   :  { %v3834_v55 = vpop.f32.mrb[69].mxu1  ;;  %v7721_v34 = vadd.f32 %v7671_v0, %v3832_v63 }
 0x98f   :  { %v3835_v7 = vpop.f32.mrb[70].mxu1 }
 0x990   :  { %v3837_v45 = vpop.f32.mrb[71].mxu1  ;;  %v3954_v13 = vadd.f32 %v3953_v41, %v7721_v34  ;;  %v7726_v10 = vadd.f32 %v7671_v0, %v3835_v7 }
 0x992   :  { %v3955_v28 = vadd.f32 %v3954_v13, %v7726_v10 }
 0x995   :  { %v3840_v42 = vpop.f32.mrb[72].mxu1 }
 0x996   :  { %v3842_v62 = vpop.f32.mrb[73].mxu1  ;;  %v7729_v9 = vadd.f32 %v7671_v0, %v3840_v42 }
 0x997   :  { %v3843_v47 = vpop.f32.mrb[74].mxu1 }
 0x998   :  { %v3845_v19 = vpop.f32.mrb[75].mxu1  ;;  %v3956_v30 = vadd.f32 %v3955_v28, %v7729_v9  ;;  %v7734_v17 = vadd.f32 %v7671_v0, %v3843_v47 }
 0x99a   :  { %v3957_v12 = vadd.f32 %v3956_v30, %v7734_v17 }
 0x99d   :  { %v3848_v57 = vpop.f32.mrb[76].mxu1 }
 0x99e   :  { %v3850_v52 = vpop.f32.mrb[77].mxu1  ;;  %v7737_v50 = vadd.f32 %v7671_v0, %v3848_v57 }
 0x99f   :  { %v3851_v60 = vpop.f32.mrb[78].mxu1 }
 0x9a0   :  { %v3853_v35 = vpop.f32.mrb[79].mxu1  ;;  %v3958_v36 = vadd.f32 %v3957_v12, %v7737_v50  ;;  %v7742_v59 = vadd.f32 %v7671_v0, %v3851_v60 }
 0x9a2   :  { %v3959_v49 = vadd.f32 %v3958_v36, %v7742_v59 }
 0x9a5   :  { %v3856_v43 = vpop.f32.mrb[80].mxu1 }
 0x9a6   :  { %v3858_v25 = vpop.f32.mrb[81].mxu1  ;;  %v7745_v1 = vadd.f32 %v7671_v0, %v3856_v43 }
 0x9a7   :  { %v3859_v51 = vpop.f32.mrb[82].mxu1 }
 0x9a8   :  { %v3861_v37 = vpop.f32.mrb[83].mxu1  ;;  %v3960_v24 = vadd.f32 %v3959_v49, %v7745_v1  ;;  %v7750_v58 = vadd.f32 %v7671_v0, %v3859_v51 }
 0x9aa   :  { %v3961_v38 = vadd.f32 %v3960_v24, %v7750_v58 }
 0x9ad   :  { %v3864_v20 = vpop.f32.mrb[84].mxu1 }
 0x9ae   :  { %v3866_v15 = vpop.f32.mrb[85].mxu1  ;;  %v7753_v11 = vadd.f32 %v7671_v0, %v3864_v20 }
 0x9af   :  { %v3867_v2 = vpop.f32.mrb[86].mxu1 }
 0x9b0   :  { %v3869_v39 = vpop.f32.mrb[87].mxu1  ;;  %v3962_v46 = vadd.f32 %v3961_v38, %v7753_v11  ;;  %v7758_v29 = vadd.f32 %v7671_v0, %v3867_v2 }
 0x9b2   :  { %v3963_v53 = vadd.f32 %v3962_v46, %v7758_v29 }
 0x9b5   :  { %v3872_v22 = vpop.f32.mrb[88].mxu1 }
 0x9b6   :  { %v3874_v3 = vpop.f32.mrb[89].mxu1  ;;  %v7761_v61 = vadd.f32 %v7671_v0, %v3872_v22 }
 0x9b7   :  { %v3875_v27 = vpop.f32.mrb[90].mxu1 }
 0x9b8   :  { %v3877_v48 = vpop.f32.mrb[91].mxu1  ;;  %v3964_v32 = vadd.f32 %v3963_v53, %v7761_v61  ;;  %v7766_v45 = vadd.f32 %v7671_v0, %v3875_v27 }
 0x9ba   :  { %v3965_v14 = vadd.f32 %v3964_v32, %v7766_v45 }
 0x9bd   :  { %v3880_v63 = vpop.f32.mrb[92].mxu1 }
 0x9be   :  { %v3882_v55 = vpop.f32.mrb[93].mxu1  ;;  %v7769_v42 = vadd.f32 %v7671_v0, %v3880_v63 }
 0x9bf   :  { %v3883_v7 = vpop.f32.mrb[94].mxu1 }
 0x9c0   :  { %v3885_v40 = vpop.f32.mrb[95].mxu1  ;;  %v3966_v47 = vadd.f32 %v3965_v14, %v7769_v42  ;;  %v7774_v19 = vadd.f32 %v7671_v0, %v3883_v7 }
 0x9c2   :  { %v3967_v60 = vadd.f32 %v3966_v47, %v7774_v19 }
 0x9c5   :  { %v3888_v62 = vpop.f32.mrb[96].mxu1 }
 0x9c6   :  { %v3890_v16 = vpop.f32.mrb[97].mxu1  ;;  %v7777_v57 = vadd.f32 %v7671_v0, %v3888_v62 }
 0x9c7   :  { %v3891_v23 = vpop.f32.mrb[98].mxu1 }
 0x9c8   :  { %v3893_v52 = vpop.f32.mrb[99].mxu1  ;;  %v3968_v41 = vadd.f32 %v3967_v60, %v7777_v57  ;;  %v7782_v35 = vadd.f32 %v7671_v0, %v3891_v23 }
 0x9ca   :  { %v3969_v51 = vadd.f32 %v3968_v41, %v7782_v35 }
 0x9cd   :  { %v3896_v13 = vpop.f32.mrb[100].mxu1 }
 0x9ce   :  { %v7785_v43 = vadd.f32 %v7671_v0, %v3896_v13  ;;  %v3898_v28 = vpop.f32.mrb[101].mxu1 }
 0x9cf   :  { %v3899_v25 = vpop.f32.mrb[102].mxu1 }
 0x9d0   :  { %v3901_v30 = vpop.f32.mrb[103].mxu1  ;;  %v3970_v37 = vadd.f32 %v3969_v51, %v7785_v43  ;;  %v3900_v12 = vadd.f32 %v7671_v0, %v3899_v25 }
 0x9d2   :  { %v3971_v36 = vadd.f32 %v3970_v37, %v3900_v12 }
 0x9d5   :  { %v3904_v20 = vpop.f32.mrb[104].mxu1 }
 0x9d6   :  { %v3905_v15 = vadd.f32 %v7671_v0, %v3904_v20  ;;  %v3906_v2 = vpop.f32.mrb[105].mxu1 }
 0x9d7   :  { %v3907_v39 = vpop.f32.mrb[106].mxu1 }
 0x9d8   :  { %v3972_v49 = vadd.f32 %v3971_v36, %v3905_v15  ;;  %v3908_v24 = vadd.f32 %v7671_v0, %v3907_v39  ;;  %v3909_v22 = vpop.f32.mrb[107].mxu1 }
 0x9da   :  { %v3973_v3 = vadd.f32 %v3972_v49, %v3908_v24 }
 0x9dd   :  { %v3912_v27 = vpop.f32.mrb[108].mxu1 }
 0x9de   :  { %v3913_v38 = vadd.f32 %v7671_v0, %v3912_v27  ;;  %v3914_v48 = vpop.f32.mrb[109].mxu1 }
 0x9df   :  { %v3915_v46 = vpop.f32.mrb[110].mxu1 }
 0x9e0   :  { %v3974_v63 = vadd.f32 %v3973_v3, %v3913_v38  ;;  %v3916_v53 = vadd.f32 %v7671_v0, %v3915_v46  ;;  %v3917_v55 = vpop.f32.mrb[111].mxu1 }
 0x9e2   :  { %v3975_v7 = vadd.f32 %v3974_v63, %v3916_v53 }
 0x9e5   :  { %v3920_v32 = vpop.f32.mrb[112].mxu1 }
 0x9e6   :  { %v3921_v40 = vadd.f32 %v7671_v0, %v3920_v32  ;;  %v3922_v14 = vpop.f32.mrb[113].mxu1 }
 0x9e7   :  { %v3923_v62 = vpop.f32.mrb[114].mxu1  ;;  %v5821_v14 = vld [vmem:[#allocation23 + $0x8] sm:$0xff]  }
 0x9e8   :  { %v3976_v47 = vadd.f32 %v3975_v7, %v3921_v40  ;;  %v3924_v16 = vadd.f32 %v7671_v0, %v3923_v62  ;;  %v3925_v23 = vpop.f32.mrb[115].mxu1  ;;  %v5820_v7 = vld [vmem:[#allocation23] sm:$0xff]  }
 0x9e9   :  { %5445 = vmatprep.subr.bf16.mxu0 %v5820_v7 }
 0x9ea   :  { %v3977_v52 = vadd.f32 %v3976_v47, %v3924_v16  ;;  %5446 = vmatpush3.bf16.msra.mxu0 %v5820_v7  ;;  %v5822_v47 = vld [vmem:[#allocation23 + $0x10] sm:$0xff]  }
 0x9eb   :  { %5447 = vmatprep.subr.bf16.mxu0 %v5821_v14 }
 0x9ed   :  { %v3928_v60 = vpop.f32.mrb[116].mxu1 }
 0x9ee   :  { %v3929_v41 = vadd.f32 %v7671_v0, %v3928_v60  ;;  %v3930_v13 = vpop.f32.mrb[117].mxu1  ;;  %5448 = vmatpush3.bf16.msra.mxu0 %v5821_v14 }
 0x9ef   :  { %v3931_v28 = vpop.f32.mrb[118].mxu1  ;;  %5449 = vmatprep.subr.bf16.mxu0 %v5822_v47 }
 0x9f0   :  { %v3978_v25 = vadd.f32 %v3977_v52, %v3929_v41  ;;  %v3932_v51 = vadd.f32 %v7671_v0, %v3931_v28  ;;  %v3933_v30 = vpop.f32.mrb[119].mxu1 }
 0x9f2   :  { %v3979_v37 = vadd.f32 %v3978_v25, %v3932_v51  ;;  %5450 = vmatpush3.bf16.msra.mxu0 %v5822_v47 }
 0x9f5   :  { %v3936_v20 = vpop.f32.mrb[120].mxu1 }
 0x9f6   :  { %v3937_v36 = vadd.f32 %v7671_v0, %v3936_v20  ;;  %v3938_v2 = vpop.f32.mrb[121].mxu1 }
 0x9f7   :  { %v3939_v39 = vpop.f32.mrb[122].mxu1 }
 0x9f8   :  { %v3980_v49 = vadd.f32 %v3979_v37, %v3937_v36  ;;  %v3940_v22 = vadd.f32 %v7671_v0, %v3939_v39  ;;  %v3941_v3 = vpop.f32.mrb[123].mxu1  ;;  %v5823_v0 = vld [vmem:[#allocation23 + $0x18] sm:$0xff]  }
 0x9f9   :  { %5451 = vmatprep.subr.bf16.mxu0 %v5823_v0 }
 0x9fa   :  { %v3981_v27 = vadd.f32 %v3980_v49, %v3940_v22  ;;  %5452 = vmatpush3.bf16.msra.mxu0 %v5823_v0  ;;  %v5827_v49 = vld [vmem:[#allocation23 + $0x38] sm:$0xff]  }
 0x9fc   :  { %v3982_v48 = vrot.slane %v3981_v27, 4 }
 0x9fe   :  { %v3983_v46 = vadd.f32 %v3982_v48, %v3981_v27 }
 0xa00   :  { %v3984_v63 = vrot.slane %v3983_v46, 2 }
 0xa02   :  { %v3985_v55 = vadd.f32 %v3984_v63, %v3983_v46 }
 0xa04   :  { %v3986_v32 = vrot.slane %v3985_v55, 1 }
 0xa06   :  { %v3987_v62 = vadd.f32 %v3986_v32, %v3985_v55 }
 0xa08   :  { %v7800_v23 = vmul.f32 0.003125, %v3987_v62 }
 0xa0a   :  { %v7803_v52 = vsub.f32 %v3900_v12, %v7800_v23  ;;  %v7806_v60 = vsub.f32 %v3905_v15, %v7800_v23  ;;  %v7809_v13 = vsub.f32 %v3908_v24, %v7800_v23  ;;  %v7812_v28 = vsub.f32 %v3913_v38, %v7800_v23 }
 0xa0b   :  { %v7815_v25 = vsub.f32 %v3916_v53, %v7800_v23  ;;  %v7818_v30 = vsub.f32 %v3921_v40, %v7800_v23  ;;  %v7821_v37 = vsub.f32 %v3924_v16, %v7800_v23  ;;  %v7824_v12 = vsub.f32 %v3929_v41, %v7800_v23  ;;  %v5824_v53 = vld [vmem:[#allocation23 + $0x20] sm:$0xff]   ;;  %v5825_v41 = vld [vmem:[#allocation23 + $0x28] sm:$0xff]  }
 0xa0c   :  { %v7827_v15 = vsub.f32 %v3932_v51, %v7800_v23  ;;  %v7830_v24 = vsub.f32 %v3937_v36, %v7800_v23  ;;  %v7833_v38 = vsub.f32 %v3940_v22, %v7800_v23  ;;  %5453 = vmatprep.subr.bf16.mxu0 %v5824_v53  ;;  %v7837_v40 = vsub.f32 %v7677_v6, %v7800_v23  ;;  %v5826_v6 = vld [vmem:[#allocation23 + $0x30] sm:$0xff]  }
 0xa0d   :  { %v7841_v16 = vsub.f32 %v7674_v21, %v7800_v23  ;;  %5454 = vmatpush3.bf16.msra.mxu0 %v5824_v53  ;;  %v7845_v51 = vsub.f32 %v7680_v5, %v7800_v23  ;;  %v7853_v2 = vsub.f32 %v7686_v56, %v7800_v23  ;;  %v7857_v21 = vsub.f32 %v7689_v33, %v7800_v23 }
 0xa0e   :  { %5455 = vmatprep.subr.bf16.mxu0 %v5825_v41  ;;  %v4030_v20 = vmul.f32 %v7837_v40, %v7837_v40  ;;  %v7863_v22 = vsub.f32 %v7694_v8, %v7800_v23  ;;  %v7869_v27 = vsub.f32 %v7697_v26, %v7800_v23  ;;  %v7875_v46 = vsub.f32 %v7702_v54, %v7800_v23 }
 0xa0f   :  { %v4031_v36 = vmul.f32 %v7841_v16, %v7841_v16  ;;  %v4032_v5 = vmul.f32 %v7845_v51, %v7845_v51  ;;  %v4033_v3 = vmul.f32 %v7853_v2, %v7853_v2  ;;  %v4034_v33 = vmul.f32 %v7857_v21, %v7857_v21 }
 0xa10   :  { %v4035_v8 = vmul.f32 %v7863_v22, %v7863_v22  ;;  %v7881_v55 = vsub.f32 %v7705_v31, %v7800_v23  ;;  %v4036_v26 = vmul.f32 %v7869_v27, %v7869_v27  ;;  %v7887_v32 = vsub.f32 %v7710_v44, %v7800_v23 }
 0xa11   :  { %5456 = vmatpush3.bf16.msra.mxu0 %v5825_v41  ;;  %v4070_v39 = vadd.f32 %v4031_v36, %v4030_v20  ;;  %v4037_v54 = vmul.f32 %v7875_v46, %v7875_v46  ;;  %v7893_v62 = vsub.f32 %v7713_v18, %v7800_v23  ;;  %v7899_v0 = vsub.f32 %v7718_v4, %v7800_v23 }
 0xa12   :  { %5457 = vmatprep.subr.bf16.mxu0 %v5826_v6  ;;  %v4038_v31 = vmul.f32 %v7881_v55, %v7881_v55  ;;  %v4039_v44 = vmul.f32 %v7887_v32, %v7887_v32  ;;  %v7905_v41 = vsub.f32 %v7721_v34, %v7800_v23  ;;  %v7911_v36 = vsub.f32 %v7726_v10, %v7800_v23 }
 0xa13   :  { %v4071_v56 = vadd.f32 %v4070_v39, %v4032_v5  ;;  %v4040_v18 = vmul.f32 %v7893_v62, %v7893_v62  ;;  %v4041_v4 = vmul.f32 %v7899_v0, %v7899_v0  ;;  %v7917_v5 = vsub.f32 %v7729_v9, %v7800_v23 }
 0xa14   :  { %v4042_v34 = vmul.f32 %v7905_v41, %v7905_v41  ;;  %v4043_v10 = vmul.f32 %v7911_v36, %v7911_v36 }
 0xa15   :  { %5458 = vmatpush3.bf16.msra.mxu0 %v5826_v6  ;;  %v4072_v48 = vadd.f32 %v4071_v56, %v4033_v3  ;;  %v7929_v56 = vsub.f32 %v7737_v50, %v7800_v23  ;;  %v4044_v9 = vmul.f32 %v7917_v5, %v7917_v5 }
 0xa16   :  { %5459 = vmatprep.subr.bf16.mxu0 %v5827_v49 }
 0xa17   :  { %v4073_v63 = vadd.f32 %v4072_v48, %v4034_v33  ;;  %v7935_v48 = vsub.f32 %v7742_v59, %v7800_v23  ;;  %v4046_v50 = vmul.f32 %v7929_v56, %v7929_v56 }
 0xa19   :  { %5460 = vmatpush3.bf16.msra.mxu0 %v5827_v49  ;;  %v4074_v7 = vadd.f32 %v4073_v63, %v4035_v8  ;;  %v7923_v49 = vsub.f32 %v7734_v17, %v7800_v23  ;;  %v7941_v63 = vsub.f32 %v7745_v1, %v7800_v23  ;;  %v4047_v59 = vmul.f32 %v7935_v48, %v7935_v48 }
 0xa1b   :  { %v4075_v14 = vadd.f32 %v4074_v7, %v4036_v26  ;;  %v4045_v17 = vmul.f32 %v7923_v49, %v7923_v49  ;;  %v7947_v7 = vsub.f32 %v7750_v58, %v7800_v23  ;;  %v4048_v1 = vmul.f32 %v7941_v63, %v7941_v63 }
 0xa1d   :  { %v4076_v47 = vadd.f32 %v4075_v14, %v4037_v54  ;;  %v7953_v14 = vsub.f32 %v7753_v11, %v7800_v23  ;;  %v4049_v58 = vmul.f32 %v7947_v7, %v7947_v7 }
 0xa1f   :  { %v4077_v53 = vadd.f32 %v4076_v47, %v4038_v31  ;;  %v7959_v47 = vsub.f32 %v7758_v29, %v7800_v23  ;;  %v4050_v11 = vmul.f32 %v7953_v14, %v7953_v14 }
 0xa21   :  { %v4078_v20 = vadd.f32 %v4077_v53, %v4039_v44  ;;  %v7965_v53 = vsub.f32 %v7761_v61, %v7800_v23  ;;  %v4051_v29 = vmul.f32 %v7959_v47, %v7959_v47 }
 0xa23   :  { %v4079_v6 = vadd.f32 %v4078_v20, %v4040_v18  ;;  %v7971_v20 = vsub.f32 %v7766_v45, %v7800_v23  ;;  %v4052_v61 = vmul.f32 %v7965_v53, %v7965_v53 }
 0xa25   :  { %v4080_v39 = vadd.f32 %v4079_v6, %v4041_v4  ;;  %v7977_v6 = vsub.f32 %v7769_v42, %v7800_v23  ;;  %v4053_v45 = vmul.f32 %v7971_v20, %v7971_v20 }
 0xa27   :  { %v4081_v3 = vadd.f32 %v4080_v39, %v4042_v34  ;;  %v7983_v39 = vsub.f32 %v7774_v19, %v7800_v23  ;;  %v4054_v42 = vmul.f32 %v7977_v6, %v7977_v6 }
 0xa29   :  { %v4082_v33 = vadd.f32 %v4081_v3, %v4043_v10  ;;  %v7989_v3 = vsub.f32 %v7777_v57, %v7800_v23  ;;  %v4055_v19 = vmul.f32 %v7983_v39, %v7983_v39 }
 0xa2b   :  { %v4083_v8 = vadd.f32 %v4082_v33, %v4044_v9  ;;  %v7995_v33 = vsub.f32 %v7782_v35, %v7800_v23  ;;  %v4056_v57 = vmul.f32 %v7989_v3, %v7989_v3 }
 0xa2d   :  { %v4084_v26 = vadd.f32 %v4083_v8, %v4045_v17  ;;  %v8001_v8 = vsub.f32 %v7785_v43, %v7800_v23  ;;  %v4060_v43 = vmul.f32 %v7806_v60, %v7806_v60 }
 0xa2f   :  { %v4085_v54 = vadd.f32 %v4084_v26, %v4046_v50  ;;  %v4057_v26 = vmul.f32 %v7995_v33, %v7995_v33  ;;  %v4058_v35 = vmul.f32 %v8001_v8, %v8001_v8 }
 0xa31   :  { %v4086_v31 = vadd.f32 %v4085_v54, %v4047_v59 }
 0xa33   :  { %v4087_v44 = vadd.f32 %v4086_v31, %v4048_v1  ;;  %v4059_v1 = vmul.f32 %v7803_v52, %v7803_v52 }
 0xa35   :  { %v4088_v18 = vadd.f32 %v4087_v44, %v4049_v58  ;;  %v4061_v58 = vmul.f32 %v7809_v13, %v7809_v13 }
 0xa37   :  { %v4089_v4 = vadd.f32 %v4088_v18, %v4050_v11  ;;  %v4062_v11 = vmul.f32 %v7812_v28, %v7812_v28 }
 0xa39   :  { %v4090_v34 = vadd.f32 %v4089_v4, %v4051_v29  ;;  %v4063_v29 = vmul.f32 %v7815_v25, %v7815_v25 }
 0xa3b   :  { %v4091_v10 = vadd.f32 %v4090_v34, %v4052_v61  ;;  %v4064_v61 = vmul.f32 %v7818_v30, %v7818_v30 }
 0xa3d   :  { %v4092_v9 = vadd.f32 %v4091_v10, %v4053_v45  ;;  %v4065_v45 = vmul.f32 %v7821_v37, %v7821_v37 }
 0xa3f   :  { %v4093_v17 = vadd.f32 %v4092_v9, %v4054_v42  ;;  %v4066_v42 = vmul.f32 %v7824_v12, %v7824_v12 }
 0xa41   :  { %v4094_v50 = vadd.f32 %v4093_v17, %v4055_v19  ;;  %v4067_v19 = vmul.f32 %v7827_v15, %v7827_v15 }
 0xa43   :  { %v4095_v59 = vadd.f32 %v4094_v50, %v4056_v57  ;;  %v4068_v57 = vmul.f32 %v7830_v24, %v7830_v24 }
 0xa45   :  { %v4096_v54 = vadd.f32 %v4095_v59, %v4057_v26  ;;  %v4069_v26 = vmul.f32 %v7833_v38, %v7833_v38 }
 0xa47   :  { %v4097_v31 = vadd.f32 %v4096_v54, %v4058_v35 }
 0xa49   :  { %v4098_v23 = vadd.f32 %v4097_v31, %v4059_v1  ;;  %v8031_v31 = vld [vmem:[#allocation26] sm:$0xff]  }
 0xa4a   :  { %5501 = vmatprep.subr.bf16.mxu0 %v8031_v31 }
 0xa4b   :  { %v4099_v44 = vadd.f32 %v4098_v23, %v4060_v43 }
 0xa4d   :  { %v4100_v18 = vadd.f32 %v4099_v44, %v4061_v58 }
 0xa4f   :  { %v4101_v4 = vadd.f32 %v4100_v18, %v4062_v11 }
 0xa51   :  { %v4102_v34 = vadd.f32 %v4101_v4, %v4063_v29  ;;  %v8036_v4 = vld [vmem:[#allocation20] ss:$0 sm:$0xff] }
 0xa53   :  { %v4103_v10 = vadd.f32 %v4102_v34, %v4064_v61 }
 0xa55   :  { %v4104_v9 = vadd.f32 %v4103_v10, %v4065_v45  ;;  %v8042_v45 = vld [vmem:[#allocation22] ss:$0 sm:$0xff] }
 0xa57   :  { %v4105_v17 = vadd.f32 %v4104_v9, %v4066_v42 }
 0xa59   :  { %v4106_v50 = vadd.f32 %v4105_v17, %v4067_v19 }
 0xa5b   :  { %v4107_v59 = vadd.f32 %v4106_v50, %v4068_v57 }
 0xa5d   :  { %v4108_v35 = vadd.f32 %v4107_v59, %v4069_v26 }
 0xa5f   :  { %v4109_v54 = vrot.slane %v4108_v35, 4 }
 0xa61   :  { %v4110_v1 = vadd.f32 %v4109_v54, %v4108_v35 }
 0xa63   :  { %v4111_v43 = vrot.slane %v4110_v1, 2 }
 0xa65   :  { %v4112_v23 = vadd.f32 %v4111_v43, %v4110_v1 }
 0xa67   :  { %v4113_v58 = vrot.slane %v4112_v23, 1 }
 0xa69   :  { %v4114_v44 = vadd.f32 %v4113_v58, %v4112_v23 }
 0xa6b   :  { %v4115_v11 = vmul.f32 0.003125, %v4114_v44 }
 0xa6d   :  { %v4116_v18 = vadd.f32 1e-05, %v4115_v11 }
 0xa6f   :  { %5836 = vrsqrt.f32 %v4116_v18 }
 0xa79   :  { %v8034_v29 = vpop.eup %5836 }
 0xa7a   :  { %v4156_v61 = vmul.f32 %v8034_v29, %v7830_v24  ;;  %v4157_v34 = vmul.f32 %v8034_v29, %v7833_v38  ;;  %v4120_v24 = vmul.f32 %v8034_v29, %v7845_v51  ;;  %v4152_v38 = vmul.f32 %v8034_v29, %v7818_v30 }
 0xa7b   :  { %v4121_v57 = vmul.f32 %v8034_v29, %v7853_v2  ;;  %v4153_v50 = vmul.f32 %v8034_v29, %v7821_v37  ;;  %v4154_v26 = vmul.f32 %v8034_v29, %v7824_v12  ;;  %v4155_v59 = vmul.f32 %v8034_v29, %v7827_v15 }
 0xa7c   :  { %v4203_v10 = vmul.f32 %v8036_v4, %v4156_v61  ;;  %v4204_v42 = vmul.f32 %v8036_v4, %v4157_v34  ;;  %v4118_v35 = vmul.f32 %v8034_v29, %v7837_v40  ;;  %v4119_v51 = vmul.f32 %v8034_v29, %v7841_v16 }
 0xa7d   :  { %v4122_v30 = vmul.f32 %v8034_v29, %v7857_v21  ;;  %v4123_v2 = vmul.f32 %v8034_v29, %v7863_v22  ;;  %v4167_v37 = vmul.f32 %v8036_v4, %v4120_v24  ;;  %v4199_v54 = vmul.f32 %v8036_v4, %v4152_v38 }
 0xa7e   :  { %v8047_v9 = vadd.f32 %v8042_v45, %v4203_v10  ;;  %v8050_v19 = vadd.f32 %v8042_v45, %v4204_v42  ;;  %v4168_v12 = vmul.f32 %v8036_v4, %v4121_v57  ;;  %v4200_v15 = vmul.f32 %v8036_v4, %v4153_v50 }
 0xa7f   :  { %v4201_v1 = vmul.f32 %v8036_v4, %v4154_v26  ;;  %v4202_v40 = vmul.f32 %v8036_v4, %v4155_v59  ;;  %v4165_v16 = vmul.f32 %v8036_v4, %v4118_v35  ;;  %v4166_v43 = vmul.f32 %v8036_v4, %v4119_v51  ;;  %v5829_v51 = vld [vmem:[#allocation26 + $0x8] sm:$0xff]  }
 0xa80   :  { %v4271_v17 = vpack.c.bf16 %v8050_v19, %v8047_v9  ;;  %v4169_v21 = vmul.f32 %v8036_v4, %v4122_v30  ;;  %v4170_v22 = vmul.f32 %v8036_v4, %v4123_v2  ;;  %v4214_v23 = vadd.f32 %v8042_v45, %v4167_v37 }
 0xa81   :  { %v4215_v58 = vadd.f32 %v8042_v45, %v4168_v12  ;;  %v8087_v44 = vadd.f32 %v8042_v45, %v4199_v54  ;;  %v8090_v11 = vadd.f32 %v8042_v45, %v4200_v15  ;;  %v4124_v18 = vmul.f32 %v8034_v29, %v7869_v27 }
 0xa82   :  { %v4125_v61 = vmul.f32 %v8034_v29, %v7875_v46  ;;  %v4126_v34 = vmul.f32 %v8034_v29, %v7881_v55  ;;  %v4127_v10 = vmul.f32 %v8034_v29, %v7887_v32  ;;  %v4212_v24 = vadd.f32 %v8042_v45, %v4165_v16 }
 0xa83   :  { %v4269_v42 = vpack.c.bf16 %v8090_v11, %v8087_v44  ;;  %v4213_v38 = vadd.f32 %v8042_v45, %v4166_v43  ;;  %v4253_v57 = vpack.c.bf16 %v4215_v58, %v4214_v23  ;;  %v4216_v50 = vadd.f32 %v8042_v45, %v4169_v21  ;;  %v5831_v58 = vld [vmem:[#allocation26 + $0x18] sm:$0xff]  }
 0xa84   :  { %v4217_v27 = vadd.f32 %v8042_v45, %v4170_v22  ;;  %v4171_v46 = vmul.f32 %v8036_v4, %v4124_v18  ;;  %v4172_v55 = vmul.f32 %v8036_v4, %v4125_v61  ;;  %v4173_v59 = vmul.f32 %v8036_v4, %v4126_v34 }
 0xa85   :  { %v4252_v26 = vpack.c.bf16 %v4213_v38, %v4212_v24  ;;  %v4174_v32 = vmul.f32 %v8036_v4, %v4127_v10  ;;  %v4128_v30 = vmul.f32 %v8034_v29, %v7893_v62  ;;  %v8113_v2 = vadd.f32 %v8042_v45, %v4201_v1 }
 0xa86   :  { %v4254_v35 = vpack.c.bf16 %v4217_v27, %v4216_v50  ;;  %v4129_v37 = vmul.f32 %v8034_v29, %v7899_v0  ;;  %v4218_v54 = vadd.f32 %v8042_v45, %v4171_v46  ;;  %v4219_v12 = vadd.f32 %v8042_v45, %v4172_v55  ;;  %v5830_v0 = vld [vmem:[#allocation26 + $0x10] sm:$0xff]  }
 0xa87   :  { %5461 = vmatprep.mubr.bf16.mxu0 %v4252_v26  ;;  %v8120_v15 = vadd.f32 %v8042_v45, %v4202_v40  ;;  %v4130_v16 = vmul.f32 %v8034_v29, %v7905_v41  ;;  %v4131_v62 = vmul.f32 %v8034_v29, %v7911_v36  ;;  %v4220_v1 = vadd.f32 %v8042_v45, %v4173_v59  ;;  %v5833_v59 = vld [vmem:[#allocation26 + $0x28] sm:$0xff]  }
 0xa88   :  { %5462 = vmatmul.mubr.bf16.vlgmr.msra.gmra.mrb[44].mxu0 %v4253_v57  ;;  %v4221_v43 = vadd.f32 %v8042_v45, %v4174_v32  ;;  %v4175_v40 = vmul.f32 %v8036_v4, %v4128_v30  ;;  %v4176_v22 = vmul.f32 %v8036_v4, %v4129_v37  ;;  %v4132_v18 = vmul.f32 %v8034_v29, %v7917_v5  ;;  %v5832_v5 = vld [vmem:[#allocation26 + $0x20] sm:$0xff]  }
 0xa89   :  { %5465 = vmatprep.mubr.bf16.mxu0 %v4254_v35  ;;  %5502 = vmatpush3.bf16.msra.mxu0 %v8031_v31  ;;  %v4270_v21 = vpack.c.bf16 %v8120_v15, %v8113_v2  ;;  %v4255_v31 = vpack.c.bf16 %v4219_v12, %v4218_v54  ;;  %v4177_v41 = vmul.f32 %v8036_v4, %v4130_v16 }
 0xa8a   :  { %5503 = vmatprep.subr.bf16.mxu0 %v5829_v51  ;;  %v4178_v23 = vmul.f32 %v8036_v4, %v4131_v62  ;;  %v4256_v36 = vpack.c.bf16 %v4221_v43, %v4220_v1  ;;  %v4133_v61 = vmul.f32 %v8034_v29, %v7923_v49  ;;  %v4222_v34 = vadd.f32 %v8042_v45, %v4175_v40 }
 0xa8b   :  { %v4223_v10 = vadd.f32 %v8042_v45, %v4176_v22  ;;  %v4134_v24 = vmul.f32 %v8034_v29, %v7929_v56  ;;  %v4135_v38 = vmul.f32 %v8034_v29, %v7935_v48  ;;  %v4224_v57 = vadd.f32 %v8042_v45, %v4177_v41 }
 0xa8c   :  { %v4225_v50 = vadd.f32 %v8042_v45, %v4178_v23  ;;  %v4179_v27 = vmul.f32 %v8036_v4, %v4132_v18  ;;  %v4180_v49 = vmul.f32 %v8036_v4, %v4133_v61  ;;  %v4136_v48 = vmul.f32 %v8034_v29, %v7941_v63 }
 0xa8d   :  { %5504 = vmatpush3.bf16.msra.mxu0 %v5829_v51  ;;  %v4257_v26 = vpack.c.bf16 %v4223_v10, %v4222_v34  ;;  %v4181_v46 = vmul.f32 %v8036_v4, %v4134_v24  ;;  %v4182_v55 = vmul.f32 %v8036_v4, %v4135_v38  ;;  %v4137_v32 = vmul.f32 %v8034_v29, %v7947_v7 }
 0xa8e   :  { %5505 = vmatprep.subr.bf16.mxu0 %v5830_v0  ;;  %v4258_v56 = vpack.c.bf16 %v4225_v50, %v4224_v57  ;;  %v4226_v35 = vadd.f32 %v8042_v45, %v4179_v27  ;;  %v4227_v51 = vadd.f32 %v8042_v45, %v4180_v49  ;;  %v4138_v30 = vmul.f32 %v8034_v29, %v7953_v14 }
 0xa8f   :  { %v4139_v37 = vmul.f32 %v8034_v29, %v7959_v47  ;;  %v4228_v54 = vadd.f32 %v8042_v45, %v4181_v46  ;;  %v4229_v12 = vadd.f32 %v8042_v45, %v4182_v55  ;;  %v4183_v63 = vmul.f32 %v8036_v4, %v4136_v48 }
 0xa90   :  { %5466 = vmatmul.mubr.bf16.gmra.mrb[48].mxu0 %v4255_v31  ;;  %v4184_v7 = vmul.f32 %v8036_v4, %v4137_v32  ;;  %v4259_v16 = vpack.c.bf16 %v4227_v51, %v4226_v35  ;;  %v4185_v62 = vmul.f32 %v8036_v4, %v4138_v30  ;;  %v4140_v14 = vmul.f32 %v8034_v29, %v7965_v53 }
 0xa91   :  { %5469 = vmatprep.mubr.bf16.mxu0 %v4256_v36  ;;  %5506 = vmatpush3.bf16.msra.mxu0 %v5830_v0  ;;  %v4186_v1 = vmul.f32 %v8036_v4, %v4139_v37  ;;  %v4260_v43 = vpack.c.bf16 %v4229_v12, %v4228_v54  ;;  %v4141_v47 = vmul.f32 %v8034_v29, %v7971_v20 }
 0xa92   :  { %5507 = vmatprep.subr.bf16.mxu0 %v5831_v58  ;;  %v4230_v0 = vadd.f32 %v8042_v45, %v4183_v63  ;;  %v4231_v40 = vadd.f32 %v8042_v45, %v4184_v7  ;;  %v4142_v22 = vmul.f32 %v8034_v29, %v7977_v6  ;;  %v4143_v31 = vmul.f32 %v8034_v29, %v7983_v39  ;;  %v5835_v7 = vld [vmem:[#allocation26 + $0x38] sm:$0xff]  }
 0xa93   :  { %v4232_v41 = vadd.f32 %v8042_v45, %v4185_v62  ;;  %v4233_v23 = vadd.f32 %v8042_v45, %v4186_v1  ;;  %v4187_v36 = vmul.f32 %v8036_v4, %v4140_v14  ;;  %v4188_v53 = vmul.f32 %v8036_v4, %v4141_v47 }
 0xa94   :  { %v4189_v20 = vmul.f32 %v8036_v4, %v4142_v22  ;;  %v4190_v18 = vmul.f32 %v8036_v4, %v4143_v31  ;;  %v4144_v6 = vmul.f32 %v8034_v29, %v7989_v3  ;;  %v4145_v39 = vmul.f32 %v8034_v29, %v7995_v33 }
 0xa95   :  { %5508 = vmatpush3.bf16.msra.mxu0 %v5831_v58  ;;  %v4261_v58 = vpack.c.bf16 %v4231_v40, %v4230_v0  ;;  %v4262_v61 = vpack.c.bf16 %v4233_v23, %v4232_v41  ;;  %v4234_v34 = vadd.f32 %v8042_v45, %v4187_v36  ;;  %v4235_v10 = vadd.f32 %v8042_v45, %v4188_v53 }
 0xa96   :  { %5509 = vmatprep.subr.bf16.mxu0 %v5832_v5  ;;  %v4146_v24 = vmul.f32 %v8034_v29, %v8001_v8  ;;  %v4147_v38 = vmul.f32 %v8034_v29, %v7803_v52  ;;  %v4236_v57 = vadd.f32 %v8042_v45, %v4189_v20  ;;  %v4237_v50 = vadd.f32 %v8042_v45, %v4190_v18 }
 0xa97   :  { %v4192_v3 = vmul.f32 %v8036_v4, %v4145_v39  ;;  %v4263_v27 = vpack.c.bf16 %v4235_v10, %v4234_v34  ;;  %v4148_v8 = vmul.f32 %v8034_v29, %v7806_v60  ;;  %v4149_v52 = vmul.f32 %v8034_v29, %v7809_v13 }
 0xa98   :  { %5470 = vmatmul.mubr.bf16.gmra.mrb[52].mxu0 %v4257_v26  ;;  %v4193_v33 = vmul.f32 %v8036_v4, %v4146_v24  ;;  %v4194_v49 = vmul.f32 %v8036_v4, %v4147_v38  ;;  %v4264_v26 = vpack.c.bf16 %v4237_v50, %v4236_v57 }
 0xa99   :  { %5473 = vmatprep.mubr.bf16.mxu0 %v4258_v56  ;;  %5510 = vmatpush3.bf16.msra.mxu0 %v5832_v5  ;;  %v4191_v5 = vmul.f32 %v8036_v4, %v4144_v6  ;;  %v4239_v55 = vadd.f32 %v8042_v45, %v4192_v3  ;;  %v4150_v56 = vmul.f32 %v8034_v29, %v7812_v28 }
 0xa9a   :  { %5511 = vmatprep.subr.bf16.mxu0 %v5833_v59  ;;  %v4240_v48 = vadd.f32 %v8042_v45, %v4193_v33  ;;  %v4241_v32 = vadd.f32 %v8042_v45, %v4194_v49  ;;  %v4195_v35 = vmul.f32 %v8036_v4, %v4148_v8  ;;  %v4196_v60 = vmul.f32 %v8036_v4, %v4149_v52 }
 0xa9b   :  { %v4238_v46 = vadd.f32 %v8042_v45, %v4191_v5  ;;  %v4197_v13 = vmul.f32 %v8036_v4, %v4150_v56 }
 0xa9c   :  { %v4266_v37 = vpack.c.bf16 %v4241_v32, %v4240_v48  ;;  %v4242_v28 = vadd.f32 %v8042_v45, %v4195_v35 }
 0xa9d   :  { %5512 = vmatpush3.bf16.msra.mxu0 %v5833_v59  ;;  %v4151_v59 = vmul.f32 %v8034_v29, %v7815_v25  ;;  %v4265_v51 = vpack.c.bf16 %v4239_v55, %v4238_v46  ;;  %v4243_v25 = vadd.f32 %v8042_v45, %v4196_v60  ;;  %v4244_v29 = vadd.f32 %v8042_v45, %v4197_v13 }
 0xa9f   :  { %v4198_v30 = vmul.f32 %v8036_v4, %v4151_v59  ;;  %v4267_v12 = vpack.c.bf16 %v4243_v25, %v4242_v28  ;;  %v5834_v4 = vld [vmem:[#allocation26 + $0x30] sm:$0xff]  }
 0xaa0   :  { %5474 = vmatmul.mubr.bf16.gmra.mrb[56].mxu0 %v4259_v16  ;;  %5513 = vmatprep.subr.bf16.mxu0 %v5834_v4 }
 0xaa1   :  { %5477 = vmatprep.mubr.bf16.mxu0 %v4260_v43  ;;  %v4245_v54 = vadd.f32 %v8042_v45, %v4198_v30  ;;  %5514 = vmatpush3.bf16.msra.mxu0 %v5834_v4  ;;  %v8228_v45 = vld [vmem:[#allocation25] ss:$0 sm:$0xff] }
 0xaa2   :  { %5515 = vmatprep.subr.bf16.mxu0 %v5835_v7 }
 0xaa3   :  { %v4268_v63 = vpack.c.bf16 %v4245_v54, %v4244_v29 }
 0xaa5   :  { %5516 = vmatpush3.bf16.msra.mxu0 %v5835_v7 }
 0xaa8   :  { %5478 = vmatmul.mubr.bf16.gmra.mrb[60].mxu0 %v4261_v58 }
 0xaa9   :  { %5481 = vmatprep.mubr.bf16.mxu0 %v4262_v61 }
 0xab0   :  { %5482 = vmatmul.mubr.bf16.gmra.mrb[64].mxu0 %v4263_v27 }
 0xab1   :  { %5485 = vmatprep.mubr.bf16.mxu0 %v4264_v26 }
 0xab8   :  { %5486 = vmatmul.mubr.bf16.gmra.mrb[68].mxu0 %v4265_v51 }
 0xab9   :  { %5489 = vmatprep.mubr.bf16.mxu0 %v4266_v37 }
 0xac0   :  { %5490 = vmatmul.mubr.bf16.gmra.mrb[72].mxu0 %v4267_v12 }
 0xac1   :  { %5493 = vmatprep.mubr.bf16.mxu0 %v4268_v63 }
 0xac8   :  { %5494 = vmatmul.mubr.bf16.gmra.mrb[76].mxu0 %v4269_v42 }
 0xac9   :  { %5497 = vmatprep.mubr.bf16.mxu0 %v4270_v21 }
 0xad0   :  { %5498 = vmatmul.mubr.bf16.gmra.mrb[80].mxu0 %v4271_v17 }
 0xb5b   :  { %v5463_v16 = vpop.f32.mrb[44].mxu0 }
 0xb5c   :  { %v4386_v44 = vadd.f32 %v5463_v16, %v8228_v45  ;;  %v4377_v11 = vpop.f32.mrb[45].mxu0 }
 0xb5d   :  { %v4378_v42 = vadd.f32 %v8228_v45, %v4377_v11  ;;  %v5464_v2 = vpop.f32.mrb[46].mxu0 }
 0xb5e   :  { %v4389_v15 = vadd.f32 %v5464_v2, %v8228_v45  ;;  %v4380_v21 = vpop.f32.mrb[47].mxu0  ;;  %v4538_v19 = vmax.f32 %v4386_v44, 0.0 }
 0xb5f   :  { %v4381_v9 = vadd.f32 %v8228_v45, %v4380_v21  ;;  %v4536_v62 = vmax.f32 %v4378_v42, 0.0 }
 0xb60   :  { %v4539_v17 = vmax.f32 %v4389_v15, 0.0 }
 0xb61   :  { %v4537_v1 = vmax.f32 %v4381_v9, 0.0 }
 0xb62   :  { %v4577_v43 = vpack.c.bf16 %v4539_v17, %v4538_v19 }
 0xb63   :  { %v4576_v14 = vpack.c.bf16 %v4537_v1, %v4536_v62  ;;  %v5467_v47 = vpop.f32.mrb[48].mxu0 }
 0xb64   :  { %v4402_v0 = vadd.f32 %v5467_v47, %v8228_v45  ;;  %v4393_v40 = vpop.f32.mrb[49].mxu0 }
 0xb65   :  { %v4394_v22 = vadd.f32 %v8228_v45, %v4393_v40  ;;  %v5468_v31 = vpop.f32.mrb[50].mxu0  ;;  %5517 = vmatprep.mubr.bf16.mxu0 %v4576_v14 }
 0xb66   :  { %v4405_v41 = vadd.f32 %v5468_v31, %v8228_v45  ;;  %v4396_v23 = vpop.f32.mrb[51].mxu0  ;;  %5518 = vmatmul.mubr.bf16.vlgmr.msra.gmra.mrb[84].mxu0 %v4577_v43  ;;  %v4542_v53 = vmax.f32 %v4402_v0, 0.0 }
 0xb67   :  { %v4397_v36 = vadd.f32 %v8228_v45, %v4396_v23  ;;  %v4540_v20 = vmax.f32 %v4394_v22, 0.0 }
 0xb68   :  { %v4543_v58 = vmax.f32 %v4405_v41, 0.0 }
 0xb69   :  { %v4541_v18 = vmax.f32 %v4397_v36, 0.0 }
 0xb6a   :  { %v4579_v61 = vpack.c.bf16 %v4543_v58, %v4542_v53 }
 0xb6b   :  { %v4578_v6 = vpack.c.bf16 %v4541_v18, %v4540_v20  ;;  %v5471_v39 = vpop.f32.mrb[52].mxu0 }
 0xb6c   :  { %v4418_v34 = vadd.f32 %v5471_v39, %v8228_v45  ;;  %v4409_v10 = vpop.f32.mrb[53].mxu0 }
 0xb6d   :  { %v4410_v24 = vadd.f32 %v8228_v45, %v4409_v10  ;;  %v5472_v38 = vpop.f32.mrb[54].mxu0  ;;  %5521 = vmatprep.mubr.bf16.mxu0 %v4578_v6 }
 0xb6e   :  { %v4421_v57 = vadd.f32 %v5472_v38, %v8228_v45  ;;  %v4412_v50 = vpop.f32.mrb[55].mxu0  ;;  %5522 = vmatmul.mubr.bf16.gmra.mrb[88].mxu0 %v4579_v61  ;;  %v4546_v3 = vmax.f32 %v4418_v34, 0.0 }
 0xb6f   :  { %v4413_v5 = vadd.f32 %v8228_v45, %v4412_v50  ;;  %v4544_v33 = vmax.f32 %v4410_v24, 0.0 }
 0xb70   :  { %v4547_v27 = vmax.f32 %v4421_v57, 0.0 }
 0xb71   :  { %v4545_v49 = vmax.f32 %v4413_v5, 0.0 }
 0xb72   :  { %v4581_v26 = vpack.c.bf16 %v4547_v27, %v4546_v3 }
 0xb73   :  { %v4580_v8 = vpack.c.bf16 %v4545_v49, %v4544_v33  ;;  %v5475_v52 = vpop.f32.mrb[56].mxu0 }
 0xb74   :  { %v4434_v46 = vadd.f32 %v5475_v52, %v8228_v45  ;;  %v4425_v55 = vpop.f32.mrb[57].mxu0 }
 0xb75   :  { %v4426_v56 = vadd.f32 %v8228_v45, %v4425_v55  ;;  %v5476_v59 = vpop.f32.mrb[58].mxu0  ;;  %5525 = vmatprep.mubr.bf16.mxu0 %v4580_v8 }
 0xb76   :  { %v4437_v48 = vadd.f32 %v5476_v59, %v8228_v45  ;;  %v4428_v32 = vpop.f32.mrb[59].mxu0  ;;  %5526 = vmatmul.mubr.bf16.gmra.mrb[92].mxu0 %v4581_v26  ;;  %v4550_v60 = vmax.f32 %v4434_v46, 0.0 }
 0xb77   :  { %v4429_v35 = vadd.f32 %v8228_v45, %v4428_v32  ;;  %v4548_v13 = vmax.f32 %v4426_v56, 0.0 }
 0xb78   :  { %v4551_v51 = vmax.f32 %v4437_v48, 0.0 }
 0xb79   :  { %v4549_v30 = vmax.f32 %v4429_v35, 0.0 }
 0xb7a   :  { %v4583_v37 = vpack.c.bf16 %v4551_v51, %v4550_v60 }
 0xb7b   :  { %v4582_v28 = vpack.c.bf16 %v4549_v30, %v4548_v13  ;;  %v5479_v25 = vpop.f32.mrb[60].mxu0 }
 0xb7c   :  { %v4450_v29 = vadd.f32 %v5479_v25, %v8228_v45  ;;  %v4441_v54 = vpop.f32.mrb[61].mxu0 }
 0xb7d   :  { %v4442_v12 = vadd.f32 %v8228_v45, %v4441_v54  ;;  %v5480_v63 = vpop.f32.mrb[62].mxu0  ;;  %5529 = vmatprep.mubr.bf16.mxu0 %v4582_v28 }
 0xb7e   :  { %v4453_v4 = vadd.f32 %v5480_v63, %v8228_v45  ;;  %v4444_v7 = vpop.f32.mrb[63].mxu0  ;;  %5530 = vmatmul.mubr.bf16.gmra.mrb[96].mxu0 %v4583_v37  ;;  %v4554_v44 = vmax.f32 %v4450_v29, 0.0 }
 0xb7f   :  { %v4445_v16 = vadd.f32 %v8228_v45, %v4444_v7  ;;  %v4552_v42 = vmax.f32 %v4442_v12, 0.0 }
 0xb80   :  { %v4555_v11 = vmax.f32 %v4453_v4, 0.0 }
 0xb81   :  { %v4553_v2 = vmax.f32 %v4445_v16, 0.0 }
 0xb82   :  { %v4585_v15 = vpack.c.bf16 %v4555_v11, %v4554_v44 }
 0xb83   :  { %v4584_v21 = vpack.c.bf16 %v4553_v2, %v4552_v42  ;;  %v5483_v9 = vpop.f32.mrb[64].mxu0 }
 0xb84   :  { %v4466_v19 = vadd.f32 %v5483_v9, %v8228_v45  ;;  %v4457_v17 = vpop.f32.mrb[65].mxu0 }
 0xb85   :  { %v4458_v62 = vadd.f32 %v8228_v45, %v4457_v17  ;;  %v5484_v1 = vpop.f32.mrb[66].mxu0  ;;  %5533 = vmatprep.mubr.bf16.mxu0 %v4584_v21 }
 0xb86   :  { %v4469_v43 = vadd.f32 %v5484_v1, %v8228_v45  ;;  %v4460_v14 = vpop.f32.mrb[67].mxu0  ;;  %5534 = vmatmul.mubr.bf16.gmra.mrb[100].mxu0 %v4585_v15  ;;  %v4558_v0 = vmax.f32 %v4466_v19, 0.0 }
 0xb87   :  { %v4461_v47 = vadd.f32 %v8228_v45, %v4460_v14  ;;  %v4556_v22 = vmax.f32 %v4458_v62, 0.0 }
 0xb88   :  { %v4559_v40 = vmax.f32 %v4469_v43, 0.0 }
 0xb89   :  { %v4557_v31 = vmax.f32 %v4461_v47, 0.0  ;;  %v8270_v47 = vld [vmem:[#allocation28] ss:$0 sm:$0xff] }
 0xb8a   :  { %v4587_v41 = vpack.c.bf16 %v4559_v40, %v4558_v0 }
 0xb8b   :  { %v4586_v23 = vpack.c.bf16 %v4557_v31, %v4556_v22  ;;  %v5487_v36 = vpop.f32.mrb[68].mxu0 }
 0xb8c   :  { %v4482_v53 = vadd.f32 %v5487_v36, %v8228_v45  ;;  %v4473_v58 = vpop.f32.mrb[69].mxu0 }
 0xb8d   :  { %v4474_v20 = vadd.f32 %v8228_v45, %v4473_v58  ;;  %v5488_v18 = vpop.f32.mrb[70].mxu0  ;;  %5537 = vmatprep.mubr.bf16.mxu0 %v4586_v23 }
 0xb8e   :  { %v4485_v61 = vadd.f32 %v5488_v18, %v8228_v45  ;;  %v4476_v6 = vpop.f32.mrb[71].mxu0  ;;  %5538 = vmatmul.mubr.bf16.gmra.mrb[104].mxu0 %v4587_v41  ;;  %v4562_v34 = vmax.f32 %v4482_v53, 0.0 }
 0xb8f   :  { %v4477_v39 = vadd.f32 %v8228_v45, %v4476_v6  ;;  %v4560_v24 = vmax.f32 %v4474_v20, 0.0 }
 0xb90   :  { %v4563_v10 = vmax.f32 %v4485_v61, 0.0 }
 0xb91   :  { %v4561_v38 = vmax.f32 %v4477_v39, 0.0 }
 0xb92   :  { %v4589_v57 = vpack.c.bf16 %v4563_v10, %v4562_v34 }
 0xb93   :  { %v4588_v50 = vpack.c.bf16 %v4561_v38, %v4560_v24  ;;  %v5491_v5 = vpop.f32.mrb[72].mxu0 }
 0xb94   :  { %v4498_v3 = vadd.f32 %v5491_v5, %v8228_v45  ;;  %v4489_v27 = vpop.f32.mrb[73].mxu0 }
 0xb95   :  { %v4490_v33 = vadd.f32 %v8228_v45, %v4489_v27  ;;  %v5492_v49 = vpop.f32.mrb[74].mxu0  ;;  %5541 = vmatprep.mubr.bf16.mxu0 %v4588_v50 }
 0xb96   :  { %v4501_v26 = vadd.f32 %v5492_v49, %v8228_v45  ;;  %v4492_v8 = vpop.f32.mrb[75].mxu0  ;;  %5542 = vmatmul.mubr.bf16.gmra.mrb[108].mxu0 %v4589_v57  ;;  %v4566_v46 = vmax.f32 %v4498_v3, 0.0 }
 0xb97   :  { %v4493_v52 = vadd.f32 %v8228_v45, %v4492_v8  ;;  %v4564_v56 = vmax.f32 %v4490_v33, 0.0 }
 0xb98   :  { %v4567_v55 = vmax.f32 %v4501_v26, 0.0 }
 0xb99   :  { %v4565_v59 = vmax.f32 %v4493_v52, 0.0 }
 0xb9a   :  { %v4591_v48 = vpack.c.bf16 %v4567_v55, %v4566_v46 }
 0xb9b   :  { %v4590_v32 = vpack.c.bf16 %v4565_v59, %v4564_v56  ;;  %v5495_v35 = vpop.f32.mrb[76].mxu0 }
 0xb9c   :  { %v4514_v60 = vadd.f32 %v5495_v35, %v8228_v45  ;;  %v4505_v51 = vpop.f32.mrb[77].mxu0 }
 0xb9d   :  { %v4506_v13 = vadd.f32 %v8228_v45, %v4505_v51  ;;  %v5496_v30 = vpop.f32.mrb[78].mxu0  ;;  %5545 = vmatprep.mubr.bf16.mxu0 %v4590_v32 }
 0xb9e   :  { %v4517_v37 = vadd.f32 %v5496_v30, %v8228_v45  ;;  %v4508_v28 = vpop.f32.mrb[79].mxu0  ;;  %5546 = vmatmul.mubr.bf16.gmra.mrb[112].mxu0 %v4591_v48  ;;  %v4570_v29 = vmax.f32 %v4514_v60, 0.0 }
 0xb9f   :  { %v4509_v25 = vadd.f32 %v8228_v45, %v4508_v28  ;;  %v4568_v12 = vmax.f32 %v4506_v13, 0.0 }
 0xba0   :  { %v4571_v54 = vmax.f32 %v4517_v37, 0.0 }
 0xba1   :  { %v4569_v63 = vmax.f32 %v4509_v25, 0.0 }
 0xba2   :  { %v4593_v4 = vpack.c.bf16 %v4571_v54, %v4570_v29 }
 0xba3   :  { %v4592_v7 = vpack.c.bf16 %v4569_v63, %v4568_v12  ;;  %v5499_v16 = vpop.f32.mrb[80].mxu0 }
 0xba4   :  { %v4530_v44 = vadd.f32 %v5499_v16, %v8228_v45  ;;  %v4521_v11 = vpop.f32.mrb[81].mxu0 }
 0xba5   :  { %v4522_v42 = vadd.f32 %v8228_v45, %v4521_v11  ;;  %v5500_v2 = vpop.f32.mrb[82].mxu0  ;;  %5549 = vmatprep.mubr.bf16.mxu0 %v4592_v7 }
 0xba6   :  { %v4533_v15 = vadd.f32 %v5500_v2, %v8228_v45  ;;  %v4524_v21 = vpop.f32.mrb[83].mxu0  ;;  %5550 = vmatmul.mubr.bf16.gmra.mrb[116].mxu0 %v4593_v4  ;;  %v4574_v19 = vmax.f32 %v4530_v44, 0.0 }
 0xba7   :  { %v4525_v9 = vadd.f32 %v8228_v45, %v4524_v21  ;;  %v4572_v62 = vmax.f32 %v4522_v42, 0.0 }
 0xba8   :  { %v4575_v17 = vmax.f32 %v4533_v15, 0.0 }
 0xba9   :  { %v4573_v1 = vmax.f32 %v4525_v9, 0.0 }
 0xbaa   :  { %v4595_v43 = vpack.c.bf16 %v4575_v17, %v4574_v19 }
 0xbab   :  { %v4594_v14 = vpack.c.bf16 %v4573_v1, %v4572_v62 }
 0xbad   :  { %5553 = vmatprep.mubr.bf16.mxu0 %v4594_v14 }
 0xbae   :  { %5554 = vmatmul.mubr.bf16.gmra.mrb[120].mxu0 %v4595_v43 }
 0xc39   :  { %v5519_v0 = vpop.f32.mrb[84].mxu0 }
 0xc3a   :  { %v4710_v40 = vadd.f32 %v5519_v0, %v8270_v47  ;;  %v4701_v22 = vpop.f32.mrb[85].mxu0 }
 0xc3b   :  { %v4702_v31 = vadd.f32 %v8270_v47, %v4701_v22  ;;  %v5520_v41 = vpop.f32.mrb[86].mxu0 }
 0xc3c   :  { %4862 = vst [vmem:[#allocation29 + $0x10] sm:$0xff] %v4710_v40  ;;  %v4713_v45 = vadd.f32 %v5520_v41, %v8270_v47  ;;  %v4704_v23 = vpop.f32.mrb[87].mxu0 }
 0xc3d   :  { %4860 = vst [vmem:[#allocation29] sm:$0xff] %v4702_v31  ;;  %v4705_v36 = vadd.f32 %v8270_v47, %v4704_v23 }
 0xc3e   :  { %4863 = vst [vmem:[#allocation29 + $0x18] sm:$0xff] %v4713_v45 }
 0xc3f   :  { %4861 = vst [vmem:[#allocation29 + $0x8] sm:$0xff] %v4705_v36 }
 0xc41   :  { %v5523_v53 = vpop.f32.mrb[88].mxu0 }
 0xc42   :  { %v4726_v58 = vadd.f32 %v5523_v53, %v8270_v47  ;;  %v4717_v20 = vpop.f32.mrb[89].mxu0 }
 0xc43   :  { %v4718_v18 = vadd.f32 %v8270_v47, %v4717_v20  ;;  %v5524_v61 = vpop.f32.mrb[90].mxu0 }
 0xc44   :  { %4866 = vst [vmem:[#allocation29 + $0x30] sm:$0xff] %v4726_v58  ;;  %v4729_v6 = vadd.f32 %v5524_v61, %v8270_v47  ;;  %v4720_v39 = vpop.f32.mrb[91].mxu0 }
 0xc45   :  { %4864 = vst [vmem:[#allocation29 + $0x20] sm:$0xff] %v4718_v18  ;;  %v4721_v34 = vadd.f32 %v8270_v47, %v4720_v39 }
 0xc46   :  { %4867 = vst [vmem:[#allocation29 + $0x38] sm:$0xff] %v4729_v6 }
 0xc47   :  { %4865 = vst [vmem:[#allocation29 + $0x28] sm:$0xff] %v4721_v34 }
 0xc49   :  { %v5527_v10 = vpop.f32.mrb[92].mxu0 }
 0xc4a   :  { %v4742_v24 = vadd.f32 %v5527_v10, %v8270_v47  ;;  %v4733_v38 = vpop.f32.mrb[93].mxu0 }
 0xc4b   :  { %v4734_v57 = vadd.f32 %v8270_v47, %v4733_v38  ;;  %v5528_v50 = vpop.f32.mrb[94].mxu0 }
 0xc4c   :  { %4870 = vst [vmem:[#allocation29 + $0x50] sm:$0xff] %v4742_v24  ;;  %v4745_v5 = vadd.f32 %v5528_v50, %v8270_v47  ;;  %v4736_v3 = vpop.f32.mrb[95].mxu0 }
 0xc4d   :  { %4868 = vst [vmem:[#allocation29 + $0x40] sm:$0xff] %v4734_v57  ;;  %v4737_v27 = vadd.f32 %v8270_v47, %v4736_v3 }
 0xc4e   :  { %4871 = vst [vmem:[#allocation29 + $0x58] sm:$0xff] %v4745_v5 }
 0xc4f   :  { %4869 = vst [vmem:[#allocation29 + $0x48] sm:$0xff] %v4737_v27 }
 0xc51   :  { %v5531_v33 = vpop.f32.mrb[96].mxu0 }
 0xc52   :  { %v4758_v49 = vadd.f32 %v5531_v33, %v8270_v47  ;;  %v4749_v26 = vpop.f32.mrb[97].mxu0 }
 0xc53   :  { %v4750_v8 = vadd.f32 %v8270_v47, %v4749_v26  ;;  %v5532_v52 = vpop.f32.mrb[98].mxu0 }
 0xc54   :  { %4874 = vst [vmem:[#allocation29 + $0x70] sm:$0xff] %v4758_v49  ;;  %v4761_v46 = vadd.f32 %v5532_v52, %v8270_v47  ;;  %v4752_v55 = vpop.f32.mrb[99].mxu0 }
 0xc55   :  { %4872 = vst [vmem:[#allocation29 + $0x60] sm:$0xff] %v4750_v8  ;;  %v4753_v56 = vadd.f32 %v8270_v47, %v4752_v55 }
 0xc56   :  { %4875 = vst [vmem:[#allocation29 + $0x78] sm:$0xff] %v4761_v46 }
 0xc57   :  { %4873 = vst [vmem:[#allocation29 + $0x68] sm:$0xff] %v4753_v56 }
 0xc59   :  { %v5535_v59 = vpop.f32.mrb[100].mxu0 }
 0xc5a   :  { %v4774_v48 = vadd.f32 %v5535_v59, %v8270_v47  ;;  %v4765_v32 = vpop.f32.mrb[101].mxu0 }
 0xc5b   :  { %v4766_v35 = vadd.f32 %v8270_v47, %v4765_v32  ;;  %v5536_v60 = vpop.f32.mrb[102].mxu0 }
 0xc5c   :  { %4878 = vst [vmem:[#allocation29 + $0x90] sm:$0xff] %v4774_v48  ;;  %v4777_v51 = vadd.f32 %v5536_v60, %v8270_v47  ;;  %v4768_v13 = vpop.f32.mrb[103].mxu0 }
 0xc5d   :  { %4876 = vst [vmem:[#allocation29 + $0x80] sm:$0xff] %v4766_v35  ;;  %v4769_v30 = vadd.f32 %v8270_v47, %v4768_v13 }
 0xc5e   :  { %4879 = vst [vmem:[#allocation29 + $0x98] sm:$0xff] %v4777_v51 }
 0xc5f   :  { %4877 = vst [vmem:[#allocation29 + $0x88] sm:$0xff] %v4769_v30 }
 0xc61   :  { %v5539_v37 = vpop.f32.mrb[104].mxu0 }
 0xc62   :  { %v4790_v28 = vadd.f32 %v5539_v37, %v8270_v47  ;;  %v4781_v25 = vpop.f32.mrb[105].mxu0 }
 0xc63   :  { %v4782_v29 = vadd.f32 %v8270_v47, %v4781_v25  ;;  %v5540_v54 = vpop.f32.mrb[106].mxu0 }
 0xc64   :  { %4882 = vst [vmem:[#allocation29 + $0xb0] sm:$0xff] %v4790_v28  ;;  %v4793_v12 = vadd.f32 %v5540_v54, %v8270_v47  ;;  %v4784_v63 = vpop.f32.mrb[107].mxu0 }
 0xc65   :  { %4880 = vst [vmem:[#allocation29 + $0xa0] sm:$0xff] %v4782_v29  ;;  %v4785_v4 = vadd.f32 %v8270_v47, %v4784_v63 }
 0xc66   :  { %4883 = vst [vmem:[#allocation29 + $0xb8] sm:$0xff] %v4793_v12 }
 0xc67   :  { %4881 = vst [vmem:[#allocation29 + $0xa8] sm:$0xff] %v4785_v4 }
 0xc69   :  { %v5543_v7 = vpop.f32.mrb[108].mxu0 }
 0xc6a   :  { %v4806_v16 = vadd.f32 %v5543_v7, %v8270_v47  ;;  %v4797_v44 = vpop.f32.mrb[109].mxu0 }
 0xc6b   :  { %v4798_v11 = vadd.f32 %v8270_v47, %v4797_v44  ;;  %v5544_v42 = vpop.f32.mrb[110].mxu0 }
 0xc6c   :  { %4886 = vst [vmem:[#allocation29 + $0xd0] sm:$0xff] %v4806_v16  ;;  %v4809_v2 = vadd.f32 %v5544_v42, %v8270_v47  ;;  %v4800_v15 = vpop.f32.mrb[111].mxu0 }
 0xc6d   :  { %4884 = vst [vmem:[#allocation29 + $0xc0] sm:$0xff] %v4798_v11  ;;  %v4801_v21 = vadd.f32 %v8270_v47, %v4800_v15 }
 0xc6e   :  { %4887 = vst [vmem:[#allocation29 + $0xd8] sm:$0xff] %v4809_v2 }
 0xc6f   :  { %4885 = vst [vmem:[#allocation29 + $0xc8] sm:$0xff] %v4801_v21 }
 0xc71   :  { %v5547_v9 = vpop.f32.mrb[112].mxu0 }
 0xc72   :  { %v4822_v19 = vadd.f32 %v5547_v9, %v8270_v47  ;;  %v4813_v17 = vpop.f32.mrb[113].mxu0 }
 0xc73   :  { %v4814_v62 = vadd.f32 %v8270_v47, %v4813_v17  ;;  %v5548_v1 = vpop.f32.mrb[114].mxu0 }
 0xc74   :  { %4890 = vst [vmem:[#allocation29 + $0xf0] sm:$0xff] %v4822_v19  ;;  %v4825_v43 = vadd.f32 %v5548_v1, %v8270_v47  ;;  %v4816_v14 = vpop.f32.mrb[115].mxu0 }
 0xc75   :  { %4888 = vst [vmem:[#allocation29 + $0xe0] sm:$0xff] %v4814_v62  ;;  %v4817_v0 = vadd.f32 %v8270_v47, %v4816_v14 }
 0xc76   :  { %4891 = vst [vmem:[#allocation29 + $0xf8] sm:$0xff] %v4825_v43 }
 0xc77   :  { %4889 = vst [vmem:[#allocation29 + $0xe8] sm:$0xff] %v4817_v0 }
 0xc79   :  { %v5551_v40 = vpop.f32.mrb[116].mxu0 }
 0xc7a   :  { %v4838_v22 = vadd.f32 %v5551_v40, %v8270_v47  ;;  %v4829_v31 = vpop.f32.mrb[117].mxu0 }
 0xc7b   :  { %v4830_v41 = vadd.f32 %v8270_v47, %v4829_v31  ;;  %v5552_v45 = vpop.f32.mrb[118].mxu0 }
 0xc7c   :  { %4894 = vst [vmem:[#allocation29 + $0x110] sm:$0xff] %v4838_v22  ;;  %v4841_v23 = vadd.f32 %v5552_v45, %v8270_v47  ;;  %v4832_v36 = vpop.f32.mrb[119].mxu0 }
 0xc7d   :  { %4892 = vst [vmem:[#allocation29 + $0x100] sm:$0xff] %v4830_v41  ;;  %v4833_v53 = vadd.f32 %v8270_v47, %v4832_v36 }
 0xc7e   :  { %4895 = vst [vmem:[#allocation29 + $0x118] sm:$0xff] %v4841_v23 }
 0xc7f   :  { %4893 = vst [vmem:[#allocation29 + $0x108] sm:$0xff] %v4833_v53 }
 0xc81   :  { %v5555_v58 = vpop.f32.mrb[120].mxu0 }
 0xc82   :  { %v4854_v20 = vadd.f32 %v5555_v58, %v8270_v47  ;;  %v4845_v18 = vpop.f32.mrb[121].mxu0 }
 0xc83   :  { %v4846_v61 = vadd.f32 %v8270_v47, %v4845_v18  ;;  %v5556_v6 = vpop.f32.mrb[122].mxu0 }
 0xc84   :  { %4898 = vst [vmem:[#allocation29 + $0x130] sm:$0xff] %v4854_v20  ;;  %v4857_v39 = vadd.f32 %v5556_v6, %v8270_v47  ;;  %v4848_v34 = vpop.f32.mrb[123].mxu0 }
 0xc85   :  { %4896 = vst [vmem:[#allocation29 + $0x120] sm:$0xff] %v4846_v61  ;;  %v4849_v10 = vadd.f32 %v8270_v47, %v4848_v34 }
 0xc86   :  { %4899 = vst [vmem:[#allocation29 + $0x138] sm:$0xff] %v4857_v39 }
 0xc87   :  { %4897 = vst [vmem:[#allocation29 + $0x128] sm:$0xff] %v4849_v10 }
 0xc88   :  { %6338 = shalt.err (!%p6335_p0)
}
 0xc89   :  { %s8540_s5 = sld [smem:[#allocation82_spill]] }
 0xc8f   :  { %s6339_s18 = scalar_lea.hbm %s8540_s5, 5120 }
 0xc90   :  { %p6340_p1 = scmp.ne.s32.totalorder %s8540_s5, %s6339_s18  ;;  %p6343_p2 = scmp.lt.u32.totalorder %s6339_s18, %s8540_s5 }
 0xc92   :  { %p6345_p3 = pnand %p6343_p2, %p6340_p1 }
 0xc94   :  { %6348 = shalt.err (!%p6345_p3)
}
 0xc95   :  { %4911 = dma.vmem_to_hbm [thread:$0]  %s4906_s10, 5120, %s8540_s5, [#allocation4], %s6382_s15, %s6382_s15, %s6383_s25  }
 0xc96   :  { %6367 = dma.done.wait [#allocation4], 5120  }
 0xc97   :  { %6368 = vsyncadd [#allocation4], 4294962176 }
 0xc98   :  { %4915 = vsyncpa [#allocation3], 1 }
 0xc99   :  { %4916 = vsyncpa [#allocation6], 1 }
 0xc9a   :  { %4917 = vsyncpa [#allocation9], 1 }
 0xc9b   :  { %4918 = vsyncpa [#allocation12], 1 }
 0xc9c   :  { %4919 = vsyncpa [#allocation15], 1 }
 0xc9d   :  { %4920 = vsyncpa [#allocation18], 1 }
 0xc9e   :  { %4921 = vsyncpa [#allocation21], 1 }
 0xc9f   :  { %4922 = vsyncpa [#allocation24], 1 }
 0xca0   :  { %4923 = vsyncpa [#allocation27], 1 }
 0xca1   :  { %4924 = vsyncpa [#allocation4], 1 }

</bundles_post_ra>
